<compile_context>
chip_gen: v7x
topology: tpu7x:2x2x1
jax: 0.10.0
libtpu: 0.0.40
codegen_flags: <defaults>
</compile_context>

<pallas_src>
import jax
import jax.numpy as jnp
from jax import lax
from jax.experimental import pallas as pl
from jax.experimental.pallas import tpu as pltpu
import numpy as np

# small, self-consistent shapes
VOCAB = 20      # input_size (embedding rows / vocab)
H = 32          # hidden_size
OUT = 16        # output_size
SEQ = 8         # sequence length
N_LAYERS = 3
GP = 128        # lane-padded fused-gate width (3*H = 96 -> 128)


def gru_decoder_kernel(x_ref, h0_ref, wih_ref, whh_ref, bx_ref, bhn_ref,
                       wdec_ref, bdec_ref, out_ref, hn_ref, buf_ref, gx_ref):
    """Multi-layer GRU over the full sequence + linear decoder (all in VMEM).

    x_ref   : (SEQ, H)             embedded inputs
    h0_ref  : (N_LAYERS, H)        initial hidden state
    wih_ref : (N_LAYERS, H, GP)    fused + lane-padded input->hidden weights (x @ W)
    whh_ref : (N_LAYERS, H, GP)    fused + lane-padded hidden->hidden weights (h @ W)
    bx_ref  : (N_LAYERS, 1, GP)    [b_ir+b_hr | b_iz+b_hz | b_in | 0]
    bhn_ref : (N_LAYERS, 1, H)     b_hn (stays inside r*(...))
    wdec_ref: (H, OUT)             decoder weight, transposed
    bdec_ref: (1, OUT)
    out_ref : (SEQ, OUT)
    hn_ref  : (N_LAYERS, H)
    buf_ref : scratch (SEQ, H)     per-layer activations (updated in place)
    gx_ref  : scratch (SEQ, GP)    hoisted input-to-hidden gate pre-activations
    """
    seq, hidden = buf_ref.shape
    n_layers = h0_ref.shape[0]

    # layer-0 input = embedded tokens
    buf_ref[...] = x_ref[...]

    for layer in range(n_layers):  # static unroll over layers
        w_hh = whh_ref[layer]      # (H, GP)
        b_hn = bhn_ref[layer]      # (1, H)

        # Hoisted input-to-hidden half: one (SEQ,H)@(H,GP) matmul per layer,
        # with the summed r/z biases and b_in already folded in.
        gx_ref[...] = (jnp.dot(buf_ref[...], wih_ref[layer],
                               preferred_element_type=jnp.float32)
                       + bx_ref[layer])

        h_init = h0_ref[pl.ds(layer, 1), :]  # (1, H)

        def step(t, h, w_hh=w_hh, b_hn=b_hn):
            gx = gx_ref[pl.ds(t, 1), :]                                   # (1, GP)
            gh = jnp.dot(h, w_hh, preferred_element_type=jnp.float32)     # (1, GP)
            r = jax.nn.sigmoid(gx[:, 0:hidden] + gh[:, 0:hidden])
            z = jax.nn.sigmoid(gx[:, hidden:2 * hidden] + gh[:, hidden:2 * hidden])
            n = jnp.tanh(gx[:, 2 * hidden:3 * hidden]
                         + r * (gh[:, 2 * hidden:3 * hidden] + b_hn))
            h_new = (1.0 - z) * n + z * h
            # this layer's output at time t becomes next layer's input
            buf_ref[pl.ds(t, 1), :] = h_new
            return h_new

        # SEQ is tiny & static -> fully unroll so the LLO scheduler can overlap
        # MXU/EUP latency of step t with the VPU combine/store of step t-1.
        h_last = lax.fori_loop(0, seq, step, h_init, unroll=True)
        hn_ref[pl.ds(layer, 1), :] = h_last

    # decoder: (SEQ, H) @ (H, OUT) + (1, OUT)
    out_ref[...] = (jnp.dot(buf_ref[...], wdec_ref[...],
                            preferred_element_type=jnp.float32)
                    + bdec_ref[...])


def pack_params(params):
    """One-time weight packing (kept OUT of the per-call forward path)."""
    wih_l, whh_l, bx_l, bhn_l = [], [], [], []
    for l in range(N_LAYERS):
        wih = jnp.concatenate([params[f"w_i{g}_l{l}"].T for g in "rzn"], axis=1)  # (H, 3H)
        whh = jnp.concatenate([params[f"w_h{g}_l{l}"].T for g in "rzn"], axis=1)  # (H, 3H)
        wih = jnp.pad(wih, ((0, 0), (0, GP - 3 * H)))                             # (H, GP)
        whh = jnp.pad(whh, ((0, 0), (0, GP - 3 * H)))                             # (H, GP)
        bx = jnp.concatenate([
            params[f"b_ir_l{l}"] + params[f"b_hr_l{l}"],
            params[f"b_iz_l{l}"] + params[f"b_hz_l{l}"],
            params[f"b_in_l{l}"],
        ])                                                                        # (3H,)
        bx = jnp.pad(bx, (0, GP - 3 * H))[None, :]                                # (1, GP)
        bhn = params[f"b_hn_l{l}"][None, :]                                       # (1, H)
        wih_l.append(wih); whh_l.append(whh); bx_l.append(bx); bhn_l.append(bhn)
    packed = {
        "embedding": params["embedding"],
        "wih": jnp.stack(wih_l),         # (NL, H, GP)
        "whh": jnp.stack(whh_l),         # (NL, H, GP)
        "bx":  jnp.stack(bx_l),          # (NL, 1, GP)
        "bhn": jnp.stack(bhn_l),         # (NL, 1, H)
        "wdec": params["dec_w"].T,       # (H, OUT)
        "bdec": params["dec_b"][None, :],  # (1, OUT)
    }
    # materialize once so the forward path only sees ready-to-use device arrays
    return jax.tree_util.tree_map(jnp.asarray, packed)


def rnn_forward(tokens, hidden, packed):
    """Pallas-backed equivalent of RNN.forward(input, hidden)."""
    x = packed["embedding"][tokens]                 # (SEQ, H)  -- glue gather
    vmem = pl.BlockSpec(memory_space=pltpu.MemorySpace.VMEM)
    out, hn = pl.pallas_call(
        gru_decoder_kernel,
        out_shape=(jax.ShapeDtypeStruct((SEQ, OUT), jnp.float32),
                   jax.ShapeDtypeStruct((N_LAYERS, H), jnp.float32)),
        in_specs=[vmem] * 8,
        out_specs=(vmem, vmem),
        scratch_shapes=[pltpu.VMEM((SEQ, H), jnp.float32),
                        pltpu.VMEM((SEQ, GP), jnp.float32)],
    )(x, hidden, packed["wih"], packed["whh"], packed["bx"], packed["bhn"],
      packed["wdec"], packed["bdec"])
    return out, hn


# ---------------- pure-JAX reference (torch GRU semantics) ----------------
def rnn_reference(tokens, hidden, params):
    x = params["embedding"][tokens]
    layer_in = x
    hn = []
    for l in range(N_LAYERS):
        h = hidden[l]
        outs = []
        for t in range(SEQ):
            xt = layer_in[t]
            r = jax.nn.sigmoid(params[f"w_ir_l{l}"] @ xt + params[f"b_ir_l{l}"]
                               + params[f"w_hr_l{l}"] @ h + params[f"b_hr_l{l}"])
            z = jax.nn.sigmoid(params[f"w_iz_l{l}"] @ xt + params[f"b_iz_l{l}"]
                               + params[f"w_hz_l{l}"] @ h + params[f"b_hz_l{l}"])
            n = jnp.tanh(params[f"w_in_l{l}"] @ xt + params[f"b_in_l{l}"]
                         + r * (params[f"w_hn_l{l}"] @ h + params[f"b_hn_l{l}"]))
            h = (1.0 - z) * n + z * h
            outs.append(h)
        layer_in = jnp.stack(outs)
        hn.append(h)
    out = layer_in @ params["dec_w"].T + params["dec_b"]
    return out, jnp.stack(hn)


def init_params(key):
    params = {}
    k = jax.random.split(key, 2 + N_LAYERS * 12 + 2)
    ki = iter(k)
    params["embedding"] = jax.random.normal(next(ki), (VOCAB, H), jnp.float32)
    scale = 1.0 / np.sqrt(H)
    for l in range(N_LAYERS):
        for g in "rzn":
            params[f"w_i{g}_l{l}"] = jax.random.uniform(next(ki), (H, H), jnp.float32, -scale, scale)
            params[f"w_h{g}_l{l}"] = jax.random.uniform(next(ki), (H, H), jnp.float32, -scale, scale)
            params[f"b_i{g}_l{l}"] = jax.random.uniform(next(ki), (H,), jnp.float32, -scale, scale)
            params[f"b_h{g}_l{l}"] = jax.random.uniform(next(ki), (H,), jnp.float32, -scale, scale)
    params["dec_w"] = jax.random.uniform(next(ki), (OUT, H), jnp.float32, -scale, scale)
    params["dec_b"] = jax.random.uniform(next(ki), (OUT,), jnp.float32, -scale, scale)
    return params


if __name__ == "__main__":
    key = jax.random.PRNGKey(0)
    pkey, tkey = jax.random.split(key)
    params = init_params(pkey)
    packed = pack_params(params)                     # one-time packing (not in hot path)
    tokens = jax.random.randint(tkey, (SEQ,), 0, VOCAB, dtype=jnp.int32)
    hidden = jnp.zeros((N_LAYERS, H), jnp.float32)   # RNN.init_hidden()

    out, hn = jax.jit(rnn_forward)(tokens, hidden, packed)
    jax.block_until_ready((out, hn))

    out_ref, hn_ref = rnn_reference(tokens, hidden, params)
    np.testing.assert_allclose(np.asarray(out), np.asarray(out_ref), rtol=1e-4, atol=1e-4)
    np.testing.assert_allclose(np.asarray(hn), np.asarray(hn_ref), rtol=1e-4, atol=1e-4)

    print("KERNEL_OK")
</pallas_src>

<mosaic_0001>
module attributes {stable_mosaic.version = 11 : i64} {
  func.func @gru_decoder_kernel(%arg0: memref<8x32xf32, #tpu.memory_space<vmem>>, %arg1: memref<3x32xf32, #tpu.memory_space<vmem>>, %arg2: memref<3x32x128xf32, #tpu.memory_space<vmem>>, %arg3: memref<3x32x128xf32, #tpu.memory_space<vmem>>, %arg4: memref<3x1x128xf32, #tpu.memory_space<vmem>>, %arg5: memref<3x1x32xf32, #tpu.memory_space<vmem>>, %arg6: memref<32x16xf32, #tpu.memory_space<vmem>>, %arg7: memref<1x16xf32, #tpu.memory_space<vmem>>, %arg8: memref<8x16xf32, #tpu.memory_space<vmem>>, %arg9: memref<3x32xf32, #tpu.memory_space<vmem>>, %arg10: memref<8x32xf32, #tpu.memory_space<vmem>>, %arg11: memref<8x128xf32, #tpu.memory_space<vmem>>) attributes {dimension_semantics = [], scalar_prefetch = 0 : i64, scratch_operands = 2 : i64, tpu.core_type = #tpu.core_type<tc>} {
    %c0 = arith.constant 0 : index
    %c0_0 = arith.constant 0 : index
    %0 = vector.load %arg0[%c0, %c0_0] : memref<8x32xf32, #tpu.memory_space<vmem>>, vector<8x32xf32>
    %c0_1 = arith.constant 0 : index
    %c0_2 = arith.constant 0 : index
    %1 = vector.load %arg10[%c0_1, %c0_2] : memref<8x32xf32, #tpu.memory_space<vmem>>, vector<8x32xf32>
    tpu.vector_store %arg10[%c0_1, %c0_2], %0 {strides = array<i32>} : memref<8x32xf32, #tpu.memory_space<vmem>>, vector<8x32xf32>,
    %c0_3 = arith.constant 0 : index
    %c0_4 = arith.constant 0 : index
    %c0_5 = arith.constant 0 : index
    %2 = vector.load %arg3[%c0_3, %c0_4, %c0_5] : memref<3x32x128xf32, #tpu.memory_space<vmem>>, vector<1x32x128xf32>
    %3 = vector.shape_cast %2 : vector<1x32x128xf32> to vector<32x128xf32>
    %c0_6 = arith.constant 0 : index
    %c0_7 = arith.constant 0 : index
    %c0_8 = arith.constant 0 : index
    %4 = vector.load %arg5[%c0_6, %c0_7, %c0_8] : memref<3x1x32xf32, #tpu.memory_space<vmem>>, vector<1x1x32xf32>
    %5 = vector.shape_cast %4 : vector<1x1x32xf32> to vector<1x32xf32>
    %c0_9 = arith.constant 0 : index
    %c0_10 = arith.constant 0 : index
    %6 = vector.load %arg10[%c0_9, %c0_10] : memref<8x32xf32, #tpu.memory_space<vmem>>, vector<8x32xf32>
    %c0_11 = arith.constant 0 : index
    %c0_12 = arith.constant 0 : index
    %c0_13 = arith.constant 0 : index
    %7 = vector.load %arg2[%c0_11, %c0_12, %c0_13] : memref<3x32x128xf32, #tpu.memory_space<vmem>>, vector<1x32x128xf32>
    %8 = vector.shape_cast %7 : vector<1x32x128xf32> to vector<32x128xf32>
    %cst = arith.constant dense<0.000000e+00> : vector<8x128xf32>
    %9 = tpu.matmul %6, %8, %cst {dimension_numbers = #tpu.dot_dimension_numbers<[1], [0], [0], [1], [0, 0, 1, 1], [], []>} : vector<8x32xf32>, vector<32x128xf32>, vector<8x128xf32> -> vector<8x128xf32>
    %c0_14 = arith.constant 0 : index
    %c0_15 = arith.constant 0 : index
    %c0_16 = arith.constant 0 : index
    %10 = vector.load %arg4[%c0_14, %c0_15, %c0_16] : memref<3x1x128xf32, #tpu.memory_space<vmem>>, vector<1x1x128xf32>
    %11 = vector.shape_cast %10 : vector<1x1x128xf32> to vector<1x128xf32>
    %12 = vector.broadcast %11 : vector<1x128xf32> to vector<8x128xf32>
    %13 = arith.addf %9, %12 : vector<8x128xf32>
    %c0_17 = arith.constant 0 : index
    %c0_18 = arith.constant 0 : index
    %14 = vector.load %arg11[%c0_17, %c0_18] : memref<8x128xf32, #tpu.memory_space<vmem>>, vector<8x128xf32>
    tpu.vector_store %arg11[%c0_17, %c0_18], %13 {strides = array<i32>} : memref<8x128xf32, #tpu.memory_space<vmem>>, vector<8x128xf32>,
    %c0_19 = arith.constant 0 : index
    %c0_20 = arith.constant 0 : index
    %15 = vector.load %arg1[%c0_19, %c0_20] : memref<3x32xf32, #tpu.memory_space<vmem>>, vector<1x32xf32>
    %c0_i32 = arith.constant 0 : i32
    %16 = arith.index_cast %c0_i32 : i32 to index
    %c0_21 = arith.constant 0 : index
    %17 = vector.load %arg11[%16, %c0_21] : memref<8x128xf32, #tpu.memory_space<vmem>>, vector<1x128xf32>
    %cst_22 = arith.constant dense<0.000000e+00> : vector<1x128xf32>
    %18 = tpu.matmul %15, %3, %cst_22 {dimension_numbers = #tpu.dot_dimension_numbers<[1], [0], [0], [1], [0, 0, 1, 1], [], []>} : vector<1x32xf32>, vector<32x128xf32>, vector<1x128xf32> -> vector<1x128xf32>
    %19 = vector.extract_strided_slice %17 {offsets = [0, 0], sizes = [1, 32], strides = [1, 1]} : vector<1x128xf32> to vector<1x32xf32>
    %20 = vector.extract_strided_slice %18 {offsets = [0, 0], sizes = [1, 32], strides = [1, 1]} : vector<1x128xf32> to vector<1x32xf32>
    %21 = arith.addf %19, %20 : vector<1x32xf32>
    %22 = arith.negf %21 : vector<1x32xf32>
    %23 = math.exp %22 : vector<1x32xf32>
    %cst_23 = arith.constant 1.000000e+00 : f32
    %24 = vector.broadcast %cst_23 : f32 to vector<1x32xf32>
    %25 = arith.addf %24, %23 : vector<1x32xf32>
    %26 = arith.divf %24, %25 : vector<1x32xf32>
    %27 = vector.extract_strided_slice %17 {offsets = [0, 32], sizes = [1, 32], strides = [1, 1]} : vector<1x128xf32> to vector<1x32xf32>
    %28 = vector.extract_strided_slice %18 {offsets = [0, 32], sizes = [1, 32], strides = [1, 1]} : vector<1x128xf32> to vector<1x32xf32>
    %29 = arith.addf %27, %28 : vector<1x32xf32>
    %30 = arith.negf %29 : vector<1x32xf32>
    %31 = math.exp %30 : vector<1x32xf32>
    %cst_24 = arith.constant 1.000000e+00 : f32
    %32 = vector.broadcast %cst_24 : f32 to vector<1x32xf32>
    %33 = arith.addf %32, %31 : vector<1x32xf32>
    %34 = arith.divf %32, %33 : vector<1x32xf32>
    %35 = vector.extract_strided_slice %17 {offsets = [0, 64], sizes = [1, 32], strides = [1, 1]} : vector<1x128xf32> to vector<1x32xf32>
    %36 = vector.extract_strided_slice %18 {offsets = [0, 64], sizes = [1, 32], strides = [1, 1]} : vector<1x128xf32> to vector<1x32xf32>
    %37 = arith.addf %36, %5 : vector<1x32xf32>
    %38 = arith.mulf %26, %37 : vector<1x32xf32>
    %39 = arith.addf %35, %38 : vector<1x32xf32>
    %40 = math.tanh %39 : vector<1x32xf32>
    %cst_25 = arith.constant 1.000000e+00 : f32
    %41 = vector.broadcast %cst_25 : f32 to vector<1x32xf32>
    %42 = arith.subf %41, %34 : vector<1x32xf32>
    %43 = arith.mulf %42, %40 : vector<1x32xf32>
    %44 = arith.mulf %34, %15 : vector<1x32xf32>
    %45 = arith.addf %43, %44 : vector<1x32xf32>
    %46 = arith.index_cast %c0_i32 : i32 to index
    %c0_26 = arith.constant 0 : index
    %47 = vector.load %arg10[%46, %c0_26] : memref<8x32xf32, #tpu.memory_space<vmem>>, vector<1x32xf32>
    tpu.vector_store %arg10[%46, %c0_26], %45 {strides = array<i32>} : memref<8x32xf32, #tpu.memory_space<vmem>>, vector<1x32xf32>,
    %c1_i32 = arith.constant 1 : i32
    %48 = arith.index_cast %c1_i32 : i32 to index
    %c0_27 = arith.constant 0 : index
    %49 = vector.load %arg11[%48, %c0_27] : memref<8x128xf32, #tpu.memory_space<vmem>>, vector<1x128xf32>
    %cst_28 = arith.constant dense<0.000000e+00> : vector<1x128xf32>
    %50 = tpu.matmul %45, %3, %cst_28 {dimension_numbers = #tpu.dot_dimension_numbers<[1], [0], [0], [1], [0, 0, 1, 1], [], []>} : vector<1x32xf32>, vector<32x128xf32>, vector<1x128xf32> -> vector<1x128xf32>
    %51 = vector.extract_strided_slice %49 {offsets = [0, 0], sizes = [1, 32], strides = [1, 1]} : vector<1x128xf32> to vector<1x32xf32>
    %52 = vector.extract_strided_slice %50 {offsets = [0, 0], sizes = [1, 32], strides = [1, 1]} : vector<1x128xf32> to vector<1x32xf32>
    %53 = arith.addf %51, %52 : vector<1x32xf32>
    %54 = arith.negf %53 : vector<1x32xf32>
    %55 = math.exp %54 : vector<1x32xf32>
    %cst_29 = arith.constant 1.000000e+00 : f32
    %56 = vector.broadcast %cst_29 : f32 to vector<1x32xf32>
    %57 = arith.addf %56, %55 : vector<1x32xf32>
    %58 = arith.divf %56, %57 : vector<1x32xf32>
    %59 = vector.extract_strided_slice %49 {offsets = [0, 32], sizes = [1, 32], strides = [1, 1]} : vector<1x128xf32> to vector<1x32xf32>
    %60 = vector.extract_strided_slice %50 {offsets = [0, 32], sizes = [1, 32], strides = [1, 1]} : vector<1x128xf32> to vector<1x32xf32>
    %61 = arith.addf %59, %60 : vector<1x32xf32>
    %62 = arith.negf %61 : vector<1x32xf32>
    %63 = math.exp %62 : vector<1x32xf32>
    %cst_30 = arith.constant 1.000000e+00 : f32
    %64 = vector.broadcast %cst_30 : f32 to vector<1x32xf32>
    %65 = arith.addf %64, %63 : vector<1x32xf32>
    %66 = arith.divf %64, %65 : vector<1x32xf32>
    %67 = vector.extract_strided_slice %49 {offsets = [0, 64], sizes = [1, 32], strides = [1, 1]} : vector<1x128xf32> to vector<1x32xf32>
    %68 = vector.extract_strided_slice %50 {offsets = [0, 64], sizes = [1, 32], strides = [1, 1]} : vector<1x128xf32> to vector<1x32xf32>
    %69 = arith.addf %68, %5 : vector<1x32xf32>
    %70 = arith.mulf %58, %69 : vector<1x32xf32>
    %71 = arith.addf %67, %70 : vector<1x32xf32>
    %72 = math.tanh %71 : vector<1x32xf32>
    %cst_31 = arith.constant 1.000000e+00 : f32
    %73 = vector.broadcast %cst_31 : f32 to vector<1x32xf32>
    %74 = arith.subf %73, %66 : vector<1x32xf32>
    %75 = arith.mulf %74, %72 : vector<1x32xf32>
    %76 = arith.mulf %66, %45 : vector<1x32xf32>
    %77 = arith.addf %75, %76 : vector<1x32xf32>
    %78 = arith.index_cast %c1_i32 : i32 to index
    %c0_32 = arith.constant 0 : index
    %79 = vector.load %arg10[%78, %c0_32] : memref<8x32xf32, #tpu.memory_space<vmem>>, vector<1x32xf32>
    tpu.vector_store %arg10[%78, %c0_32], %77 {strides = array<i32>} : memref<8x32xf32, #tpu.memory_space<vmem>>, vector<1x32xf32>,
    %c2_i32 = arith.constant 2 : i32
    %80 = arith.index_cast %c2_i32 : i32 to index
    %c0_33 = arith.constant 0 : index
    %81 = vector.load %arg11[%80, %c0_33] : memref<8x128xf32, #tpu.memory_space<vmem>>, vector<1x128xf32>
    %cst_34 = arith.constant dense<0.000000e+00> : vector<1x128xf32>
    %82 = tpu.matmul %77, %3, %cst_34 {dimension_numbers = #tpu.dot_dimension_numbers<[1], [0], [0], [1], [0, 0, 1, 1], [], []>} : vector<1x32xf32>, vector<32x128xf32>, vector<1x128xf32> -> vector<1x128xf32>
    %83 = vector.extract_strided_slice %81 {offsets = [0, 0], sizes = [1, 32], strides = [1, 1]} : vector<1x128xf32> to vector<1x32xf32>
    %84 = vector.extract_strided_slice %82 {offsets = [0, 0], sizes = [1, 32], strides = [1, 1]} : vector<1x128xf32> to vector<1x32xf32>
    %85 = arith.addf %83, %84 : vector<1x32xf32>
    %86 = arith.negf %85 : vector<1x32xf32>
    %87 = math.exp %86 : vector<1x32xf32>
    %cst_35 = arith.constant 1.000000e+00 : f32
    %88 = vector.broadcast %cst_35 : f32 to vector<1x32xf32>
    %89 = arith.addf %88, %87 : vector<1x32xf32>
    %90 = arith.divf %88, %89 : vector<1x32xf32>
    %91 = vector.extract_strided_slice %81 {offsets = [0, 32], sizes = [1, 32], strides = [1, 1]} : vector<1x128xf32> to vector<1x32xf32>
    %92 = vector.extract_strided_slice %82 {offsets = [0, 32], sizes = [1, 32], strides = [1, 1]} : vector<1x128xf32> to vector<1x32xf32>
    %93 = arith.addf %91, %92 : vector<1x32xf32>
    %94 = arith.negf %93 : vector<1x32xf32>
    %95 = math.exp %94 : vector<1x32xf32>
    %cst_36 = arith.constant 1.000000e+00 : f32
    %96 = vector.broadcast %cst_36 : f32 to vector<1x32xf32>
    %97 = arith.addf %96, %95 : vector<1x32xf32>
    %98 = arith.divf %96, %97 : vector<1x32xf32>
    %99 = vector.extract_strided_slice %81 {offsets = [0, 64], sizes = [1, 32], strides = [1, 1]} : vector<1x128xf32> to vector<1x32xf32>
    %100 = vector.extract_strided_slice %82 {offsets = [0, 64], sizes = [1, 32], strides = [1, 1]} : vector<1x128xf32> to vector<1x32xf32>
    %101 = arith.addf %100, %5 : vector<1x32xf32>
    %102 = arith.mulf %90, %101 : vector<1x32xf32>
    %103 = arith.addf %99, %102 : vector<1x32xf32>
    %104 = math.tanh %103 : vector<1x32xf32>
    %cst_37 = arith.constant 1.000000e+00 : f32
    %105 = vector.broadcast %cst_37 : f32 to vector<1x32xf32>
    %106 = arith.subf %105, %98 : vector<1x32xf32>
    %107 = arith.mulf %106, %104 : vector<1x32xf32>
    %108 = arith.mulf %98, %77 : vector<1x32xf32>
    %109 = arith.addf %107, %108 : vector<1x32xf32>
    %110 = arith.index_cast %c2_i32 : i32 to index
    %c0_38 = arith.constant 0 : index
    %111 = vector.load %arg10[%110, %c0_38] : memref<8x32xf32, #tpu.memory_space<vmem>>, vector<1x32xf32>
    tpu.vector_store %arg10[%110, %c0_38], %109 {strides = array<i32>} : memref<8x32xf32, #tpu.memory_space<vmem>>, vector<1x32xf32>,
    %c3_i32 = arith.constant 3 : i32
    %112 = arith.index_cast %c3_i32 : i32 to index
    %c0_39 = arith.constant 0 : index
    %113 = vector.load %arg11[%112, %c0_39] : memref<8x128xf32, #tpu.memory_space<vmem>>, vector<1x128xf32>
    %cst_40 = arith.constant dense<0.000000e+00> : vector<1x128xf32>
    %114 = tpu.matmul %109, %3, %cst_40 {dimension_numbers = #tpu.dot_dimension_numbers<[1], [0], [0], [1], [0, 0, 1, 1], [], []>} : vector<1x32xf32>, vector<32x128xf32>, vector<1x128xf32> -> vector<1x128xf32>
    %115 = vector.extract_strided_slice %113 {offsets = [0, 0], sizes = [1, 32], strides = [1, 1]} : vector<1x128xf32> to vector<1x32xf32>
    %116 = vector.extract_strided_slice %114 {offsets = [0, 0], sizes = [1, 32], strides = [1, 1]} : vector<1x128xf32> to vector<1x32xf32>
    %117 = arith.addf %115, %116 : vector<1x32xf32>
    %118 = arith.negf %117 : vector<1x32xf32>
    %119 = math.exp %118 : vector<1x32xf32>
    %cst_41 = arith.constant 1.000000e+00 : f32
    %120 = vector.broadcast %cst_41 : f32 to vector<1x32xf32>
    %121 = arith.addf %120, %119 : vector<1x32xf32>
    %122 = arith.divf %120, %121 : vector<1x32xf32>
    %123 = vector.extract_strided_slice %113 {offsets = [0, 32], sizes = [1, 32], strides = [1, 1]} : vector<1x128xf32> to vector<1x32xf32>
    %124 = vector.extract_strided_slice %114 {offsets = [0, 32], sizes = [1, 32], strides = [1, 1]} : vector<1x128xf32> to vector<1x32xf32>
    %125 = arith.addf %123, %124 : vector<1x32xf32>
    %126 = arith.negf %125 : vector<1x32xf32>
    %127 = math.exp %126 : vector<1x32xf32>
    %cst_42 = arith.constant 1.000000e+00 : f32
    %128 = vector.broadcast %cst_42 : f32 to vector<1x32xf32>
    %129 = arith.addf %128, %127 : vector<1x32xf32>
    %130 = arith.divf %128, %129 : vector<1x32xf32>
    %131 = vector.extract_strided_slice %113 {offsets = [0, 64], sizes = [1, 32], strides = [1, 1]} : vector<1x128xf32> to vector<1x32xf32>
    %132 = vector.extract_strided_slice %114 {offsets = [0, 64], sizes = [1, 32], strides = [1, 1]} : vector<1x128xf32> to vector<1x32xf32>
    %133 = arith.addf %132, %5 : vector<1x32xf32>
    %134 = arith.mulf %122, %133 : vector<1x32xf32>
    %135 = arith.addf %131, %134 : vector<1x32xf32>
    %136 = math.tanh %135 : vector<1x32xf32>
    %cst_43 = arith.constant 1.000000e+00 : f32
    %137 = vector.broadcast %cst_43 : f32 to vector<1x32xf32>
    %138 = arith.subf %137, %130 : vector<1x32xf32>
    %139 = arith.mulf %138, %136 : vector<1x32xf32>
    %140 = arith.mulf %130, %109 : vector<1x32xf32>
    %141 = arith.addf %139, %140 : vector<1x32xf32>
    %142 = arith.index_cast %c3_i32 : i32 to index
    %c0_44 = arith.constant 0 : index
    %143 = vector.load %arg10[%142, %c0_44] : memref<8x32xf32, #tpu.memory_space<vmem>>, vector<1x32xf32>
    tpu.vector_store %arg10[%142, %c0_44], %141 {strides = array<i32>} : memref<8x32xf32, #tpu.memory_space<vmem>>, vector<1x32xf32>,
    %c4_i32 = arith.constant 4 : i32
    %144 = arith.index_cast %c4_i32 : i32 to index
    %c0_45 = arith.constant 0 : index
    %145 = vector.load %arg11[%144, %c0_45] : memref<8x128xf32, #tpu.memory_space<vmem>>, vector<1x128xf32>
    %cst_46 = arith.constant dense<0.000000e+00> : vector<1x128xf32>
    %146 = tpu.matmul %141, %3, %cst_46 {dimension_numbers = #tpu.dot_dimension_numbers<[1], [0], [0], [1], [0, 0, 1, 1], [], []>} : vector<1x32xf32>, vector<32x128xf32>, vector<1x128xf32> -> vector<1x128xf32>
    %147 = vector.extract_strided_slice %145 {offsets = [0, 0], sizes = [1, 32], strides = [1, 1]} : vector<1x128xf32> to vector<1x32xf32>
    %148 = vector.extract_strided_slice %146 {offsets = [0, 0], sizes = [1, 32], strides = [1, 1]} : vector<1x128xf32> to vector<1x32xf32>
    %149 = arith.addf %147, %148 : vector<1x32xf32>
    %150 = arith.negf %149 : vector<1x32xf32>
    %151 = math.exp %150 : vector<1x32xf32>
    %cst_47 = arith.constant 1.000000e+00 : f32
    %152 = vector.broadcast %cst_47 : f32 to vector<1x32xf32>
    %153 = arith.addf %152, %151 : vector<1x32xf32>
    %154 = arith.divf %152, %153 : vector<1x32xf32>
    %155 = vector.extract_strided_slice %145 {offsets = [0, 32], sizes = [1, 32], strides = [1, 1]} : vector<1x128xf32> to vector<1x32xf32>
    %156 = vector.extract_strided_slice %146 {offsets = [0, 32], sizes = [1, 32], strides = [1, 1]} : vector<1x128xf32> to vector<1x32xf32>
    %157 = arith.addf %155, %156 : vector<1x32xf32>
    %158 = arith.negf %157 : vector<1x32xf32>
    %159 = math.exp %158 : vector<1x32xf32>
    %cst_48 = arith.constant 1.000000e+00 : f32
    %160 = vector.broadcast %cst_48 : f32 to vector<1x32xf32>
    %161 = arith.addf %160, %159 : vector<1x32xf32>
    %162 = arith.divf %160, %161 : vector<1x32xf32>
    %163 = vector.extract_strided_slice %145 {offsets = [0, 64], sizes = [1, 32], strides = [1, 1]} : vector<1x128xf32> to vector<1x32xf32>
    %164 = vector.extract_strided_slice %146 {offsets = [0, 64], sizes = [1, 32], strides = [1, 1]} : vector<1x128xf32> to vector<1x32xf32>
    %165 = arith.addf %164, %5 : vector<1x32xf32>
    %166 = arith.mulf %154, %165 : vector<1x32xf32>
    %167 = arith.addf %163, %166 : vector<1x32xf32>
    %168 = math.tanh %167 : vector<1x32xf32>
    %cst_49 = arith.constant 1.000000e+00 : f32
    %169 = vector.broadcast %cst_49 : f32 to vector<1x32xf32>
    %170 = arith.subf %169, %162 : vector<1x32xf32>
    %171 = arith.mulf %170, %168 : vector<1x32xf32>
    %172 = arith.mulf %162, %141 : vector<1x32xf32>
    %173 = arith.addf %171, %172 : vector<1x32xf32>
    %174 = arith.index_cast %c4_i32 : i32 to index
    %c0_50 = arith.constant 0 : index
    %175 = vector.load %arg10[%174, %c0_50] : memref<8x32xf32, #tpu.memory_space<vmem>>, vector<1x32xf32>
    tpu.vector_store %arg10[%174, %c0_50], %173 {strides = array<i32>} : memref<8x32xf32, #tpu.memory_space<vmem>>, vector<1x32xf32>,
    %c5_i32 = arith.constant 5 : i32
    %176 = arith.index_cast %c5_i32 : i32 to index
    %c0_51 = arith.constant 0 : index
    %177 = vector.load %arg11[%176, %c0_51] : memref<8x128xf32, #tpu.memory_space<vmem>>, vector<1x128xf32>
    %cst_52 = arith.constant dense<0.000000e+00> : vector<1x128xf32>
    %178 = tpu.matmul %173, %3, %cst_52 {dimension_numbers = #tpu.dot_dimension_numbers<[1], [0], [0], [1], [0, 0, 1, 1], [], []>} : vector<1x32xf32>, vector<32x128xf32>, vector<1x128xf32> -> vector<1x128xf32>
    %179 = vector.extract_strided_slice %177 {offsets = [0, 0], sizes = [1, 32], strides = [1, 1]} : vector<1x128xf32> to vector<1x32xf32>
    %180 = vector.extract_strided_slice %178 {offsets = [0, 0], sizes = [1, 32], strides = [1, 1]} : vector<1x128xf32> to vector<1x32xf32>
    %181 = arith.addf %179, %180 : vector<1x32xf32>
    %182 = arith.negf %181 : vector<1x32xf32>
    %183 = math.exp %182 : vector<1x32xf32>
    %cst_53 = arith.constant 1.000000e+00 : f32
    %184 = vector.broadcast %cst_53 : f32 to vector<1x32xf32>
    %185 = arith.addf %184, %183 : vector<1x32xf32>
    %186 = arith.divf %184, %185 : vector<1x32xf32>
    %187 = vector.extract_strided_slice %177 {offsets = [0, 32], sizes = [1, 32], strides = [1, 1]} : vector<1x128xf32> to vector<1x32xf32>
    %188 = vector.extract_strided_slice %178 {offsets = [0, 32], sizes = [1, 32], strides = [1, 1]} : vector<1x128xf32> to vector<1x32xf32>
    %189 = arith.addf %187, %188 : vector<1x32xf32>
    %190 = arith.negf %189 : vector<1x32xf32>
    %191 = math.exp %190 : vector<1x32xf32>
    %cst_54 = arith.constant 1.000000e+00 : f32
    %192 = vector.broadcast %cst_54 : f32 to vector<1x32xf32>
    %193 = arith.addf %192, %191 : vector<1x32xf32>
    %194 = arith.divf %192, %193 : vector<1x32xf32>
    %195 = vector.extract_strided_slice %177 {offsets = [0, 64], sizes = [1, 32], strides = [1, 1]} : vector<1x128xf32> to vector<1x32xf32>
    %196 = vector.extract_strided_slice %178 {offsets = [0, 64], sizes = [1, 32], strides = [1, 1]} : vector<1x128xf32> to vector<1x32xf32>
    %197 = arith.addf %196, %5 : vector<1x32xf32>
    %198 = arith.mulf %186, %197 : vector<1x32xf32>
    %199 = arith.addf %195, %198 : vector<1x32xf32>
    %200 = math.tanh %199 : vector<1x32xf32>
    %cst_55 = arith.constant 1.000000e+00 : f32
    %201 = vector.broadcast %cst_55 : f32 to vector<1x32xf32>
    %202 = arith.subf %201, %194 : vector<1x32xf32>
    %203 = arith.mulf %202, %200 : vector<1x32xf32>
    %204 = arith.mulf %194, %173 : vector<1x32xf32>
    %205 = arith.addf %203, %204 : vector<1x32xf32>
    %206 = arith.index_cast %c5_i32 : i32 to index
    %c0_56 = arith.constant 0 : index
    %207 = vector.load %arg10[%206, %c0_56] : memref<8x32xf32, #tpu.memory_space<vmem>>, vector<1x32xf32>
    tpu.vector_store %arg10[%206, %c0_56], %205 {strides = array<i32>} : memref<8x32xf32, #tpu.memory_space<vmem>>, vector<1x32xf32>,
    %c6_i32 = arith.constant 6 : i32
    %208 = arith.index_cast %c6_i32 : i32 to index
    %c0_57 = arith.constant 0 : index
    %209 = vector.load %arg11[%208, %c0_57] : memref<8x128xf32, #tpu.memory_space<vmem>>, vector<1x128xf32>
    %cst_58 = arith.constant dense<0.000000e+00> : vector<1x128xf32>
    %210 = tpu.matmul %205, %3, %cst_58 {dimension_numbers = #tpu.dot_dimension_numbers<[1], [0], [0], [1], [0, 0, 1, 1], [], []>} : vector<1x32xf32>, vector<32x128xf32>, vector<1x128xf32> -> vector<1x128xf32>
    %211 = vector.extract_strided_slice %209 {offsets = [0, 0], sizes = [1, 32], strides = [1, 1]} : vector<1x128xf32> to vector<1x32xf32>
    %212 = vector.extract_strided_slice %210 {offsets = [0, 0], sizes = [1, 32], strides = [1, 1]} : vector<1x128xf32> to vector<1x32xf32>
    %213 = arith.addf %211, %212 : vector<1x32xf32>
    %214 = arith.negf %213 : vector<1x32xf32>
    %215 = math.exp %214 : vector<1x32xf32>
    %cst_59 = arith.constant 1.000000e+00 : f32
    %216 = vector.broadcast %cst_59 : f32 to vector<1x32xf32>
    %217 = arith.addf %216, %215 : vector<1x32xf32>
    %218 = arith.divf %216, %217 : vector<1x32xf32>
    %219 = vector.extract_strided_slice %209 {offsets = [0, 32], sizes = [1, 32], strides = [1, 1]} : vector<1x128xf32> to vector<1x32xf32>
    %220 = vector.extract_strided_slice %210 {offsets = [0, 32], sizes = [1, 32], strides = [1, 1]} : vector<1x128xf32> to vector<1x32xf32>
    %221 = arith.addf %219, %220 : vector<1x32xf32>
    %222 = arith.negf %221 : vector<1x32xf32>
    %223 = math.exp %222 : vector<1x32xf32>
    %cst_60 = arith.constant 1.000000e+00 : f32
    %224 = vector.broadcast %cst_60 : f32 to vector<1x32xf32>
    %225 = arith.addf %224, %223 : vector<1x32xf32>
    %226 = arith.divf %224, %225 : vector<1x32xf32>
    %227 = vector.extract_strided_slice %209 {offsets = [0, 64], sizes = [1, 32], strides = [1, 1]} : vector<1x128xf32> to vector<1x32xf32>
    %228 = vector.extract_strided_slice %210 {offsets = [0, 64], sizes = [1, 32], strides = [1, 1]} : vector<1x128xf32> to vector<1x32xf32>
    %229 = arith.addf %228, %5 : vector<1x32xf32>
    %230 = arith.mulf %218, %229 : vector<1x32xf32>
    %231 = arith.addf %227, %230 : vector<1x32xf32>
    %232 = math.tanh %231 : vector<1x32xf32>
    %cst_61 = arith.constant 1.000000e+00 : f32
    %233 = vector.broadcast %cst_61 : f32 to vector<1x32xf32>
    %234 = arith.subf %233, %226 : vector<1x32xf32>
    %235 = arith.mulf %234, %232 : vector<1x32xf32>
    %236 = arith.mulf %226, %205 : vector<1x32xf32>
    %237 = arith.addf %235, %236 : vector<1x32xf32>
    %238 = arith.index_cast %c6_i32 : i32 to index
    %c0_62 = arith.constant 0 : index
    %239 = vector.load %arg10[%238, %c0_62] : memref<8x32xf32, #tpu.memory_space<vmem>>, vector<1x32xf32>
    tpu.vector_store %arg10[%238, %c0_62], %237 {strides = array<i32>} : memref<8x32xf32, #tpu.memory_space<vmem>>, vector<1x32xf32>,
    %c7_i32 = arith.constant 7 : i32
    %240 = arith.index_cast %c7_i32 : i32 to index
    %c0_63 = arith.constant 0 : index
    %241 = vector.load %arg11[%240, %c0_63] : memref<8x128xf32, #tpu.memory_space<vmem>>, vector<1x128xf32>
    %cst_64 = arith.constant dense<0.000000e+00> : vector<1x128xf32>
    %242 = tpu.matmul %237, %3, %cst_64 {dimension_numbers = #tpu.dot_dimension_numbers<[1], [0], [0], [1], [0, 0, 1, 1], [], []>} : vector<1x32xf32>, vector<32x128xf32>, vector<1x128xf32> -> vector<1x128xf32>
    %243 = vector.extract_strided_slice %241 {offsets = [0, 0], sizes = [1, 32], strides = [1, 1]} : vector<1x128xf32> to vector<1x32xf32>
    %244 = vector.extract_strided_slice %242 {offsets = [0, 0], sizes = [1, 32], strides = [1, 1]} : vector<1x128xf32> to vector<1x32xf32>
    %245 = arith.addf %243, %244 : vector<1x32xf32>
    %246 = arith.negf %245 : vector<1x32xf32>
    %247 = math.exp %246 : vector<1x32xf32>
    %cst_65 = arith.constant 1.000000e+00 : f32
    %248 = vector.broadcast %cst_65 : f32 to vector<1x32xf32>
    %249 = arith.addf %248, %247 : vector<1x32xf32>
    %250 = arith.divf %248, %249 : vector<1x32xf32>
    %251 = vector.extract_strided_slice %241 {offsets = [0, 32], sizes = [1, 32], strides = [1, 1]} : vector<1x128xf32> to vector<1x32xf32>
    %252 = vector.extract_strided_slice %242 {offsets = [0, 32], sizes = [1, 32], strides = [1, 1]} : vector<1x128xf32> to vector<1x32xf32>
    %253 = arith.addf %251, %252 : vector<1x32xf32>
    %254 = arith.negf %253 : vector<1x32xf32>
    %255 = math.exp %254 : vector<1x32xf32>
    %cst_66 = arith.constant 1.000000e+00 : f32
    %256 = vector.broadcast %cst_66 : f32 to vector<1x32xf32>
    %257 = arith.addf %256, %255 : vector<1x32xf32>
    %258 = arith.divf %256, %257 : vector<1x32xf32>
    %259 = vector.extract_strided_slice %241 {offsets = [0, 64], sizes = [1, 32], strides = [1, 1]} : vector<1x128xf32> to vector<1x32xf32>
    %260 = vector.extract_strided_slice %242 {offsets = [0, 64], sizes = [1, 32], strides = [1, 1]} : vector<1x128xf32> to vector<1x32xf32>
    %261 = arith.addf %260, %5 : vector<1x32xf32>
    %262 = arith.mulf %250, %261 : vector<1x32xf32>
    %263 = arith.addf %259, %262 : vector<1x32xf32>
    %264 = math.tanh %263 : vector<1x32xf32>
    %cst_67 = arith.constant 1.000000e+00 : f32
    %265 = vector.broadcast %cst_67 : f32 to vector<1x32xf32>
    %266 = arith.subf %265, %258 : vector<1x32xf32>
    %267 = arith.mulf %266, %264 : vector<1x32xf32>
    %268 = arith.mulf %258, %237 : vector<1x32xf32>
    %269 = arith.addf %267, %268 : vector<1x32xf32>
    %270 = arith.index_cast %c7_i32 : i32 to index
    %c0_68 = arith.constant 0 : index
    %271 = vector.load %arg10[%270, %c0_68] : memref<8x32xf32, #tpu.memory_space<vmem>>, vector<1x32xf32>
    tpu.vector_store %arg10[%270, %c0_68], %269 {strides = array<i32>} : memref<8x32xf32, #tpu.memory_space<vmem>>, vector<1x32xf32>,
    %c8_i32 = arith.constant 8 : i32
    %c0_69 = arith.constant 0 : index
    %c0_70 = arith.constant 0 : index
    %272 = vector.load %arg9[%c0_69, %c0_70] : memref<3x32xf32, #tpu.memory_space<vmem>>, vector<1x32xf32>
    tpu.vector_store %arg9[%c0_69, %c0_70], %269 {strides = array<i32>} : memref<3x32xf32, #tpu.memory_space<vmem>>, vector<1x32xf32>,
    %c1 = arith.constant 1 : index
    %c0_71 = arith.constant 0 : index
    %c0_72 = arith.constant 0 : index
    %273 = vector.load %arg3[%c1, %c0_71, %c0_72] : memref<3x32x128xf32, #tpu.memory_space<vmem>>, vector<1x32x128xf32>
    %274 = vector.shape_cast %273 : vector<1x32x128xf32> to vector<32x128xf32>
    %c1_73 = arith.constant 1 : index
    %c0_74 = arith.constant 0 : index
    %c0_75 = arith.constant 0 : index
    %275 = vector.load %arg5[%c1_73, %c0_74, %c0_75] : memref<3x1x32xf32, #tpu.memory_space<vmem>>, vector<1x1x32xf32>
    %276 = vector.shape_cast %275 : vector<1x1x32xf32> to vector<1x32xf32>
    %c0_76 = arith.constant 0 : index
    %c0_77 = arith.constant 0 : index
    %277 = vector.load %arg10[%c0_76, %c0_77] : memref<8x32xf32, #tpu.memory_space<vmem>>, vector<8x32xf32>
    %c1_78 = arith.constant 1 : index
    %c0_79 = arith.constant 0 : index
    %c0_80 = arith.constant 0 : index
    %278 = vector.load %arg2[%c1_78, %c0_79, %c0_80] : memref<3x32x128xf32, #tpu.memory_space<vmem>>, vector<1x32x128xf32>
    %279 = vector.shape_cast %278 : vector<1x32x128xf32> to vector<32x128xf32>
    %cst_81 = arith.constant dense<0.000000e+00> : vector<8x128xf32>
    %280 = tpu.matmul %277, %279, %cst_81 {dimension_numbers = #tpu.dot_dimension_numbers<[1], [0], [0], [1], [0, 0, 1, 1], [], []>} : vector<8x32xf32>, vector<32x128xf32>, vector<8x128xf32> -> vector<8x128xf32>
    %c1_82 = arith.constant 1 : index
    %c0_83 = arith.constant 0 : index
    %c0_84 = arith.constant 0 : index
    %281 = vector.load %arg4[%c1_82, %c0_83, %c0_84] : memref<3x1x128xf32, #tpu.memory_space<vmem>>, vector<1x1x128xf32>
    %282 = vector.shape_cast %281 : vector<1x1x128xf32> to vector<1x128xf32>
    %283 = vector.broadcast %282 : vector<1x128xf32> to vector<8x128xf32>
    %284 = arith.addf %280, %283 : vector<8x128xf32>
    %c0_85 = arith.constant 0 : index
    %c0_86 = arith.constant 0 : index
    %285 = vector.load %arg11[%c0_85, %c0_86] : memref<8x128xf32, #tpu.memory_space<vmem>>, vector<8x128xf32>
    tpu.vector_store %arg11[%c0_85, %c0_86], %284 {strides = array<i32>} : memref<8x128xf32, #tpu.memory_space<vmem>>, vector<8x128xf32>,
    %c1_87 = arith.constant 1 : index
    %c0_88 = arith.constant 0 : index
    %286 = vector.load %arg1[%c1_87, %c0_88] : memref<3x32xf32, #tpu.memory_space<vmem>>, vector<1x32xf32>
    %c0_i32_89 = arith.constant 0 : i32
    %287 = arith.index_cast %c0_i32_89 : i32 to index
    %c0_90 = arith.constant 0 : index
    %288 = vector.load %arg11[%287, %c0_90] : memref<8x128xf32, #tpu.memory_space<vmem>>, vector<1x128xf32>
    %cst_91 = arith.constant dense<0.000000e+00> : vector<1x128xf32>
    %289 = tpu.matmul %286, %274, %cst_91 {dimension_numbers = #tpu.dot_dimension_numbers<[1], [0], [0], [1], [0, 0, 1, 1], [], []>} : vector<1x32xf32>, vector<32x128xf32>, vector<1x128xf32> -> vector<1x128xf32>
    %290 = vector.extract_strided_slice %288 {offsets = [0, 0], sizes = [1, 32], strides = [1, 1]} : vector<1x128xf32> to vector<1x32xf32>
    %291 = vector.extract_strided_slice %289 {offsets = [0, 0], sizes = [1, 32], strides = [1, 1]} : vector<1x128xf32> to vector<1x32xf32>
    %292 = arith.addf %290, %291 : vector<1x32xf32>
    %293 = arith.negf %292 : vector<1x32xf32>
    %294 = math.exp %293 : vector<1x32xf32>
    %cst_92 = arith.constant 1.000000e+00 : f32
    %295 = vector.broadcast %cst_92 : f32 to vector<1x32xf32>
    %296 = arith.addf %295, %294 : vector<1x32xf32>
    %297 = arith.divf %295, %296 : vector<1x32xf32>
    %298 = vector.extract_strided_slice %288 {offsets = [0, 32], sizes = [1, 32], strides = [1, 1]} : vector<1x128xf32> to vector<1x32xf32>
    %299 = vector.extract_strided_slice %289 {offsets = [0, 32], sizes = [1, 32], strides = [1, 1]} : vector<1x128xf32> to vector<1x32xf32>
    %300 = arith.addf %298, %299 : vector<1x32xf32>
    %301 = arith.negf %300 : vector<1x32xf32>
    %302 = math.exp %301 : vector<1x32xf32>
    %cst_93 = arith.constant 1.000000e+00 : f32
    %303 = vector.broadcast %cst_93 : f32 to vector<1x32xf32>
    %304 = arith.addf %303, %302 : vector<1x32xf32>
    %305 = arith.divf %303, %304 : vector<1x32xf32>
    %306 = vector.extract_strided_slice %288 {offsets = [0, 64], sizes = [1, 32], strides = [1, 1]} : vector<1x128xf32> to vector<1x32xf32>
    %307 = vector.extract_strided_slice %289 {offsets = [0, 64], sizes = [1, 32], strides = [1, 1]} : vector<1x128xf32> to vector<1x32xf32>
    %308 = arith.addf %307, %276 : vector<1x32xf32>
    %309 = arith.mulf %297, %308 : vector<1x32xf32>
    %310 = arith.addf %306, %309 : vector<1x32xf32>
    %311 = math.tanh %310 : vector<1x32xf32>
    %cst_94 = arith.constant 1.000000e+00 : f32
    %312 = vector.broadcast %cst_94 : f32 to vector<1x32xf32>
    %313 = arith.subf %312, %305 : vector<1x32xf32>
    %314 = arith.mulf %313, %311 : vector<1x32xf32>
    %315 = arith.mulf %305, %286 : vector<1x32xf32>
    %316 = arith.addf %314, %315 : vector<1x32xf32>
    %317 = arith.index_cast %c0_i32_89 : i32 to index
    %c0_95 = arith.constant 0 : index
    %318 = vector.load %arg10[%317, %c0_95] : memref<8x32xf32, #tpu.memory_space<vmem>>, vector<1x32xf32>
    tpu.vector_store %arg10[%317, %c0_95], %316 {strides = array<i32>} : memref<8x32xf32, #tpu.memory_space<vmem>>, vector<1x32xf32>,
    %c1_i32_96 = arith.constant 1 : i32
    %319 = arith.index_cast %c1_i32_96 : i32 to index
    %c0_97 = arith.constant 0 : index
    %320 = vector.load %arg11[%319, %c0_97] : memref<8x128xf32, #tpu.memory_space<vmem>>, vector<1x128xf32>
    %cst_98 = arith.constant dense<0.000000e+00> : vector<1x128xf32>
    %321 = tpu.matmul %316, %274, %cst_98 {dimension_numbers = #tpu.dot_dimension_numbers<[1], [0], [0], [1], [0, 0, 1, 1], [], []>} : vector<1x32xf32>, vector<32x128xf32>, vector<1x128xf32> -> vector<1x128xf32>
    %322 = vector.extract_strided_slice %320 {offsets = [0, 0], sizes = [1, 32], strides = [1, 1]} : vector<1x128xf32> to vector<1x32xf32>
    %323 = vector.extract_strided_slice %321 {offsets = [0, 0], sizes = [1, 32], strides = [1, 1]} : vector<1x128xf32> to vector<1x32xf32>
    %324 = arith.addf %322, %323 : vector<1x32xf32>
    %325 = arith.negf %324 : vector<1x32xf32>
    %326 = math.exp %325 : vector<1x32xf32>
    %cst_99 = arith.constant 1.000000e+00 : f32
    %327 = vector.broadcast %cst_99 : f32 to vector<1x32xf32>
    %328 = arith.addf %327, %326 : vector<1x32xf32>
    %329 = arith.divf %327, %328 : vector<1x32xf32>
    %330 = vector.extract_strided_slice %320 {offsets = [0, 32], sizes = [1, 32], strides = [1, 1]} : vector<1x128xf32> to vector<1x32xf32>
    %331 = vector.extract_strided_slice %321 {offsets = [0, 32], sizes = [1, 32], strides = [1, 1]} : vector<1x128xf32> to vector<1x32xf32>
    %332 = arith.addf %330, %331 : vector<1x32xf32>
    %333 = arith.negf %332 : vector<1x32xf32>
    %334 = math.exp %333 : vector<1x32xf32>
    %cst_100 = arith.constant 1.000000e+00 : f32
    %335 = vector.broadcast %cst_100 : f32 to vector<1x32xf32>
    %336 = arith.addf %335, %334 : vector<1x32xf32>
    %337 = arith.divf %335, %336 : vector<1x32xf32>
    %338 = vector.extract_strided_slice %320 {offsets = [0, 64], sizes = [1, 32], strides = [1, 1]} : vector<1x128xf32> to vector<1x32xf32>
    %339 = vector.extract_strided_slice %321 {offsets = [0, 64], sizes = [1, 32], strides = [1, 1]} : vector<1x128xf32> to vector<1x32xf32>
    %340 = arith.addf %339, %276 : vector<1x32xf32>
    %341 = arith.mulf %329, %340 : vector<1x32xf32>
    %342 = arith.addf %338, %341 : vector<1x32xf32>
    %343 = math.tanh %342 : vector<1x32xf32>
    %cst_101 = arith.constant 1.000000e+00 : f32
    %344 = vector.broadcast %cst_101 : f32 to vector<1x32xf32>
    %345 = arith.subf %344, %337 : vector<1x32xf32>
    %346 = arith.mulf %345, %343 : vector<1x32xf32>
    %347 = arith.mulf %337, %316 : vector<1x32xf32>
    %348 = arith.addf %346, %347 : vector<1x32xf32>
    %349 = arith.index_cast %c1_i32_96 : i32 to index
    %c0_102 = arith.constant 0 : index
    %350 = vector.load %arg10[%349, %c0_102] : memref<8x32xf32, #tpu.memory_space<vmem>>, vector<1x32xf32>
    tpu.vector_store %arg10[%349, %c0_102], %348 {strides = array<i32>} : memref<8x32xf32, #tpu.memory_space<vmem>>, vector<1x32xf32>,
    %c2_i32_103 = arith.constant 2 : i32
    %351 = arith.index_cast %c2_i32_103 : i32 to index
    %c0_104 = arith.constant 0 : index
    %352 = vector.load %arg11[%351, %c0_104] : memref<8x128xf32, #tpu.memory_space<vmem>>, vector<1x128xf32>
    %cst_105 = arith.constant dense<0.000000e+00> : vector<1x128xf32>
    %353 = tpu.matmul %348, %274, %cst_105 {dimension_numbers = #tpu.dot_dimension_numbers<[1], [0], [0], [1], [0, 0, 1, 1], [], []>} : vector<1x32xf32>, vector<32x128xf32>, vector<1x128xf32> -> vector<1x128xf32>
    %354 = vector.extract_strided_slice %352 {offsets = [0, 0], sizes = [1, 32], strides = [1, 1]} : vector<1x128xf32> to vector<1x32xf32>
    %355 = vector.extract_strided_slice %353 {offsets = [0, 0], sizes = [1, 32], strides = [1, 1]} : vector<1x128xf32> to vector<1x32xf32>
    %356 = arith.addf %354, %355 : vector<1x32xf32>
    %357 = arith.negf %356 : vector<1x32xf32>
    %358 = math.exp %357 : vector<1x32xf32>
    %cst_106 = arith.constant 1.000000e+00 : f32
    %359 = vector.broadcast %cst_106 : f32 to vector<1x32xf32>
    %360 = arith.addf %359, %358 : vector<1x32xf32>
    %361 = arith.divf %359, %360 : vector<1x32xf32>
    %362 = vector.extract_strided_slice %352 {offsets = [0, 32], sizes = [1, 32], strides = [1, 1]} : vector<1x128xf32> to vector<1x32xf32>
    %363 = vector.extract_strided_slice %353 {offsets = [0, 32], sizes = [1, 32], strides = [1, 1]} : vector<1x128xf32> to vector<1x32xf32>
    %364 = arith.addf %362, %363 : vector<1x32xf32>
    %365 = arith.negf %364 : vector<1x32xf32>
    %366 = math.exp %365 : vector<1x32xf32>
    %cst_107 = arith.constant 1.000000e+00 : f32
    %367 = vector.broadcast %cst_107 : f32 to vector<1x32xf32>
    %368 = arith.addf %367, %366 : vector<1x32xf32>
    %369 = arith.divf %367, %368 : vector<1x32xf32>
    %370 = vector.extract_strided_slice %352 {offsets = [0, 64], sizes = [1, 32], strides = [1, 1]} : vector<1x128xf32> to vector<1x32xf32>
    %371 = vector.extract_strided_slice %353 {offsets = [0, 64], sizes = [1, 32], strides = [1, 1]} : vector<1x128xf32> to vector<1x32xf32>
    %372 = arith.addf %371, %276 : vector<1x32xf32>
    %373 = arith.mulf %361, %372 : vector<1x32xf32>
    %374 = arith.addf %370, %373 : vector<1x32xf32>
    %375 = math.tanh %374 : vector<1x32xf32>
    %cst_108 = arith.constant 1.000000e+00 : f32
    %376 = vector.broadcast %cst_108 : f32 to vector<1x32xf32>
    %377 = arith.subf %376, %369 : vector<1x32xf32>
    %378 = arith.mulf %377, %375 : vector<1x32xf32>
    %379 = arith.mulf %369, %348 : vector<1x32xf32>
    %380 = arith.addf %378, %379 : vector<1x32xf32>
    %381 = arith.index_cast %c2_i32_103 : i32 to index
    %c0_109 = arith.constant 0 : index
    %382 = vector.load %arg10[%381, %c0_109] : memref<8x32xf32, #tpu.memory_space<vmem>>, vector<1x32xf32>
    tpu.vector_store %arg10[%381, %c0_109], %380 {strides = array<i32>} : memref<8x32xf32, #tpu.memory_space<vmem>>, vector<1x32xf32>,
    %c3_i32_110 = arith.constant 3 : i32
    %383 = arith.index_cast %c3_i32_110 : i32 to index
    %c0_111 = arith.constant 0 : index
    %384 = vector.load %arg11[%383, %c0_111] : memref<8x128xf32, #tpu.memory_space<vmem>>, vector<1x128xf32>
    %cst_112 = arith.constant dense<0.000000e+00> : vector<1x128xf32>
    %385 = tpu.matmul %380, %274, %cst_112 {dimension_numbers = #tpu.dot_dimension_numbers<[1], [0], [0], [1], [0, 0, 1, 1], [], []>} : vector<1x32xf32>, vector<32x128xf32>, vector<1x128xf32> -> vector<1x128xf32>
    %386 = vector.extract_strided_slice %384 {offsets = [0, 0], sizes = [1, 32], strides = [1, 1]} : vector<1x128xf32> to vector<1x32xf32>
    %387 = vector.extract_strided_slice %385 {offsets = [0, 0], sizes = [1, 32], strides = [1, 1]} : vector<1x128xf32> to vector<1x32xf32>
    %388 = arith.addf %386, %387 : vector<1x32xf32>
    %389 = arith.negf %388 : vector<1x32xf32>
    %390 = math.exp %389 : vector<1x32xf32>
    %cst_113 = arith.constant 1.000000e+00 : f32
    %391 = vector.broadcast %cst_113 : f32 to vector<1x32xf32>
    %392 = arith.addf %391, %390 : vector<1x32xf32>
    %393 = arith.divf %391, %392 : vector<1x32xf32>
    %394 = vector.extract_strided_slice %384 {offsets = [0, 32], sizes = [1, 32], strides = [1, 1]} : vector<1x128xf32> to vector<1x32xf32>
    %395 = vector.extract_strided_slice %385 {offsets = [0, 32], sizes = [1, 32], strides = [1, 1]} : vector<1x128xf32> to vector<1x32xf32>
    %396 = arith.addf %394, %395 : vector<1x32xf32>
    %397 = arith.negf %396 : vector<1x32xf32>
    %398 = math.exp %397 : vector<1x32xf32>
    %cst_114 = arith.constant 1.000000e+00 : f32
    %399 = vector.broadcast %cst_114 : f32 to vector<1x32xf32>
    %400 = arith.addf %399, %398 : vector<1x32xf32>
    %401 = arith.divf %399, %400 : vector<1x32xf32>
    %402 = vector.extract_strided_slice %384 {offsets = [0, 64], sizes = [1, 32], strides = [1, 1]} : vector<1x128xf32> to vector<1x32xf32>
    %403 = vector.extract_strided_slice %385 {offsets = [0, 64], sizes = [1, 32], strides = [1, 1]} : vector<1x128xf32> to vector<1x32xf32>
    %404 = arith.addf %403, %276 : vector<1x32xf32>
    %405 = arith.mulf %393, %404 : vector<1x32xf32>
    %406 = arith.addf %402, %405 : vector<1x32xf32>
    %407 = math.tanh %406 : vector<1x32xf32>
    %cst_115 = arith.constant 1.000000e+00 : f32
    %408 = vector.broadcast %cst_115 : f32 to vector<1x32xf32>
    %409 = arith.subf %408, %401 : vector<1x32xf32>
    %410 = arith.mulf %409, %407 : vector<1x32xf32>
    %411 = arith.mulf %401, %380 : vector<1x32xf32>
    %412 = arith.addf %410, %411 : vector<1x32xf32>
    %413 = arith.index_cast %c3_i32_110 : i32 to index
    %c0_116 = arith.constant 0 : index
    %414 = vector.load %arg10[%413, %c0_116] : memref<8x32xf32, #tpu.memory_space<vmem>>, vector<1x32xf32>
    tpu.vector_store %arg10[%413, %c0_116], %412 {strides = array<i32>} : memref<8x32xf32, #tpu.memory_space<vmem>>, vector<1x32xf32>,
    %c4_i32_117 = arith.constant 4 : i32
    %415 = arith.index_cast %c4_i32_117 : i32 to index
    %c0_118 = arith.constant 0 : index
    %416 = vector.load %arg11[%415, %c0_118] : memref<8x128xf32, #tpu.memory_space<vmem>>, vector<1x128xf32>
    %cst_119 = arith.constant dense<0.000000e+00> : vector<1x128xf32>
    %417 = tpu.matmul %412, %274, %cst_119 {dimension_numbers = #tpu.dot_dimension_numbers<[1], [0], [0], [1], [0, 0, 1, 1], [], []>} : vector<1x32xf32>, vector<32x128xf32>, vector<1x128xf32> -> vector<1x128xf32>
    %418 = vector.extract_strided_slice %416 {offsets = [0, 0], sizes = [1, 32], strides = [1, 1]} : vector<1x128xf32> to vector<1x32xf32>
    %419 = vector.extract_strided_slice %417 {offsets = [0, 0], sizes = [1, 32], strides = [1, 1]} : vector<1x128xf32> to vector<1x32xf32>
    %420 = arith.addf %418, %419 : vector<1x32xf32>
    %421 = arith.negf %420 : vector<1x32xf32>
    %422 = math.exp %421 : vector<1x32xf32>
    %cst_120 = arith.constant 1.000000e+00 : f32
    %423 = vector.broadcast %cst_120 : f32 to vector<1x32xf32>
    %424 = arith.addf %423, %422 : vector<1x32xf32>
    %425 = arith.divf %423, %424 : vector<1x32xf32>
    %426 = vector.extract_strided_slice %416 {offsets = [0, 32], sizes = [1, 32], strides = [1, 1]} : vector<1x128xf32> to vector<1x32xf32>
    %427 = vector.extract_strided_slice %417 {offsets = [0, 32], sizes = [1, 32], strides = [1, 1]} : vector<1x128xf32> to vector<1x32xf32>
    %428 = arith.addf %426, %427 : vector<1x32xf32>
    %429 = arith.negf %428 : vector<1x32xf32>
    %430 = math.exp %429 : vector<1x32xf32>
    %cst_121 = arith.constant 1.000000e+00 : f32
    %431 = vector.broadcast %cst_121 : f32 to vector<1x32xf32>
    %432 = arith.addf %431, %430 : vector<1x32xf32>
    %433 = arith.divf %431, %432 : vector<1x32xf32>
    %434 = vector.extract_strided_slice %416 {offsets = [0, 64], sizes = [1, 32], strides = [1, 1]} : vector<1x128xf32> to vector<1x32xf32>
    %435 = vector.extract_strided_slice %417 {offsets = [0, 64], sizes = [1, 32], strides = [1, 1]} : vector<1x128xf32> to vector<1x32xf32>
    %436 = arith.addf %435, %276 : vector<1x32xf32>
    %437 = arith.mulf %425, %436 : vector<1x32xf32>
    %438 = arith.addf %434, %437 : vector<1x32xf32>
    %439 = math.tanh %438 : vector<1x32xf32>
    %cst_122 = arith.constant 1.000000e+00 : f32
    %440 = vector.broadcast %cst_122 : f32 to vector<1x32xf32>
    %441 = arith.subf %440, %433 : vector<1x32xf32>
    %442 = arith.mulf %441, %439 : vector<1x32xf32>
    %443 = arith.mulf %433, %412 : vector<1x32xf32>
    %444 = arith.addf %442, %443 : vector<1x32xf32>
    %445 = arith.index_cast %c4_i32_117 : i32 to index
    %c0_123 = arith.constant 0 : index
    %446 = vector.load %arg10[%445, %c0_123] : memref<8x32xf32, #tpu.memory_space<vmem>>, vector<1x32xf32>
    tpu.vector_store %arg10[%445, %c0_123], %444 {strides = array<i32>} : memref<8x32xf32, #tpu.memory_space<vmem>>, vector<1x32xf32>,
    %c5_i32_124 = arith.constant 5 : i32
    %447 = arith.index_cast %c5_i32_124 : i32 to index
    %c0_125 = arith.constant 0 : index
    %448 = vector.load %arg11[%447, %c0_125] : memref<8x128xf32, #tpu.memory_space<vmem>>, vector<1x128xf32>
    %cst_126 = arith.constant dense<0.000000e+00> : vector<1x128xf32>
    %449 = tpu.matmul %444, %274, %cst_126 {dimension_numbers = #tpu.dot_dimension_numbers<[1], [0], [0], [1], [0, 0, 1, 1], [], []>} : vector<1x32xf32>, vector<32x128xf32>, vector<1x128xf32> -> vector<1x128xf32>
    %450 = vector.extract_strided_slice %448 {offsets = [0, 0], sizes = [1, 32], strides = [1, 1]} : vector<1x128xf32> to vector<1x32xf32>
    %451 = vector.extract_strided_slice %449 {offsets = [0, 0], sizes = [1, 32], strides = [1, 1]} : vector<1x128xf32> to vector<1x32xf32>
    %452 = arith.addf %450, %451 : vector<1x32xf32>
    %453 = arith.negf %452 : vector<1x32xf32>
    %454 = math.exp %453 : vector<1x32xf32>
    %cst_127 = arith.constant 1.000000e+00 : f32
    %455 = vector.broadcast %cst_127 : f32 to vector<1x32xf32>
    %456 = arith.addf %455, %454 : vector<1x32xf32>
    %457 = arith.divf %455, %456 : vector<1x32xf32>
    %458 = vector.extract_strided_slice %448 {offsets = [0, 32], sizes = [1, 32], strides = [1, 1]} : vector<1x128xf32> to vector<1x32xf32>
    %459 = vector.extract_strided_slice %449 {offsets = [0, 32], sizes = [1, 32], strides = [1, 1]} : vector<1x128xf32> to vector<1x32xf32>
    %460 = arith.addf %458, %459 : vector<1x32xf32>
    %461 = arith.negf %460 : vector<1x32xf32>
    %462 = math.exp %461 : vector<1x32xf32>
    %cst_128 = arith.constant 1.000000e+00 : f32
    %463 = vector.broadcast %cst_128 : f32 to vector<1x32xf32>
    %464 = arith.addf %463, %462 : vector<1x32xf32>
    %465 = arith.divf %463, %464 : vector<1x32xf32>
    %466 = vector.extract_strided_slice %448 {offsets = [0, 64], sizes = [1, 32], strides = [1, 1]} : vector<1x128xf32> to vector<1x32xf32>
    %467 = vector.extract_strided_slice %449 {offsets = [0, 64], sizes = [1, 32], strides = [1, 1]} : vector<1x128xf32> to vector<1x32xf32>
    %468 = arith.addf %467, %276 : vector<1x32xf32>
    %469 = arith.mulf %457, %468 : vector<1x32xf32>
    %470 = arith.addf %466, %469 : vector<1x32xf32>
    %471 = math.tanh %470 : vector<1x32xf32>
    %cst_129 = arith.constant 1.000000e+00 : f32
    %472 = vector.broadcast %cst_129 : f32 to vector<1x32xf32>
    %473 = arith.subf %472, %465 : vector<1x32xf32>
    %474 = arith.mulf %473, %471 : vector<1x32xf32>
    %475 = arith.mulf %465, %444 : vector<1x32xf32>
    %476 = arith.addf %474, %475 : vector<1x32xf32>
    %477 = arith.index_cast %c5_i32_124 : i32 to index
    %c0_130 = arith.constant 0 : index
    %478 = vector.load %arg10[%477, %c0_130] : memref<8x32xf32, #tpu.memory_space<vmem>>, vector<1x32xf32>
    tpu.vector_store %arg10[%477, %c0_130], %476 {strides = array<i32>} : memref<8x32xf32, #tpu.memory_space<vmem>>, vector<1x32xf32>,
    %c6_i32_131 = arith.constant 6 : i32
    %479 = arith.index_cast %c6_i32_131 : i32 to index
    %c0_132 = arith.constant 0 : index
    %480 = vector.load %arg11[%479, %c0_132] : memref<8x128xf32, #tpu.memory_space<vmem>>, vector<1x128xf32>
    %cst_133 = arith.constant dense<0.000000e+00> : vector<1x128xf32>
    %481 = tpu.matmul %476, %274, %cst_133 {dimension_numbers = #tpu.dot_dimension_numbers<[1], [0], [0], [1], [0, 0, 1, 1], [], []>} : vector<1x32xf32>, vector<32x128xf32>, vector<1x128xf32> -> vector<1x128xf32>
    %482 = vector.extract_strided_slice %480 {offsets = [0, 0], sizes = [1, 32], strides = [1, 1]} : vector<1x128xf32> to vector<1x32xf32>
    %483 = vector.extract_strided_slice %481 {offsets = [0, 0], sizes = [1, 32], strides = [1, 1]} : vector<1x128xf32> to vector<1x32xf32>
    %484 = arith.addf %482, %483 : vector<1x32xf32>
    %485 = arith.negf %484 : vector<1x32xf32>
    %486 = math.exp %485 : vector<1x32xf32>
    %cst_134 = arith.constant 1.000000e+00 : f32
    %487 = vector.broadcast %cst_134 : f32 to vector<1x32xf32>
    %488 = arith.addf %487, %486 : vector<1x32xf32>
    %489 = arith.divf %487, %488 : vector<1x32xf32>
    %490 = vector.extract_strided_slice %480 {offsets = [0, 32], sizes = [1, 32], strides = [1, 1]} : vector<1x128xf32> to vector<1x32xf32>
    %491 = vector.extract_strided_slice %481 {offsets = [0, 32], sizes = [1, 32], strides = [1, 1]} : vector<1x128xf32> to vector<1x32xf32>
    %492 = arith.addf %490, %491 : vector<1x32xf32>
    %493 = arith.negf %492 : vector<1x32xf32>
    %494 = math.exp %493 : vector<1x32xf32>
    %cst_135 = arith.constant 1.000000e+00 : f32
    %495 = vector.broadcast %cst_135 : f32 to vector<1x32xf32>
    %496 = arith.addf %495, %494 : vector<1x32xf32>
    %497 = arith.divf %495, %496 : vector<1x32xf32>
    %498 = vector.extract_strided_slice %480 {offsets = [0, 64], sizes = [1, 32], strides = [1, 1]} : vector<1x128xf32> to vector<1x32xf32>
    %499 = vector.extract_strided_slice %481 {offsets = [0, 64], sizes = [1, 32], strides = [1, 1]} : vector<1x128xf32> to vector<1x32xf32>
    %500 = arith.addf %499, %276 : vector<1x32xf32>
    %501 = arith.mulf %489, %500 : vector<1x32xf32>
    %502 = arith.addf %498, %501 : vector<1x32xf32>
    %503 = math.tanh %502 : vector<1x32xf32>
    %cst_136 = arith.constant 1.000000e+00 : f32
    %504 = vector.broadcast %cst_136 : f32 to vector<1x32xf32>
    %505 = arith.subf %504, %497 : vector<1x32xf32>
    %506 = arith.mulf %505, %503 : vector<1x32xf32>
    %507 = arith.mulf %497, %476 : vector<1x32xf32>
    %508 = arith.addf %506, %507 : vector<1x32xf32>
    %509 = arith.index_cast %c6_i32_131 : i32 to index
    %c0_137 = arith.constant 0 : index
    %510 = vector.load %arg10[%509, %c0_137] : memref<8x32xf32, #tpu.memory_space<vmem>>, vector<1x32xf32>
    tpu.vector_store %arg10[%509, %c0_137], %508 {strides = array<i32>} : memref<8x32xf32, #tpu.memory_space<vmem>>, vector<1x32xf32>,
    %c7_i32_138 = arith.constant 7 : i32
    %511 = arith.index_cast %c7_i32_138 : i32 to index
    %c0_139 = arith.constant 0 : index
    %512 = vector.load %arg11[%511, %c0_139] : memref<8x128xf32, #tpu.memory_space<vmem>>, vector<1x128xf32>
    %cst_140 = arith.constant dense<0.000000e+00> : vector<1x128xf32>
    %513 = tpu.matmul %508, %274, %cst_140 {dimension_numbers = #tpu.dot_dimension_numbers<[1], [0], [0], [1], [0, 0, 1, 1], [], []>} : vector<1x32xf32>, vector<32x128xf32>, vector<1x128xf32> -> vector<1x128xf32>
    %514 = vector.extract_strided_slice %512 {offsets = [0, 0], sizes = [1, 32], strides = [1, 1]} : vector<1x128xf32> to vector<1x32xf32>
    %515 = vector.extract_strided_slice %513 {offsets = [0, 0], sizes = [1, 32], strides = [1, 1]} : vector<1x128xf32> to vector<1x32xf32>
    %516 = arith.addf %514, %515 : vector<1x32xf32>
    %517 = arith.negf %516 : vector<1x32xf32>
    %518 = math.exp %517 : vector<1x32xf32>
    %cst_141 = arith.constant 1.000000e+00 : f32
    %519 = vector.broadcast %cst_141 : f32 to vector<1x32xf32>
    %520 = arith.addf %519, %518 : vector<1x32xf32>
    %521 = arith.divf %519, %520 : vector<1x32xf32>
    %522 = vector.extract_strided_slice %512 {offsets = [0, 32], sizes = [1, 32], strides = [1, 1]} : vector<1x128xf32> to vector<1x32xf32>
    %523 = vector.extract_strided_slice %513 {offsets = [0, 32], sizes = [1, 32], strides = [1, 1]} : vector<1x128xf32> to vector<1x32xf32>
    %524 = arith.addf %522, %523 : vector<1x32xf32>
    %525 = arith.negf %524 : vector<1x32xf32>
    %526 = math.exp %525 : vector<1x32xf32>
    %cst_142 = arith.constant 1.000000e+00 : f32
    %527 = vector.broadcast %cst_142 : f32 to vector<1x32xf32>
    %528 = arith.addf %527, %526 : vector<1x32xf32>
    %529 = arith.divf %527, %528 : vector<1x32xf32>
    %530 = vector.extract_strided_slice %512 {offsets = [0, 64], sizes = [1, 32], strides = [1, 1]} : vector<1x128xf32> to vector<1x32xf32>
    %531 = vector.extract_strided_slice %513 {offsets = [0, 64], sizes = [1, 32], strides = [1, 1]} : vector<1x128xf32> to vector<1x32xf32>
    %532 = arith.addf %531, %276 : vector<1x32xf32>
    %533 = arith.mulf %521, %532 : vector<1x32xf32>
    %534 = arith.addf %530, %533 : vector<1x32xf32>
    %535 = math.tanh %534 : vector<1x32xf32>
    %cst_143 = arith.constant 1.000000e+00 : f32
    %536 = vector.broadcast %cst_143 : f32 to vector<1x32xf32>
    %537 = arith.subf %536, %529 : vector<1x32xf32>
    %538 = arith.mulf %537, %535 : vector<1x32xf32>
    %539 = arith.mulf %529, %508 : vector<1x32xf32>
    %540 = arith.addf %538, %539 : vector<1x32xf32>
    %541 = arith.index_cast %c7_i32_138 : i32 to index
    %c0_144 = arith.constant 0 : index
    %542 = vector.load %arg10[%541, %c0_144] : memref<8x32xf32, #tpu.memory_space<vmem>>, vector<1x32xf32>
    tpu.vector_store %arg10[%541, %c0_144], %540 {strides = array<i32>} : memref<8x32xf32, #tpu.memory_space<vmem>>, vector<1x32xf32>,
    %c8_i32_145 = arith.constant 8 : i32
    %c1_146 = arith.constant 1 : index
    %c0_147 = arith.constant 0 : index
    %543 = vector.load %arg9[%c1_146, %c0_147] : memref<3x32xf32, #tpu.memory_space<vmem>>, vector<1x32xf32>
    tpu.vector_store %arg9[%c1_146, %c0_147], %540 {strides = array<i32>} : memref<3x32xf32, #tpu.memory_space<vmem>>, vector<1x32xf32>,
    %c2 = arith.constant 2 : index
    %c0_148 = arith.constant 0 : index
    %c0_149 = arith.constant 0 : index
    %544 = vector.load %arg3[%c2, %c0_148, %c0_149] : memref<3x32x128xf32, #tpu.memory_space<vmem>>, vector<1x32x128xf32>
    %545 = vector.shape_cast %544 : vector<1x32x128xf32> to vector<32x128xf32>
    %c2_150 = arith.constant 2 : index
    %c0_151 = arith.constant 0 : index
    %c0_152 = arith.constant 0 : index
    %546 = vector.load %arg5[%c2_150, %c0_151, %c0_152] : memref<3x1x32xf32, #tpu.memory_space<vmem>>, vector<1x1x32xf32>
    %547 = vector.shape_cast %546 : vector<1x1x32xf32> to vector<1x32xf32>
    %c0_153 = arith.constant 0 : index
    %c0_154 = arith.constant 0 : index
    %548 = vector.load %arg10[%c0_153, %c0_154] : memref<8x32xf32, #tpu.memory_space<vmem>>, vector<8x32xf32>
    %c2_155 = arith.constant 2 : index
    %c0_156 = arith.constant 0 : index
    %c0_157 = arith.constant 0 : index
    %549 = vector.load %arg2[%c2_155, %c0_156, %c0_157] : memref<3x32x128xf32, #tpu.memory_space<vmem>>, vector<1x32x128xf32>
    %550 = vector.shape_cast %549 : vector<1x32x128xf32> to vector<32x128xf32>
    %cst_158 = arith.constant dense<0.000000e+00> : vector<8x128xf32>
    %551 = tpu.matmul %548, %550, %cst_158 {dimension_numbers = #tpu.dot_dimension_numbers<[1], [0], [0], [1], [0, 0, 1, 1], [], []>} : vector<8x32xf32>, vector<32x128xf32>, vector<8x128xf32> -> vector<8x128xf32>
    %c2_159 = arith.constant 2 : index
    %c0_160 = arith.constant 0 : index
    %c0_161 = arith.constant 0 : index
    %552 = vector.load %arg4[%c2_159, %c0_160, %c0_161] : memref<3x1x128xf32, #tpu.memory_space<vmem>>, vector<1x1x128xf32>
    %553 = vector.shape_cast %552 : vector<1x1x128xf32> to vector<1x128xf32>
    %554 = vector.broadcast %553 : vector<1x128xf32> to vector<8x128xf32>
    %555 = arith.addf %551, %554 : vector<8x128xf32>
    %c0_162 = arith.constant 0 : index
    %c0_163 = arith.constant 0 : index
    %556 = vector.load %arg11[%c0_162, %c0_163] : memref<8x128xf32, #tpu.memory_space<vmem>>, vector<8x128xf32>
    tpu.vector_store %arg11[%c0_162, %c0_163], %555 {strides = array<i32>} : memref<8x128xf32, #tpu.memory_space<vmem>>, vector<8x128xf32>,
    %c2_164 = arith.constant 2 : index
    %c0_165 = arith.constant 0 : index
    %557 = vector.load %arg1[%c2_164, %c0_165] : memref<3x32xf32, #tpu.memory_space<vmem>>, vector<1x32xf32>
    %c0_i32_166 = arith.constant 0 : i32
    %558 = arith.index_cast %c0_i32_166 : i32 to index
    %c0_167 = arith.constant 0 : index
    %559 = vector.load %arg11[%558, %c0_167] : memref<8x128xf32, #tpu.memory_space<vmem>>, vector<1x128xf32>
    %cst_168 = arith.constant dense<0.000000e+00> : vector<1x128xf32>
    %560 = tpu.matmul %557, %545, %cst_168 {dimension_numbers = #tpu.dot_dimension_numbers<[1], [0], [0], [1], [0, 0, 1, 1], [], []>} : vector<1x32xf32>, vector<32x128xf32>, vector<1x128xf32> -> vector<1x128xf32>
    %561 = vector.extract_strided_slice %559 {offsets = [0, 0], sizes = [1, 32], strides = [1, 1]} : vector<1x128xf32> to vector<1x32xf32>
    %562 = vector.extract_strided_slice %560 {offsets = [0, 0], sizes = [1, 32], strides = [1, 1]} : vector<1x128xf32> to vector<1x32xf32>
    %563 = arith.addf %561, %562 : vector<1x32xf32>
    %564 = arith.negf %563 : vector<1x32xf32>
    %565 = math.exp %564 : vector<1x32xf32>
    %cst_169 = arith.constant 1.000000e+00 : f32
    %566 = vector.broadcast %cst_169 : f32 to vector<1x32xf32>
    %567 = arith.addf %566, %565 : vector<1x32xf32>
    %568 = arith.divf %566, %567 : vector<1x32xf32>
    %569 = vector.extract_strided_slice %559 {offsets = [0, 32], sizes = [1, 32], strides = [1, 1]} : vector<1x128xf32> to vector<1x32xf32>
    %570 = vector.extract_strided_slice %560 {offsets = [0, 32], sizes = [1, 32], strides = [1, 1]} : vector<1x128xf32> to vector<1x32xf32>
    %571 = arith.addf %569, %570 : vector<1x32xf32>
    %572 = arith.negf %571 : vector<1x32xf32>
    %573 = math.exp %572 : vector<1x32xf32>
    %cst_170 = arith.constant 1.000000e+00 : f32
    %574 = vector.broadcast %cst_170 : f32 to vector<1x32xf32>
    %575 = arith.addf %574, %573 : vector<1x32xf32>
    %576 = arith.divf %574, %575 : vector<1x32xf32>
    %577 = vector.extract_strided_slice %559 {offsets = [0, 64], sizes = [1, 32], strides = [1, 1]} : vector<1x128xf32> to vector<1x32xf32>
    %578 = vector.extract_strided_slice %560 {offsets = [0, 64], sizes = [1, 32], strides = [1, 1]} : vector<1x128xf32> to vector<1x32xf32>
    %579 = arith.addf %578, %547 : vector<1x32xf32>
    %580 = arith.mulf %568, %579 : vector<1x32xf32>
    %581 = arith.addf %577, %580 : vector<1x32xf32>
    %582 = math.tanh %581 : vector<1x32xf32>
    %cst_171 = arith.constant 1.000000e+00 : f32
    %583 = vector.broadcast %cst_171 : f32 to vector<1x32xf32>
    %584 = arith.subf %583, %576 : vector<1x32xf32>
    %585 = arith.mulf %584, %582 : vector<1x32xf32>
    %586 = arith.mulf %576, %557 : vector<1x32xf32>
    %587 = arith.addf %585, %586 : vector<1x32xf32>
    %588 = arith.index_cast %c0_i32_166 : i32 to index
    %c0_172 = arith.constant 0 : index
    %589 = vector.load %arg10[%588, %c0_172] : memref<8x32xf32, #tpu.memory_space<vmem>>, vector<1x32xf32>
    tpu.vector_store %arg10[%588, %c0_172], %587 {strides = array<i32>} : memref<8x32xf32, #tpu.memory_space<vmem>>, vector<1x32xf32>,
    %c1_i32_173 = arith.constant 1 : i32
    %590 = arith.index_cast %c1_i32_173 : i32 to index
    %c0_174 = arith.constant 0 : index
    %591 = vector.load %arg11[%590, %c0_174] : memref<8x128xf32, #tpu.memory_space<vmem>>, vector<1x128xf32>
    %cst_175 = arith.constant dense<0.000000e+00> : vector<1x128xf32>
    %592 = tpu.matmul %587, %545, %cst_175 {dimension_numbers = #tpu.dot_dimension_numbers<[1], [0], [0], [1], [0, 0, 1, 1], [], []>} : vector<1x32xf32>, vector<32x128xf32>, vector<1x128xf32> -> vector<1x128xf32>
    %593 = vector.extract_strided_slice %591 {offsets = [0, 0], sizes = [1, 32], strides = [1, 1]} : vector<1x128xf32> to vector<1x32xf32>
    %594 = vector.extract_strided_slice %592 {offsets = [0, 0], sizes = [1, 32], strides = [1, 1]} : vector<1x128xf32> to vector<1x32xf32>
    %595 = arith.addf %593, %594 : vector<1x32xf32>
    %596 = arith.negf %595 : vector<1x32xf32>
    %597 = math.exp %596 : vector<1x32xf32>
    %cst_176 = arith.constant 1.000000e+00 : f32
    %598 = vector.broadcast %cst_176 : f32 to vector<1x32xf32>
    %599 = arith.addf %598, %597 : vector<1x32xf32>
    %600 = arith.divf %598, %599 : vector<1x32xf32>
    %601 = vector.extract_strided_slice %591 {offsets = [0, 32], sizes = [1, 32], strides = [1, 1]} : vector<1x128xf32> to vector<1x32xf32>
    %602 = vector.extract_strided_slice %592 {offsets = [0, 32], sizes = [1, 32], strides = [1, 1]} : vector<1x128xf32> to vector<1x32xf32>
    %603 = arith.addf %601, %602 : vector<1x32xf32>
    %604 = arith.negf %603 : vector<1x32xf32>
    %605 = math.exp %604 : vector<1x32xf32>
    %cst_177 = arith.constant 1.000000e+00 : f32
    %606 = vector.broadcast %cst_177 : f32 to vector<1x32xf32>
    %607 = arith.addf %606, %605 : vector<1x32xf32>
    %608 = arith.divf %606, %607 : vector<1x32xf32>
    %609 = vector.extract_strided_slice %591 {offsets = [0, 64], sizes = [1, 32], strides = [1, 1]} : vector<1x128xf32> to vector<1x32xf32>
    %610 = vector.extract_strided_slice %592 {offsets = [0, 64], sizes = [1, 32], strides = [1, 1]} : vector<1x128xf32> to vector<1x32xf32>
    %611 = arith.addf %610, %547 : vector<1x32xf32>
    %612 = arith.mulf %600, %611 : vector<1x32xf32>
    %613 = arith.addf %609, %612 : vector<1x32xf32>
    %614 = math.tanh %613 : vector<1x32xf32>
    %cst_178 = arith.constant 1.000000e+00 : f32
    %615 = vector.broadcast %cst_178 : f32 to vector<1x32xf32>
    %616 = arith.subf %615, %608 : vector<1x32xf32>
    %617 = arith.mulf %616, %614 : vector<1x32xf32>
    %618 = arith.mulf %608, %587 : vector<1x32xf32>
    %619 = arith.addf %617, %618 : vector<1x32xf32>
    %620 = arith.index_cast %c1_i32_173 : i32 to index
    %c0_179 = arith.constant 0 : index
    %621 = vector.load %arg10[%620, %c0_179] : memref<8x32xf32, #tpu.memory_space<vmem>>, vector<1x32xf32>
    tpu.vector_store %arg10[%620, %c0_179], %619 {strides = array<i32>} : memref<8x32xf32, #tpu.memory_space<vmem>>, vector<1x32xf32>,
    %c2_i32_180 = arith.constant 2 : i32
    %622 = arith.index_cast %c2_i32_180 : i32 to index
    %c0_181 = arith.constant 0 : index
    %623 = vector.load %arg11[%622, %c0_181] : memref<8x128xf32, #tpu.memory_space<vmem>>, vector<1x128xf32>
    %cst_182 = arith.constant dense<0.000000e+00> : vector<1x128xf32>
    %624 = tpu.matmul %619, %545, %cst_182 {dimension_numbers = #tpu.dot_dimension_numbers<[1], [0], [0], [1], [0, 0, 1, 1], [], []>} : vector<1x32xf32>, vector<32x128xf32>, vector<1x128xf32> -> vector<1x128xf32>
    %625 = vector.extract_strided_slice %623 {offsets = [0, 0], sizes = [1, 32], strides = [1, 1]} : vector<1x128xf32> to vector<1x32xf32>
    %626 = vector.extract_strided_slice %624 {offsets = [0, 0], sizes = [1, 32], strides = [1, 1]} : vector<1x128xf32> to vector<1x32xf32>
    %627 = arith.addf %625, %626 : vector<1x32xf32>
    %628 = arith.negf %627 : vector<1x32xf32>
    %629 = math.exp %628 : vector<1x32xf32>
    %cst_183 = arith.constant 1.000000e+00 : f32
    %630 = vector.broadcast %cst_183 : f32 to vector<1x32xf32>
    %631 = arith.addf %630, %629 : vector<1x32xf32>
    %632 = arith.divf %630, %631 : vector<1x32xf32>
    %633 = vector.extract_strided_slice %623 {offsets = [0, 32], sizes = [1, 32], strides = [1, 1]} : vector<1x128xf32> to vector<1x32xf32>
    %634 = vector.extract_strided_slice %624 {offsets = [0, 32], sizes = [1, 32], strides = [1, 1]} : vector<1x128xf32> to vector<1x32xf32>
    %635 = arith.addf %633, %634 : vector<1x32xf32>
    %636 = arith.negf %635 : vector<1x32xf32>
    %637 = math.exp %636 : vector<1x32xf32>
    %cst_184 = arith.constant 1.000000e+00 : f32
    %638 = vector.broadcast %cst_184 : f32 to vector<1x32xf32>
    %639 = arith.addf %638, %637 : vector<1x32xf32>
    %640 = arith.divf %638, %639 : vector<1x32xf32>
    %641 = vector.extract_strided_slice %623 {offsets = [0, 64], sizes = [1, 32], strides = [1, 1]} : vector<1x128xf32> to vector<1x32xf32>
    %642 = vector.extract_strided_slice %624 {offsets = [0, 64], sizes = [1, 32], strides = [1, 1]} : vector<1x128xf32> to vector<1x32xf32>
    %643 = arith.addf %642, %547 : vector<1x32xf32>
    %644 = arith.mulf %632, %643 : vector<1x32xf32>
    %645 = arith.addf %641, %644 : vector<1x32xf32>
    %646 = math.tanh %645 : vector<1x32xf32>
    %cst_185 = arith.constant 1.000000e+00 : f32
    %647 = vector.broadcast %cst_185 : f32 to vector<1x32xf32>
    %648 = arith.subf %647, %640 : vector<1x32xf32>
    %649 = arith.mulf %648, %646 : vector<1x32xf32>
    %650 = arith.mulf %640, %619 : vector<1x32xf32>
    %651 = arith.addf %649, %650 : vector<1x32xf32>
    %652 = arith.index_cast %c2_i32_180 : i32 to index
    %c0_186 = arith.constant 0 : index
    %653 = vector.load %arg10[%652, %c0_186] : memref<8x32xf32, #tpu.memory_space<vmem>>, vector<1x32xf32>
    tpu.vector_store %arg10[%652, %c0_186], %651 {strides = array<i32>} : memref<8x32xf32, #tpu.memory_space<vmem>>, vector<1x32xf32>,
    %c3_i32_187 = arith.constant 3 : i32
    %654 = arith.index_cast %c3_i32_187 : i32 to index
    %c0_188 = arith.constant 0 : index
    %655 = vector.load %arg11[%654, %c0_188] : memref<8x128xf32, #tpu.memory_space<vmem>>, vector<1x128xf32>
    %cst_189 = arith.constant dense<0.000000e+00> : vector<1x128xf32>
    %656 = tpu.matmul %651, %545, %cst_189 {dimension_numbers = #tpu.dot_dimension_numbers<[1], [0], [0], [1], [0, 0, 1, 1], [], []>} : vector<1x32xf32>, vector<32x128xf32>, vector<1x128xf32> -> vector<1x128xf32>
    %657 = vector.extract_strided_slice %655 {offsets = [0, 0], sizes = [1, 32], strides = [1, 1]} : vector<1x128xf32> to vector<1x32xf32>
    %658 = vector.extract_strided_slice %656 {offsets = [0, 0], sizes = [1, 32], strides = [1, 1]} : vector<1x128xf32> to vector<1x32xf32>
    %659 = arith.addf %657, %658 : vector<1x32xf32>
    %660 = arith.negf %659 : vector<1x32xf32>
    %661 = math.exp %660 : vector<1x32xf32>
    %cst_190 = arith.constant 1.000000e+00 : f32
    %662 = vector.broadcast %cst_190 : f32 to vector<1x32xf32>
    %663 = arith.addf %662, %661 : vector<1x32xf32>
    %664 = arith.divf %662, %663 : vector<1x32xf32>
    %665 = vector.extract_strided_slice %655 {offsets = [0, 32], sizes = [1, 32], strides = [1, 1]} : vector<1x128xf32> to vector<1x32xf32>
    %666 = vector.extract_strided_slice %656 {offsets = [0, 32], sizes = [1, 32], strides = [1, 1]} : vector<1x128xf32> to vector<1x32xf32>
    %667 = arith.addf %665, %666 : vector<1x32xf32>
    %668 = arith.negf %667 : vector<1x32xf32>
    %669 = math.exp %668 : vector<1x32xf32>
    %cst_191 = arith.constant 1.000000e+00 : f32
    %670 = vector.broadcast %cst_191 : f32 to vector<1x32xf32>
    %671 = arith.addf %670, %669 : vector<1x32xf32>
    %672 = arith.divf %670, %671 : vector<1x32xf32>
    %673 = vector.extract_strided_slice %655 {offsets = [0, 64], sizes = [1, 32], strides = [1, 1]} : vector<1x128xf32> to vector<1x32xf32>
    %674 = vector.extract_strided_slice %656 {offsets = [0, 64], sizes = [1, 32], strides = [1, 1]} : vector<1x128xf32> to vector<1x32xf32>
    %675 = arith.addf %674, %547 : vector<1x32xf32>
    %676 = arith.mulf %664, %675 : vector<1x32xf32>
    %677 = arith.addf %673, %676 : vector<1x32xf32>
    %678 = math.tanh %677 : vector<1x32xf32>
    %cst_192 = arith.constant 1.000000e+00 : f32
    %679 = vector.broadcast %cst_192 : f32 to vector<1x32xf32>
    %680 = arith.subf %679, %672 : vector<1x32xf32>
    %681 = arith.mulf %680, %678 : vector<1x32xf32>
    %682 = arith.mulf %672, %651 : vector<1x32xf32>
    %683 = arith.addf %681, %682 : vector<1x32xf32>
    %684 = arith.index_cast %c3_i32_187 : i32 to index
    %c0_193 = arith.constant 0 : index
    %685 = vector.load %arg10[%684, %c0_193] : memref<8x32xf32, #tpu.memory_space<vmem>>, vector<1x32xf32>
    tpu.vector_store %arg10[%684, %c0_193], %683 {strides = array<i32>} : memref<8x32xf32, #tpu.memory_space<vmem>>, vector<1x32xf32>,
    %c4_i32_194 = arith.constant 4 : i32
    %686 = arith.index_cast %c4_i32_194 : i32 to index
    %c0_195 = arith.constant 0 : index
    %687 = vector.load %arg11[%686, %c0_195] : memref<8x128xf32, #tpu.memory_space<vmem>>, vector<1x128xf32>
    %cst_196 = arith.constant dense<0.000000e+00> : vector<1x128xf32>
    %688 = tpu.matmul %683, %545, %cst_196 {dimension_numbers = #tpu.dot_dimension_numbers<[1], [0], [0], [1], [0, 0, 1, 1], [], []>} : vector<1x32xf32>, vector<32x128xf32>, vector<1x128xf32> -> vector<1x128xf32>
    %689 = vector.extract_strided_slice %687 {offsets = [0, 0], sizes = [1, 32], strides = [1, 1]} : vector<1x128xf32> to vector<1x32xf32>
    %690 = vector.extract_strided_slice %688 {offsets = [0, 0], sizes = [1, 32], strides = [1, 1]} : vector<1x128xf32> to vector<1x32xf32>
    %691 = arith.addf %689, %690 : vector<1x32xf32>
    %692 = arith.negf %691 : vector<1x32xf32>
    %693 = math.exp %692 : vector<1x32xf32>
    %cst_197 = arith.constant 1.000000e+00 : f32
    %694 = vector.broadcast %cst_197 : f32 to vector<1x32xf32>
    %695 = arith.addf %694, %693 : vector<1x32xf32>
    %696 = arith.divf %694, %695 : vector<1x32xf32>
    %697 = vector.extract_strided_slice %687 {offsets = [0, 32], sizes = [1, 32], strides = [1, 1]} : vector<1x128xf32> to vector<1x32xf32>
    %698 = vector.extract_strided_slice %688 {offsets = [0, 32], sizes = [1, 32], strides = [1, 1]} : vector<1x128xf32> to vector<1x32xf32>
    %699 = arith.addf %697, %698 : vector<1x32xf32>
    %700 = arith.negf %699 : vector<1x32xf32>
    %701 = math.exp %700 : vector<1x32xf32>
    %cst_198 = arith.constant 1.000000e+00 : f32
    %702 = vector.broadcast %cst_198 : f32 to vector<1x32xf32>
    %703 = arith.addf %702, %701 : vector<1x32xf32>
    %704 = arith.divf %702, %703 : vector<1x32xf32>
    %705 = vector.extract_strided_slice %687 {offsets = [0, 64], sizes = [1, 32], strides = [1, 1]} : vector<1x128xf32> to vector<1x32xf32>
    %706 = vector.extract_strided_slice %688 {offsets = [0, 64], sizes = [1, 32], strides = [1, 1]} : vector<1x128xf32> to vector<1x32xf32>
    %707 = arith.addf %706, %547 : vector<1x32xf32>
    %708 = arith.mulf %696, %707 : vector<1x32xf32>
    %709 = arith.addf %705, %708 : vector<1x32xf32>
    %710 = math.tanh %709 : vector<1x32xf32>
    %cst_199 = arith.constant 1.000000e+00 : f32
    %711 = vector.broadcast %cst_199 : f32 to vector<1x32xf32>
    %712 = arith.subf %711, %704 : vector<1x32xf32>
    %713 = arith.mulf %712, %710 : vector<1x32xf32>
    %714 = arith.mulf %704, %683 : vector<1x32xf32>
    %715 = arith.addf %713, %714 : vector<1x32xf32>
    %716 = arith.index_cast %c4_i32_194 : i32 to index
    %c0_200 = arith.constant 0 : index
    %717 = vector.load %arg10[%716, %c0_200] : memref<8x32xf32, #tpu.memory_space<vmem>>, vector<1x32xf32>
    tpu.vector_store %arg10[%716, %c0_200], %715 {strides = array<i32>} : memref<8x32xf32, #tpu.memory_space<vmem>>, vector<1x32xf32>,
    %c5_i32_201 = arith.constant 5 : i32
    %718 = arith.index_cast %c5_i32_201 : i32 to index
    %c0_202 = arith.constant 0 : index
    %719 = vector.load %arg11[%718, %c0_202] : memref<8x128xf32, #tpu.memory_space<vmem>>, vector<1x128xf32>
    %cst_203 = arith.constant dense<0.000000e+00> : vector<1x128xf32>
    %720 = tpu.matmul %715, %545, %cst_203 {dimension_numbers = #tpu.dot_dimension_numbers<[1], [0], [0], [1], [0, 0, 1, 1], [], []>} : vector<1x32xf32>, vector<32x128xf32>, vector<1x128xf32> -> vector<1x128xf32>
    %721 = vector.extract_strided_slice %719 {offsets = [0, 0], sizes = [1, 32], strides = [1, 1]} : vector<1x128xf32> to vector<1x32xf32>
    %722 = vector.extract_strided_slice %720 {offsets = [0, 0], sizes = [1, 32], strides = [1, 1]} : vector<1x128xf32> to vector<1x32xf32>
    %723 = arith.addf %721, %722 : vector<1x32xf32>
    %724 = arith.negf %723 : vector<1x32xf32>
    %725 = math.exp %724 : vector<1x32xf32>
    %cst_204 = arith.constant 1.000000e+00 : f32
    %726 = vector.broadcast %cst_204 : f32 to vector<1x32xf32>
    %727 = arith.addf %726, %725 : vector<1x32xf32>
    %728 = arith.divf %726, %727 : vector<1x32xf32>
    %729 = vector.extract_strided_slice %719 {offsets = [0, 32], sizes = [1, 32], strides = [1, 1]} : vector<1x128xf32> to vector<1x32xf32>
    %730 = vector.extract_strided_slice %720 {offsets = [0, 32], sizes = [1, 32], strides = [1, 1]} : vector<1x128xf32> to vector<1x32xf32>
    %731 = arith.addf %729, %730 : vector<1x32xf32>
    %732 = arith.negf %731 : vector<1x32xf32>
    %733 = math.exp %732 : vector<1x32xf32>
    %cst_205 = arith.constant 1.000000e+00 : f32
    %734 = vector.broadcast %cst_205 : f32 to vector<1x32xf32>
    %735 = arith.addf %734, %733 : vector<1x32xf32>
    %736 = arith.divf %734, %735 : vector<1x32xf32>
    %737 = vector.extract_strided_slice %719 {offsets = [0, 64], sizes = [1, 32], strides = [1, 1]} : vector<1x128xf32> to vector<1x32xf32>
    %738 = vector.extract_strided_slice %720 {offsets = [0, 64], sizes = [1, 32], strides = [1, 1]} : vector<1x128xf32> to vector<1x32xf32>
    %739 = arith.addf %738, %547 : vector<1x32xf32>
    %740 = arith.mulf %728, %739 : vector<1x32xf32>
    %741 = arith.addf %737, %740 : vector<1x32xf32>
    %742 = math.tanh %741 : vector<1x32xf32>
    %cst_206 = arith.constant 1.000000e+00 : f32
    %743 = vector.broadcast %cst_206 : f32 to vector<1x32xf32>
    %744 = arith.subf %743, %736 : vector<1x32xf32>
    %745 = arith.mulf %744, %742 : vector<1x32xf32>
    %746 = arith.mulf %736, %715 : vector<1x32xf32>
    %747 = arith.addf %745, %746 : vector<1x32xf32>
    %748 = arith.index_cast %c5_i32_201 : i32 to index
    %c0_207 = arith.constant 0 : index
    %749 = vector.load %arg10[%748, %c0_207] : memref<8x32xf32, #tpu.memory_space<vmem>>, vector<1x32xf32>
    tpu.vector_store %arg10[%748, %c0_207], %747 {strides = array<i32>} : memref<8x32xf32, #tpu.memory_space<vmem>>, vector<1x32xf32>,
    %c6_i32_208 = arith.constant 6 : i32
    %750 = arith.index_cast %c6_i32_208 : i32 to index
    %c0_209 = arith.constant 0 : index
    %751 = vector.load %arg11[%750, %c0_209] : memref<8x128xf32, #tpu.memory_space<vmem>>, vector<1x128xf32>
    %cst_210 = arith.constant dense<0.000000e+00> : vector<1x128xf32>
    %752 = tpu.matmul %747, %545, %cst_210 {dimension_numbers = #tpu.dot_dimension_numbers<[1], [0], [0], [1], [0, 0, 1, 1], [], []>} : vector<1x32xf32>, vector<32x128xf32>, vector<1x128xf32> -> vector<1x128xf32>
    %753 = vector.extract_strided_slice %751 {offsets = [0, 0], sizes = [1, 32], strides = [1, 1]} : vector<1x128xf32> to vector<1x32xf32>
    %754 = vector.extract_strided_slice %752 {offsets = [0, 0], sizes = [1, 32], strides = [1, 1]} : vector<1x128xf32> to vector<1x32xf32>
    %755 = arith.addf %753, %754 : vector<1x32xf32>
    %756 = arith.negf %755 : vector<1x32xf32>
    %757 = math.exp %756 : vector<1x32xf32>
    %cst_211 = arith.constant 1.000000e+00 : f32
    %758 = vector.broadcast %cst_211 : f32 to vector<1x32xf32>
    %759 = arith.addf %758, %757 : vector<1x32xf32>
    %760 = arith.divf %758, %759 : vector<1x32xf32>
    %761 = vector.extract_strided_slice %751 {offsets = [0, 32], sizes = [1, 32], strides = [1, 1]} : vector<1x128xf32> to vector<1x32xf32>
    %762 = vector.extract_strided_slice %752 {offsets = [0, 32], sizes = [1, 32], strides = [1, 1]} : vector<1x128xf32> to vector<1x32xf32>
    %763 = arith.addf %761, %762 : vector<1x32xf32>
    %764 = arith.negf %763 : vector<1x32xf32>
    %765 = math.exp %764 : vector<1x32xf32>
    %cst_212 = arith.constant 1.000000e+00 : f32
    %766 = vector.broadcast %cst_212 : f32 to vector<1x32xf32>
    %767 = arith.addf %766, %765 : vector<1x32xf32>
    %768 = arith.divf %766, %767 : vector<1x32xf32>
    %769 = vector.extract_strided_slice %751 {offsets = [0, 64], sizes = [1, 32], strides = [1, 1]} : vector<1x128xf32> to vector<1x32xf32>
    %770 = vector.extract_strided_slice %752 {offsets = [0, 64], sizes = [1, 32], strides = [1, 1]} : vector<1x128xf32> to vector<1x32xf32>
    %771 = arith.addf %770, %547 : vector<1x32xf32>
    %772 = arith.mulf %760, %771 : vector<1x32xf32>
    %773 = arith.addf %769, %772 : vector<1x32xf32>
    %774 = math.tanh %773 : vector<1x32xf32>
    %cst_213 = arith.constant 1.000000e+00 : f32
    %775 = vector.broadcast %cst_213 : f32 to vector<1x32xf32>
    %776 = arith.subf %775, %768 : vector<1x32xf32>
    %777 = arith.mulf %776, %774 : vector<1x32xf32>
    %778 = arith.mulf %768, %747 : vector<1x32xf32>
    %779 = arith.addf %777, %778 : vector<1x32xf32>
    %780 = arith.index_cast %c6_i32_208 : i32 to index
    %c0_214 = arith.constant 0 : index
    %781 = vector.load %arg10[%780, %c0_214] : memref<8x32xf32, #tpu.memory_space<vmem>>, vector<1x32xf32>
    tpu.vector_store %arg10[%780, %c0_214], %779 {strides = array<i32>} : memref<8x32xf32, #tpu.memory_space<vmem>>, vector<1x32xf32>,
    %c7_i32_215 = arith.constant 7 : i32
    %782 = arith.index_cast %c7_i32_215 : i32 to index
    %c0_216 = arith.constant 0 : index
    %783 = vector.load %arg11[%782, %c0_216] : memref<8x128xf32, #tpu.memory_space<vmem>>, vector<1x128xf32>
    %cst_217 = arith.constant dense<0.000000e+00> : vector<1x128xf32>
    %784 = tpu.matmul %779, %545, %cst_217 {dimension_numbers = #tpu.dot_dimension_numbers<[1], [0], [0], [1], [0, 0, 1, 1], [], []>} : vector<1x32xf32>, vector<32x128xf32>, vector<1x128xf32> -> vector<1x128xf32>
    %785 = vector.extract_strided_slice %783 {offsets = [0, 0], sizes = [1, 32], strides = [1, 1]} : vector<1x128xf32> to vector<1x32xf32>
    %786 = vector.extract_strided_slice %784 {offsets = [0, 0], sizes = [1, 32], strides = [1, 1]} : vector<1x128xf32> to vector<1x32xf32>
    %787 = arith.addf %785, %786 : vector<1x32xf32>
    %788 = arith.negf %787 : vector<1x32xf32>
    %789 = math.exp %788 : vector<1x32xf32>
    %cst_218 = arith.constant 1.000000e+00 : f32
    %790 = vector.broadcast %cst_218 : f32 to vector<1x32xf32>
    %791 = arith.addf %790, %789 : vector<1x32xf32>
    %792 = arith.divf %790, %791 : vector<1x32xf32>
    %793 = vector.extract_strided_slice %783 {offsets = [0, 32], sizes = [1, 32], strides = [1, 1]} : vector<1x128xf32> to vector<1x32xf32>
    %794 = vector.extract_strided_slice %784 {offsets = [0, 32], sizes = [1, 32], strides = [1, 1]} : vector<1x128xf32> to vector<1x32xf32>
    %795 = arith.addf %793, %794 : vector<1x32xf32>
    %796 = arith.negf %795 : vector<1x32xf32>
    %797 = math.exp %796 : vector<1x32xf32>
    %cst_219 = arith.constant 1.000000e+00 : f32
    %798 = vector.broadcast %cst_219 : f32 to vector<1x32xf32>
    %799 = arith.addf %798, %797 : vector<1x32xf32>
    %800 = arith.divf %798, %799 : vector<1x32xf32>
    %801 = vector.extract_strided_slice %783 {offsets = [0, 64], sizes = [1, 32], strides = [1, 1]} : vector<1x128xf32> to vector<1x32xf32>
    %802 = vector.extract_strided_slice %784 {offsets = [0, 64], sizes = [1, 32], strides = [1, 1]} : vector<1x128xf32> to vector<1x32xf32>
    %803 = arith.addf %802, %547 : vector<1x32xf32>
    %804 = arith.mulf %792, %803 : vector<1x32xf32>
    %805 = arith.addf %801, %804 : vector<1x32xf32>
    %806 = math.tanh %805 : vector<1x32xf32>
    %cst_220 = arith.constant 1.000000e+00 : f32
    %807 = vector.broadcast %cst_220 : f32 to vector<1x32xf32>
    %808 = arith.subf %807, %800 : vector<1x32xf32>
    %809 = arith.mulf %808, %806 : vector<1x32xf32>
    %810 = arith.mulf %800, %779 : vector<1x32xf32>
    %811 = arith.addf %809, %810 : vector<1x32xf32>
    %812 = arith.index_cast %c7_i32_215 : i32 to index
    %c0_221 = arith.constant 0 : index
    %813 = vector.load %arg10[%812, %c0_221] : memref<8x32xf32, #tpu.memory_space<vmem>>, vector<1x32xf32>
    tpu.vector_store %arg10[%812, %c0_221], %811 {strides = array<i32>} : memref<8x32xf32, #tpu.memory_space<vmem>>, vector<1x32xf32>,
    %c8_i32_222 = arith.constant 8 : i32
    %c2_223 = arith.constant 2 : index
    %c0_224 = arith.constant 0 : index
    %814 = vector.load %arg9[%c2_223, %c0_224] : memref<3x32xf32, #tpu.memory_space<vmem>>, vector<1x32xf32>
    tpu.vector_store %arg9[%c2_223, %c0_224], %811 {strides = array<i32>} : memref<3x32xf32, #tpu.memory_space<vmem>>, vector<1x32xf32>,
    %c0_225 = arith.constant 0 : index
    %c0_226 = arith.constant 0 : index
    %815 = vector.load %arg10[%c0_225, %c0_226] : memref<8x32xf32, #tpu.memory_space<vmem>>, vector<8x32xf32>
    %c0_227 = arith.constant 0 : index
    %c0_228 = arith.constant 0 : index
    %816 = vector.load %arg6[%c0_227, %c0_228] : memref<32x16xf32, #tpu.memory_space<vmem>>, vector<32x16xf32>
    %cst_229 = arith.constant dense<0.000000e+00> : vector<8x16xf32>
    %817 = tpu.matmul %815, %816, %cst_229 {dimension_numbers = #tpu.dot_dimension_numbers<[1], [0], [0], [1], [0, 0, 1, 1], [], []>} : vector<8x32xf32>, vector<32x16xf32>, vector<8x16xf32> -> vector<8x16xf32>
    %c0_230 = arith.constant 0 : index
    %c0_231 = arith.constant 0 : index
    %818 = vector.load %arg7[%c0_230, %c0_231] : memref<1x16xf32, #tpu.memory_space<vmem>>, vector<1x16xf32>
    %819 = vector.broadcast %818 : vector<1x16xf32> to vector<8x16xf32>
    %820 = arith.addf %817, %819 : vector<8x16xf32>
    %c0_232 = arith.constant 0 : index
    %c0_233 = arith.constant 0 : index
    %821 = vector.load %arg8[%c0_232, %c0_233] : memref<8x16xf32, #tpu.memory_space<vmem>>, vector<8x16xf32>
    tpu.vector_store %arg8[%c0_232, %c0_233], %820 {strides = array<i32>} : memref<8x16xf32, #tpu.memory_space<vmem>>, vector<8x16xf32>,
    return
  }
}

</mosaic_0001>

<bundles_post_ra>
// kernel: rnn_forward.1
= control target key start
LH: loop header
LB: loop body
LE: loop exit
PB: predicated region body
PF: predicated region fallthrough
CT: control target
= control target key end

     0   :  { %15 = vsyncpa [#allocation5], 0  ;;  %s4462_s0 = inlined_call_operand.vmem [shape: f32[8,32], index: 0, kind: input, shape index: {}]   ;;  %s4463_s1 = inlined_call_operand.vmem [shape: f32[3,32], index: 1, kind: input, shape index: {}]   ;;  %s4464_s2 = inlined_call_operand.vmem [shape: f32[3,32,128], index: 2, kind: input, shape index: {}]   ;;  %s4465_s3 = inlined_call_operand.hbm [shape: f32[3,32,128], index: 3, kind: input, shape index: {}]   ;;  %s4466_s4 = inlined_call_operand.vmem [shape: f32[3,1,128], index: 4, kind: input, shape index: {}]   ;;  %s4467_s5 = inlined_call_operand.vmem [shape: f32[3,1,32], index: 5, kind: input, shape index: {}]   ;;  %s4468_s6 = inlined_call_operand.vmem [shape: f32[32,16], index: 6, kind: input, shape index: {}]   ;;  %s4469_s7 = inlined_call_operand.vmem [shape: f32[1,16], index: 7, kind: input, shape index: {}]   ;;  %s4470_s8 = inlined_call_operand.hbm [shape: f32[8,16], index: 8, kind: output, shape index: {0}]   ;;  %s4471_s9 = inlined_call_operand.hbm [shape: f32[3,32], index: 9, kind: output, shape index: {1}]  }
   0x1   :  { %16 = vsyncpa [#allocation6], 0 }
   0x2   :  { %17 = vsyncpa [#allocation9], 0  ;;  %s3924_s30 = smov [#allocation4]   ;;  %s3852_s13 = scalar_lea.hbm %s4465_s3, 1536 }
   0x3   :  { %s29_s10 = sshll.u32 %s3924_s30, 4  ;;  %p3853_p0 = scmp.ne.s32.totalorder %s4465_s3, %s3852_s13  ;;  %s30_s10 = int_to_ptr.vmem [resolvable:$true] %s29_s10 }
   0x4   :  { %p3856_p1 = scmp.lt.u32.totalorder %s3852_s13, %s4465_s3 }
   0x6   :  { %p3858_p2 = pnand %p3856_p1, %p3853_p0 }
   0x8   :  { %3861 = shalt.err (!%p3858_p2)
}
   0x9   :  { %s3862_s18 = scalar_lea.vmem %s30_s10, 1536  ;;  %p3867_p4 = scmp.lt.s32.totalorder %s30_s10, %s30_s10 }
   0xa   :  { %p3863_p3 = scmp.ne.s32.totalorder %s30_s10, %s3862_s18  ;;  %p3868_p5 = scmp.lt.s32.totalorder %s3862_s18, %s3862_s18 }
   0xc   :  { %p3869_p6 = por %p3868_p5, %p3867_p4 }
   0xe   :  { %p3870_p7 = pnand %p3869_p6, %p3863_p3 }
  0x10   :  { %3873 = shalt.err (!%p3870_p7)
}
  0x11   :  { %s3925_s19 = smov 128   ;;  %s3926_s20 = smov 8  }
  0x12   :  { %35 = dma.hbm_to_vmem [thread:$0]  %s4465_s3, 1536, %s30_s10, [#allocation5], %s3925_s19, %s3925_s19, %s3926_s20  }
  0x13   :  { %3918 = dma.done.wait [#allocation5], 1536  }
  0x14   :  { %3919 = vsyncadd [#allocation5], 4294965760  ;;  %v3927_v0 = vmov 0.0|0.0   ;;  %vm3928_vm0 = vmmov 0   ;;  %v3929_v1 = vmov 0.0   ;;  %v56_v2 = vld [vmem:[%s4464_s2] sm:$0xff] }
  0x15   :  { %3529 = vmatprep.subr.bf16.mxu0 %v3927_v0  ;;  %3535 = vmatprep.subr.bf16.mxu1 %v3927_v0  ;;  %v57_v3 = vld [vmem:[%s4464_s2 + $0x8] sm:$0xff]  ;;  %vm48_vm1 = vcmask 261120   ;;  %v51_v6 = vld [vmem:[#allocation4 + $0x8] sm:$0xff]  ;;  %v59_v8 = vld [vmem:[%s4464_s2 + $0x18] sm:$0xff]  ;;  %s3930_s13 = smov 64   ;;  %s3931_s17 = smov 32  }
  0x16   :  { %3229 = vmatprep.mubr.msk.f32.mxu0 %vm3928_vm0, %v3929_v1  ;;  %3240 = vmatprep.mubr.msk.f32.mxu1 %vm3928_vm0, %v3929_v1  ;;  %v50_v4 = vld [vmem:[#allocation4] sm:$0xff]  ;;  %v3530_v5 = vpack.c.bf16 %v57_v3, %v56_v2  ;;  %v58_v7 = vld [vmem:[%s4464_s2 + $0x10] sm:$0xff]  ;;  %v52_v10 = vld [vmem:[#allocation4 + $0x10] sm:$0xff]  ;;  %s3932_s18 = smov 96   ;;  %vm258_vm2 = vcmask 253952  }
  0x17   :  { %v4015_v9 = vpack.c.bf16 %v51_v6, %v50_v4  ;;  %v53_v11 = vld [vmem:[#allocation4 + $0x18] sm:$0xff]  ;;  %v3533_v13 = vpack.c.bf16 %v59_v8, %v58_v7 }
  0x18   :  { %v47_v12 = vld [vmem:[%s4462_s0] sm:$0xff]  ;;  %3531 = vmatpush3.bf16.msra.mxu0 %v3530_v5  ;;  %v4026_v15 = vpack.c.bf16 %v53_v11, %v52_v10 }
  0x19   :  { %49 = vst.msk [vmem:[#allocation2] sm:$0xff] %vm48_vm1, %v47_v12  ;;  %v3014_v14 = vld [vmem:[%s4467_s5] ss:$0 sm:$0xff]  ;;  %3537 = vmatpush3.bf16.msra.mxu1 %v4015_v9  ;;  %3532 = vmatprep.subr.bf16.mxu0 %v3927_v0 }
  0x1a   :  { %3538 = vmatprep.subr.bf16.mxu1 %v3927_v0  ;;  %228 = vrot.lane.b32.xlu0 %v3014_v14, %s3930_s13  ;;  %v141_v16 = vld [vmem:[%s4463_s1] sm:$0x1] }
  0x1b   :  { %v3010_v19 = vld [vmem:[%s4466_s4] ss:$0 sm:$0xff] }
  0x1c   :  { %3534 = vmatpush3.bf16.msra.mxu0 %v3533_v13 }
  0x1d   :  { %3540 = vmatpush3.bf16.msra.mxu1 %v4026_v15  ;;  %3541 = vmatprep.subr.bf16.mxu0 %v3927_v0 }
  0x1e   :  { %3547 = vmatprep.subr.bf16.mxu1 %v3927_v0 }
  0x20   :  { %v55_v17 = vld [vmem:[#allocation2] sm:$0xff]  ;;  %3241 = vmatmul.mubr.msk.f32.vlgmr.msra.gmra.mrb[0].mxu1 %vm48_vm1, %v141_v16 }
  0x21   :  { %3230 = vmatmul.mubr.msk.f32.vlgmr.msra.gmra.mrb[0].mxu0 %vm48_vm1, %v55_v17  ;;  %3549 = vmatpush3.bf16.msra.mxu1 %v4015_v9 }
  0x22   :  { %3543 = vmatpush3.bf16.msra.mxu0 %v4015_v9  ;;  %3251 = vmatprep.mubr.msk.f32.mxu0 %vm3928_vm0, %v3929_v1 }
  0x23   :  { %3544 = vmatprep.subr.bf16.mxu0 %v3927_v0  ;;  %3550 = vmatprep.subr.bf16.mxu1 %v3927_v0 }
  0x24   :  { %3262 = vmatprep.mubr.msk.f32.mxu1 %vm3928_vm0, %v3929_v1 }
  0x25   :  { %3552 = vmatpush3.bf16.msra.mxu1 %v4026_v15 }
  0x26   :  { %3546 = vmatpush3.bf16.msra.mxu0 %v4026_v15  ;;  %3559 = vmatprep.subr.bf16.mxu1 %v3927_v0 }
  0x27   :  { %3553 = vmatprep.subr.bf16.mxu0 %v3927_v0 }
  0x8c   :  { %v4050_v18 = vpop.permute.xlu0 %228 }
  0xf3   :  { %v212_v21 = vpop.f32.mrb[0].mxu1 }
  0xf4   :  { %v136_v20 = vpop.f32.mrb[0].mxu0  ;;  %v231_v23 = vadd.f32 %v4050_v18, %v212_v21  ;;  %v3242_v24 = vpop.f32.mrb[1].mxu1 }
  0xf5   :  { %v137_v22 = vadd.f32 %v3010_v19, %v136_v20  ;;  %v3231_v25 = vpop.f32.mrb[1].mxu0 }
  0xf6   :  { %233 = vrot.lane.b32.xlu0 %v231_v23, %s3930_s13 }
  0xf7   :  { %140 = vst [vmem:[#allocation3] sm:$0xff] %v137_v22 }
  0xfa   :  { %249 = vrot.lane.b32.xlu0 %v141_v16, %s3931_s17 }
  0xfe   :  { %v142_v26 = vld [vmem:[#allocation3] sm:$0x1]  ;;  %v260_v47 = vld [vmem:[#allocation3 + $0x1] sm:$0x1]  ;;  %v365_v5 = vld [vmem:[#allocation3 + $0x2] sm:$0x1] }
  0xff   :  { %v216_v27 = vadd.f32 %v212_v21, %v142_v26 }
 0x101   :  { %v3013_v28 = vmul.f32 -1.442695, %v216_v27 }
 0x103   :  { %3708 = vpow2.f32 %v3013_v28  ;;  %v470_v28 = vld [vmem:[#allocation3 + $0x3] sm:$0x1] }
 0x10d   :  { %v3709_v29 = vpop.eup %3708 }
 0x10e   :  { %v220_v30 = vadd.f32 1.0, %v3709_v29 }
 0x110   :  { %3710 = vrcp.f32 %v220_v30 }
 0x11a   :  { %v3711_v31 = vpop.eup %3710 }
 0x11b   :  { %v243_v38 = vsub.f32 1.0, %v3711_v31 }
 0x168   :  { %v234_v32 = vpop.permute.xlu0 %233 }
 0x169   :  { %v236_v33 = vmul.f32 %v3711_v31, %v234_v32 }
 0x16b   :  { %238 = vrot.lane.b32.xlu1 %v236_v33, %s3930_s13 }
 0x16c   :  { %v250_v37 = vpop.permute.xlu0 %249 }
 0x16d   :  { %v252_v40 = vmul.f32 %v3711_v31, %v250_v37 }
 0x1dd   :  { %v239_v34 = vpop.permute.xlu1 %238 }
 0x1de   :  { %v241_v35 = vadd.f32 %v239_v34, %v142_v26 }
 0x1e0   :  { %3712 = vtanh.f32 %v241_v35 }
 0x1ea   :  { %v3713_v36 = vpop.eup %3712 }
 0x1eb   :  { %245 = vrot.lane.b32.xlu1 %v3713_v36, %s3932_s18 }
 0x25d   :  { %v246_v39 = vpop.permute.xlu1 %245 }
 0x25e   :  { %v248_v41 = vmul.f32 %v246_v39, %v243_v38 }
 0x260   :  { %v253_v42 = vadd.f32 %v252_v40, %v248_v41 }
 0x262   :  { %255 = vrot.lane.b32.xlu1 %v253_v42, %s3932_s18 }
 0x2d4   :  { %v256_v43 = vpop.permute.xlu1 %255 }
 0x2d5   :  { %259 = vst.msk [vmem:[#allocation2] sm:$0x1] %vm258_vm2, %v256_v43  ;;  %3252 = vmatmul.mubr.msk.f32.vlgmr.msra.gmra.mrb[2].mxu0 %vm48_vm1, %v256_v43 }
 0x2d6   :  { %3555 = vmatpush3.bf16.msra.mxu0 %v4015_v9  ;;  %3273 = vmatprep.mubr.msk.f32.mxu0 %vm3928_vm0, %v3929_v1 }
 0x2d7   :  { %3556 = vmatprep.subr.bf16.mxu0 %v3927_v0 }
 0x2da   :  { %3558 = vmatpush3.bf16.msra.mxu0 %v4026_v15 }
 0x2db   :  { %3565 = vmatprep.subr.bf16.mxu0 %v3927_v0 }
 0x3a8   :  { %v329_v44 = vpop.f32.mrb[2].mxu0 }
 0x3a9   :  { %v340_v45 = vadd.f32 %v329_v44, %v4050_v18  ;;  %v3253_v46 = vpop.f32.mrb[3].mxu0  ;;  %v333_v48 = vadd.f32 %v329_v44, %v260_v47 }
 0x3ab   :  { %342 = vrot.lane.b32.xlu0 %v340_v45, %s3930_s13  ;;  %v3016_v49 = vmul.f32 -1.442695, %v333_v48  ;;  %v575_v48 = vld [vmem:[#allocation3 + $0x4] sm:$0x1] }
 0x3ad   :  { %3714 = vpow2.f32 %v3016_v49 }
 0x3b7   :  { %v3715_v50 = vpop.eup %3714 }
 0x3b8   :  { %v337_v51 = vadd.f32 1.0, %v3715_v50 }
 0x3ba   :  { %3716 = vrcp.f32 %v337_v51 }
 0x3c4   :  { %v3717_v52 = vpop.eup %3716 }
 0x3c5   :  { %v352_v58 = vsub.f32 1.0, %v3717_v52  ;;  %v358_v60 = vmul.f32 %v3717_v52, %v253_v42 }
 0x41d   :  { %v343_v53 = vpop.permute.xlu0 %342 }
 0x41e   :  { %v345_v54 = vmul.f32 %v3717_v52, %v343_v53 }
 0x420   :  { %347 = vrot.lane.b32.xlu1 %v345_v54, %s3930_s13 }
 0x492   :  { %v348_v55 = vpop.permute.xlu1 %347 }
 0x493   :  { %v350_v56 = vadd.f32 %v348_v55, %v260_v47 }
 0x495   :  { %3718 = vtanh.f32 %v350_v56 }
 0x49f   :  { %v3719_v57 = vpop.eup %3718 }
 0x4a0   :  { %354 = vrot.lane.b32.xlu0 %v3719_v57, %s3932_s18 }
 0x512   :  { %v355_v59 = vpop.permute.xlu0 %354 }
 0x513   :  { %v357_v61 = vmul.f32 %v355_v59, %v352_v58 }
 0x515   :  { %v359_v62 = vadd.f32 %v358_v60, %v357_v61 }
 0x517   :  { %361 = vrot.lane.b32.xlu1 %v359_v62, %s3932_s18 }
 0x589   :  { %v362_v63 = vpop.permute.xlu1 %361 }
 0x58a   :  { %364 = vst.msk [vmem:[#allocation2 + $0x1] sm:$0x1] %vm258_vm2, %v362_v63  ;;  %3263 = vmatmul.mubr.msk.f32.vlgmr.msra.gmra.mrb[2].mxu1 %vm48_vm1, %v362_v63 }
 0x58b   :  { %3561 = vmatpush3.bf16.msra.mxu1 %v4015_v9  ;;  %3284 = vmatprep.mubr.msk.f32.mxu1 %vm3928_vm0, %v3929_v1 }
 0x58c   :  { %3562 = vmatprep.subr.bf16.mxu1 %v3927_v0 }
 0x58f   :  { %3564 = vmatpush3.bf16.msra.mxu1 %v4026_v15 }
 0x590   :  { %3571 = vmatprep.subr.bf16.mxu1 %v3927_v0 }
 0x65d   :  { %v434_v2 = vpop.f32.mrb[2].mxu1 }
 0x65e   :  { %v445_v3 = vadd.f32 %v434_v2, %v4050_v18  ;;  %v3264_v4 = vpop.f32.mrb[3].mxu1  ;;  %v438_v6 = vadd.f32 %v434_v2, %v365_v5 }
 0x660   :  { %447 = vrot.lane.b32.xlu0 %v445_v3, %s3930_s13  ;;  %v3018_v7 = vmul.f32 -1.442695, %v438_v6  ;;  %v680_v6 = vld [vmem:[#allocation3 + $0x5] sm:$0x1] }
 0x662   :  { %3720 = vpow2.f32 %v3018_v7 }
 0x66c   :  { %v3721_v8 = vpop.eup %3720 }
 0x66d   :  { %v442_v10 = vadd.f32 1.0, %v3721_v8 }
 0x66f   :  { %3722 = vrcp.f32 %v442_v10 }
 0x679   :  { %v3723_v11 = vpop.eup %3722 }
 0x67a   :  { %v457_v19 = vsub.f32 1.0, %v3723_v11  ;;  %v463_v21 = vmul.f32 %v3723_v11, %v359_v62 }
 0x6d2   :  { %v448_v12 = vpop.permute.xlu0 %447 }
 0x6d3   :  { %v450_v13 = vmul.f32 %v3723_v11, %v448_v12 }
 0x6d5   :  { %452 = vrot.lane.b32.xlu1 %v450_v13, %s3930_s13 }
 0x747   :  { %v453_v14 = vpop.permute.xlu1 %452 }
 0x748   :  { %v455_v16 = vadd.f32 %v453_v14, %v365_v5 }
 0x74a   :  { %3724 = vtanh.f32 %v455_v16 }
 0x754   :  { %v3725_v17 = vpop.eup %3724 }
 0x755   :  { %459 = vrot.lane.b32.xlu0 %v3725_v17, %s3932_s18 }
 0x7c7   :  { %v460_v20 = vpop.permute.xlu0 %459 }
 0x7c8   :  { %v462_v22 = vmul.f32 %v460_v20, %v457_v19 }
 0x7ca   :  { %v464_v23 = vadd.f32 %v463_v21, %v462_v22 }
 0x7cc   :  { %466 = vrot.lane.b32.xlu1 %v464_v23, %s3932_s18 }
 0x83e   :  { %v467_v24 = vpop.permute.xlu1 %466 }
 0x83f   :  { %469 = vst.msk [vmem:[#allocation2 + $0x2] sm:$0x1] %vm258_vm2, %v467_v24  ;;  %3274 = vmatmul.mubr.msk.f32.vlgmr.msra.gmra.mrb[4].mxu0 %vm48_vm1, %v467_v24 }
 0x840   :  { %3567 = vmatpush3.bf16.msra.mxu0 %v4015_v9  ;;  %3295 = vmatprep.mubr.msk.f32.mxu0 %vm3928_vm0, %v3929_v1 }
 0x841   :  { %3568 = vmatprep.subr.bf16.mxu0 %v3927_v0 }
 0x844   :  { %3570 = vmatpush3.bf16.msra.mxu0 %v4026_v15 }
 0x845   :  { %3577 = vmatprep.subr.bf16.mxu0 %v3927_v0 }
 0x912   :  { %v539_v25 = vpop.f32.mrb[4].mxu0 }
 0x913   :  { %v550_v26 = vadd.f32 %v539_v25, %v4050_v18  ;;  %v3275_v27 = vpop.f32.mrb[5].mxu0  ;;  %v543_v29 = vadd.f32 %v539_v25, %v470_v28 }
 0x914   :  { %v785_v27 = vld [vmem:[#allocation3 + $0x6] sm:$0x1] }
 0x915   :  { %552 = vrot.lane.b32.xlu0 %v550_v26, %s3930_s13  ;;  %v3020_v30 = vmul.f32 -1.442695, %v543_v29 }
 0x917   :  { %3726 = vpow2.f32 %v3020_v30 }
 0x921   :  { %v3727_v31 = vpop.eup %3726 }
 0x922   :  { %v547_v32 = vadd.f32 1.0, %v3727_v31 }
 0x924   :  { %3728 = vrcp.f32 %v547_v32 }
 0x92e   :  { %v3729_v33 = vpop.eup %3728 }
 0x92f   :  { %v562_v39 = vsub.f32 1.0, %v3729_v33  ;;  %v568_v41 = vmul.f32 %v3729_v33, %v464_v23 }
 0x987   :  { %v553_v34 = vpop.permute.xlu0 %552 }
 0x988   :  { %v555_v35 = vmul.f32 %v3729_v33, %v553_v34 }
 0x98a   :  { %557 = vrot.lane.b32.xlu1 %v555_v35, %s3930_s13 }
 0x9fc   :  { %v558_v36 = vpop.permute.xlu1 %557 }
 0x9fd   :  { %v560_v37 = vadd.f32 %v558_v36, %v470_v28 }
 0x9ff   :  { %3730 = vtanh.f32 %v560_v37 }
 0xa09   :  { %v3731_v38 = vpop.eup %3730 }
 0xa0a   :  { %564 = vrot.lane.b32.xlu0 %v3731_v38, %s3932_s18 }
 0xa7c   :  { %v565_v40 = vpop.permute.xlu0 %564 }
 0xa7d   :  { %v567_v42 = vmul.f32 %v565_v40, %v562_v39 }
 0xa7f   :  { %v569_v43 = vadd.f32 %v568_v41, %v567_v42 }
 0xa81   :  { %571 = vrot.lane.b32.xlu1 %v569_v43, %s3932_s18 }
 0xaf3   :  { %v572_v44 = vpop.permute.xlu1 %571 }
 0xaf4   :  { %574 = vst.msk [vmem:[#allocation2 + $0x3] sm:$0x1] %vm258_vm2, %v572_v44  ;;  %3285 = vmatmul.mubr.msk.f32.vlgmr.msra.gmra.mrb[4].mxu1 %vm48_vm1, %v572_v44 }
 0xaf5   :  { %3573 = vmatpush3.bf16.msra.mxu1 %v4015_v9  ;;  %3306 = vmatprep.mubr.msk.f32.mxu1 %vm3928_vm0, %v3929_v1 }
 0xaf6   :  { %3574 = vmatprep.subr.bf16.mxu1 %v3927_v0 }
 0xaf9   :  { %3576 = vmatpush3.bf16.msra.mxu1 %v4026_v15 }
 0xafa   :  { %3583 = vmatprep.subr.bf16.mxu1 %v3927_v0 }
 0xbc7   :  { %v644_v45 = vpop.f32.mrb[4].mxu1 }
 0xbc8   :  { %v655_v46 = vadd.f32 %v644_v45, %v4050_v18  ;;  %v3286_v47 = vpop.f32.mrb[5].mxu1  ;;  %v648_v49 = vadd.f32 %v644_v45, %v575_v48 }
 0xbc9   :  { %v890_v47 = vld [vmem:[#allocation3 + $0x7] sm:$0x1] }
 0xbca   :  { %657 = vrot.lane.b32.xlu0 %v655_v46, %s3930_s13  ;;  %v3022_v50 = vmul.f32 -1.442695, %v648_v49 }
 0xbcc   :  { %3732 = vpow2.f32 %v3022_v50 }
 0xbd6   :  { %v3733_v51 = vpop.eup %3732 }
 0xbd7   :  { %v652_v52 = vadd.f32 1.0, %v3733_v51 }
 0xbd9   :  { %3734 = vrcp.f32 %v652_v52 }
 0xbe3   :  { %v3735_v53 = vpop.eup %3734 }
 0xbe4   :  { %v667_v59 = vsub.f32 1.0, %v3735_v53  ;;  %v673_v61 = vmul.f32 %v3735_v53, %v569_v43 }
 0xc3c   :  { %v658_v54 = vpop.permute.xlu0 %657 }
 0xc3d   :  { %v660_v55 = vmul.f32 %v3735_v53, %v658_v54 }
 0xc3f   :  { %662 = vrot.lane.b32.xlu1 %v660_v55, %s3930_s13 }
 0xcb1   :  { %v663_v56 = vpop.permute.xlu1 %662 }
 0xcb2   :  { %v665_v57 = vadd.f32 %v663_v56, %v575_v48 }
 0xcb4   :  { %3736 = vtanh.f32 %v665_v57  ;;  %v997_v57 = vld [vmem:[#allocation4 + $0x20] sm:$0xff] }
 0xcbe   :  { %v3737_v58 = vpop.eup %3736 }
 0xcbf   :  { %669 = vrot.lane.b32.xlu0 %v3737_v58, %s3932_s18  ;;  %v999_v58 = vld [vmem:[#allocation4 + $0x30] sm:$0xff] }
 0xd31   :  { %v670_v60 = vpop.permute.xlu0 %669 }
 0xd32   :  { %v672_v62 = vmul.f32 %v670_v60, %v667_v59  ;;  %v1000_v60 = vld [vmem:[#allocation4 + $0x38] sm:$0xff] }
 0xd34   :  { %v674_v63 = vadd.f32 %v673_v61, %v672_v62  ;;  %v4145_v61 = vpack.c.bf16 %v1000_v60, %v999_v58  ;;  %v1091_v62 = vld [vmem:[%s4463_s1 + $0x1] sm:$0x1] }
 0xd36   :  { %676 = vrot.lane.b32.xlu1 %v674_v63, %s3932_s18 }
 0xda8   :  { %v677_v2 = vpop.permute.xlu1 %676 }
 0xda9   :  { %679 = vst.msk [vmem:[#allocation2 + $0x4] sm:$0x1] %vm258_vm2, %v677_v2  ;;  %3296 = vmatmul.mubr.msk.f32.vlgmr.msra.gmra.mrb[6].mxu0 %vm48_vm1, %v677_v2  ;;  %v3030_v2 = vld [vmem:[%s4464_s2 + $0x20] sm:$0xff] }
 0xdaa   :  { %3579 = vmatpush3.bf16.msra.mxu0 %v4015_v9  ;;  %3317 = vmatprep.mubr.msk.f32.mxu0 %vm3928_vm0, %v3929_v1 }
 0xdab   :  { %3580 = vmatprep.subr.bf16.mxu0 %v3927_v0 }
 0xdae   :  { %3582 = vmatpush3.bf16.msra.mxu0 %v4026_v15 }
 0xdaf   :  { %3589 = vmatprep.subr.bf16.mxu0 %v3927_v0 }
 0xe7c   :  { %v749_v3 = vpop.f32.mrb[6].mxu0 }
 0xe7d   :  { %v760_v4 = vadd.f32 %v749_v3, %v4050_v18  ;;  %v3297_v5 = vpop.f32.mrb[7].mxu0  ;;  %v753_v7 = vadd.f32 %v749_v3, %v680_v6  ;;  %v3031_v3 = vld [vmem:[%s4464_s2 + $0x28] sm:$0xff] }
 0xe7e   :  { %v3032_v5 = vld [vmem:[%s4464_s2 + $0x30] sm:$0xff] }
 0xe7f   :  { %762 = vrot.lane.b32.xlu0 %v760_v4, %s3930_s13  ;;  %v3024_v8 = vmul.f32 -1.442695, %v753_v7  ;;  %v3584_v4 = vpack.c.bf16 %v3031_v3, %v3030_v2 }
 0xe81   :  { %3738 = vpow2.f32 %v3024_v8 }
 0xe8b   :  { %v3739_v9 = vpop.eup %3738 }
 0xe8c   :  { %v757_v10 = vadd.f32 1.0, %v3739_v9 }
 0xe8e   :  { %3740 = vrcp.f32 %v757_v10  ;;  %v3039_v10 = vld [vmem:[%s4467_s5 + $0x1] ss:$0 sm:$0xff] }
 0xe98   :  { %v3741_v11 = vpop.eup %3740 }
 0xe99   :  { %v772_v17 = vsub.f32 1.0, %v3741_v11  ;;  %v778_v20 = vmul.f32 %v3741_v11, %v674_v63 }
 0xef1   :  { %v763_v12 = vpop.permute.xlu0 %762 }
 0xef2   :  { %v765_v13 = vmul.f32 %v3741_v11, %v763_v12 }
 0xef4   :  { %767 = vrot.lane.b32.xlu1 %v765_v13, %s3930_s13 }
 0xf66   :  { %v768_v15 = vpop.permute.xlu1 %767 }
 0xf67   :  { %v770_v14 = vadd.f32 %v768_v15, %v680_v6  ;;  %v3033_v6 = vld [vmem:[%s4464_s2 + $0x38] sm:$0xff] }
 0xf68   :  { %v3587_v7 = vpack.c.bf16 %v3033_v6, %v3032_v5 }
 0xf69   :  { %3742 = vtanh.f32 %v770_v14 }
 0xf73   :  { %v3743_v16 = vpop.eup %3742 }
 0xf74   :  { %774 = vrot.lane.b32.xlu0 %v3743_v16, %s3932_s18 }
 0xfe6   :  { %v775_v19 = vpop.permute.xlu0 %774 }
 0xfe7   :  { %v777_v21 = vmul.f32 %v775_v19, %v772_v17 }
 0xfe9   :  { %v779_v22 = vadd.f32 %v778_v20, %v777_v21  ;;  %v3035_v21 = vld [vmem:[%s4466_s4 + $0x1] ss:$0 sm:$0xff] }
 0xfeb   :  { %781 = vrot.lane.b32.xlu1 %v779_v22, %s3932_s18 }
0x105d   :  { %v782_v23 = vpop.permute.xlu1 %781 }
0x105e   :  { %784 = vst.msk [vmem:[#allocation2 + $0x5] sm:$0x1] %vm258_vm2, %v782_v23  ;;  %3307 = vmatmul.mubr.msk.f32.vlgmr.msra.gmra.mrb[6].mxu1 %vm48_vm1, %v782_v23 }
0x105f   :  { %3328 = vmatprep.mubr.msk.f32.mxu1 %vm3928_vm0, %v3929_v1  ;;  %3585 = vmatpush3.bf16.msra.mxu1 %v3584_v4 }
0x1060   :  { %3586 = vmatprep.subr.bf16.mxu1 %v3927_v0 }
0x1063   :  { %3588 = vmatpush3.bf16.msra.mxu1 %v3587_v7 }
0x1064   :  { %3595 = vmatprep.subr.bf16.mxu1 %v3927_v0 }
0x1131   :  { %v854_v24 = vpop.f32.mrb[6].mxu1 }
0x1132   :  { %v865_v25 = vadd.f32 %v854_v24, %v4050_v18  ;;  %v3308_v26 = vpop.f32.mrb[7].mxu1  ;;  %v858_v28 = vadd.f32 %v854_v24, %v785_v27 }
0x1134   :  { %867 = vrot.lane.b32.xlu0 %v865_v25, %s3930_s13  ;;  %v3026_v29 = vmul.f32 -1.442695, %v858_v28 }
0x1136   :  { %3744 = vpow2.f32 %v3026_v29 }
0x1140   :  { %v3745_v30 = vpop.eup %3744 }
0x1141   :  { %v862_v31 = vadd.f32 1.0, %v3745_v30 }
0x1143   :  { %3746 = vrcp.f32 %v862_v31 }
0x114d   :  { %v3747_v32 = vpop.eup %3746 }
0x114e   :  { %v877_v38 = vsub.f32 1.0, %v3747_v32  ;;  %v883_v40 = vmul.f32 %v3747_v32, %v779_v22 }
0x11a6   :  { %v868_v33 = vpop.permute.xlu0 %867 }
0x11a7   :  { %v870_v34 = vmul.f32 %v3747_v32, %v868_v33 }
0x11a9   :  { %872 = vrot.lane.b32.xlu1 %v870_v34, %s3930_s13 }
0x121b   :  { %v873_v35 = vpop.permute.xlu1 %872 }
0x121c   :  { %v875_v36 = vadd.f32 %v873_v35, %v785_v27 }
0x121e   :  { %3748 = vtanh.f32 %v875_v36 }
0x1228   :  { %v3749_v37 = vpop.eup %3748 }
0x1229   :  { %879 = vrot.lane.b32.xlu0 %v3749_v37, %s3932_s18 }
0x129b   :  { %v880_v39 = vpop.permute.xlu0 %879 }
0x129c   :  { %v882_v41 = vmul.f32 %v880_v39, %v877_v38 }
0x129e   :  { %v884_v42 = vadd.f32 %v883_v40, %v882_v41 }
0x12a0   :  { %886 = vrot.lane.b32.xlu1 %v884_v42, %s3932_s18 }
0x1312   :  { %v887_v43 = vpop.permute.xlu1 %886 }
0x1313   :  { %889 = vst.msk [vmem:[#allocation2 + $0x6] sm:$0x1] %vm258_vm2, %v887_v43  ;;  %3318 = vmatmul.mubr.msk.f32.vlgmr.msra.gmra.mrb[8].mxu0 %vm48_vm1, %v887_v43 }
0x1314   :  { %3339 = vmatprep.mubr.msk.f32.mxu0 %vm3928_vm0, %v3929_v1 }
0x13e6   :  { %v959_v44 = vpop.f32.mrb[8].mxu0 }
0x13e7   :  { %v970_v45 = vadd.f32 %v959_v44, %v4050_v18  ;;  %v3319_v46 = vpop.f32.mrb[9].mxu0  ;;  %v963_v48 = vadd.f32 %v959_v44, %v890_v47  ;;  %v998_v18 = vld [vmem:[#allocation4 + $0x28] sm:$0xff] }
0x13e8   :  { %v4142_v59 = vpack.c.bf16 %v998_v18, %v997_v57 }
0x13e9   :  { %972 = vrot.lane.b32.xlu0 %v970_v45, %s3930_s13  ;;  %v3028_v49 = vmul.f32 -1.442695, %v963_v48 }
0x13ea   :  { %3591 = vmatpush3.bf16.msra.mxu0 %v4142_v59 }
0x13eb   :  { %3750 = vpow2.f32 %v3028_v49  ;;  %3592 = vmatprep.subr.bf16.mxu0 %v3927_v0 }
0x13ee   :  { %3594 = vmatpush3.bf16.msra.mxu0 %v4145_v61 }
0x13ef   :  { %3601 = vmatprep.subr.bf16.mxu0 %v3927_v0 }
0x13f1   :  { %3340 = vmatmul.mubr.msk.f32.vlgmr.msra.gmra.mrb[10].mxu0 %vm48_vm1, %v1091_v62 }
0x13f2   :  { %3603 = vmatpush3.bf16.msra.mxu0 %v4142_v59  ;;  %3361 = vmatprep.mubr.msk.f32.mxu0 %vm3928_vm0, %v3929_v1 }
0x13f3   :  { %3604 = vmatprep.subr.bf16.mxu0 %v3927_v0 }
0x13f5   :  { %v3751_v50 = vpop.eup %3750 }
0x13f6   :  { %v967_v51 = vadd.f32 1.0, %v3751_v50  ;;  %3606 = vmatpush3.bf16.msra.mxu0 %v4145_v61 }
0x13f7   :  { %3613 = vmatprep.subr.bf16.mxu0 %v3927_v0 }
0x13f8   :  { %3752 = vrcp.f32 %v967_v51 }
0x1402   :  { %v3753_v52 = vpop.eup %3752 }
0x1403   :  { %v982_v8 = vsub.f32 1.0, %v3753_v52  ;;  %v988_v11 = vmul.f32 %v3753_v52, %v884_v42 }
0x145b   :  { %v973_v53 = vpop.permute.xlu0 %972 }
0x145c   :  { %v975_v54 = vmul.f32 %v3753_v52, %v973_v53 }
0x145e   :  { %977 = vrot.lane.b32.xlu1 %v975_v54, %s3930_s13 }
0x14c4   :  { %v1162_v15 = vpop.f32.mrb[10].mxu0 }
0x14c5   :  { %v3341_v14 = vpop.f32.mrb[11].mxu0 }
0x14d0   :  { %v978_v55 = vpop.permute.xlu1 %977 }
0x14d1   :  { %v980_v56 = vadd.f32 %v978_v55, %v890_v47 }
0x14d3   :  { %3754 = vtanh.f32 %v980_v56 }
0x14dd   :  { %v3755_v63 = vpop.eup %3754 }
0x14de   :  { %984 = vrot.lane.b32.xlu0 %v3755_v63, %s3932_s18 }
0x14e2   :  { %1178 = vrot.lane.b32.xlu0 %v3039_v10, %s3930_s13 }
0x1550   :  { %v985_v9 = vpop.permute.xlu0 %984 }
0x1551   :  { %v987_v12 = vmul.f32 %v985_v9, %v982_v8 }
0x1553   :  { %v989_v13 = vadd.f32 %v988_v11, %v987_v12 }
0x1554   :  { %v4180_v16 = vpop.permute.xlu0 %1178 }
0x1555   :  { %991 = vrot.lane.b32.xlu1 %v989_v13, %s3932_s18  ;;  %v1181_v17 = vadd.f32 %v4180_v16, %v1162_v15 }
0x1559   :  { %1183 = vrot.lane.b32.xlu1 %v1181_v17, %s3930_s13 }
0x15c7   :  { %v992_v19 = vpop.permute.xlu1 %991 }
0x15c8   :  { %994 = vst.msk [vmem:[#allocation2 + $0x7] sm:$0x1] %vm258_vm2, %v992_v19  ;;  %995 = vst.msk [vmem:[#allocation8] sm:$0x1] %vm258_vm2, %v992_v19 }
0x15cb   :  { %v1184_v30 = vpop.permute.xlu1 %1183 }
0x15cf   :  { %v1003_v20 = vld [vmem:[#allocation2] sm:$0xff] }
0x15d0   :  { %3329 = vmatmul.mubr.msk.f32.vlgmr.msra.gmra.mrb[8].mxu1 %vm48_vm1, %v1003_v20 }
0x15d1   :  { %3597 = vmatpush3.bf16.msra.mxu1 %v4142_v59  ;;  %3350 = vmatprep.mubr.msk.f32.mxu1 %vm3928_vm0, %v3929_v1 }
0x15d2   :  { %3598 = vmatprep.subr.bf16.mxu1 %v3927_v0 }
0x15d5   :  { %3600 = vmatpush3.bf16.msra.mxu1 %v4145_v61 }
0x15d6   :  { %3607 = vmatprep.subr.bf16.mxu1 %v3927_v0 }
0x16a3   :  { %v1086_v22 = vpop.f32.mrb[8].mxu1 }
0x16a4   :  { %v1087_v23 = vadd.f32 %v3035_v21, %v1086_v22  ;;  %v3330_v24 = vpop.f32.mrb[9].mxu1 }
0x16a6   :  { %1090 = vst [vmem:[#allocation3] sm:$0xff] %v1087_v23 }
0x16ad   :  { %v1092_v25 = vld [vmem:[#allocation3] sm:$0x1]  ;;  %v1209_v46 = vld [vmem:[#allocation3 + $0x1] sm:$0x1]  ;;  %v1314_v5 = vld [vmem:[#allocation3 + $0x2] sm:$0x1] }
0x16ae   :  { %v1166_v26 = vadd.f32 %v1162_v15, %v1092_v25 }
0x16b0   :  { %v3038_v27 = vmul.f32 -1.442695, %v1166_v26 }
0x16b2   :  { %3756 = vpow2.f32 %v3038_v27  ;;  %v1419_v27 = vld [vmem:[#allocation3 + $0x3] sm:$0x1] }
0x16bc   :  { %v3757_v28 = vpop.eup %3756 }
0x16bd   :  { %v1170_v29 = vadd.f32 1.0, %v3757_v28 }
0x16bf   :  { %3758 = vrcp.f32 %v1170_v29 }
0x16c9   :  { %v3759_v31 = vpop.eup %3758 }
0x16ca   :  { %v1186_v32 = vmul.f32 %v3759_v31, %v1184_v30  ;;  %v1193_v37 = vsub.f32 1.0, %v3759_v31 }
0x16cc   :  { %1188 = vrot.lane.b32.xlu0 %v1186_v32, %s3930_s13 }
0x16d0   :  { %1199 = vrot.lane.b32.xlu0 %v1091_v62, %s3931_s17 }
0x173e   :  { %v1189_v33 = vpop.permute.xlu0 %1188 }
0x173f   :  { %v1191_v34 = vadd.f32 %v1189_v33, %v1092_v25 }
0x1741   :  { %3760 = vtanh.f32 %v1191_v34 }
0x1742   :  { %v1200_v36 = vpop.permute.xlu0 %1199 }
0x1743   :  { %v1202_v39 = vmul.f32 %v3759_v31, %v1200_v36 }
0x174b   :  { %v3761_v35 = vpop.eup %3760 }
0x174c   :  { %1195 = vrot.lane.b32.xlu1 %v3761_v35, %s3932_s18 }
0x17be   :  { %v1196_v38 = vpop.permute.xlu1 %1195 }
0x17bf   :  { %v1198_v40 = vmul.f32 %v1196_v38, %v1193_v37 }
0x17c1   :  { %v1203_v41 = vadd.f32 %v1202_v39, %v1198_v40 }
0x17c3   :  { %1205 = vrot.lane.b32.xlu1 %v1203_v41, %s3932_s18 }
0x1835   :  { %v1206_v42 = vpop.permute.xlu1 %1205 }
0x1836   :  { %1208 = vst.msk [vmem:[#allocation2] sm:$0x1] %vm258_vm2, %v1206_v42  ;;  %3351 = vmatmul.mubr.msk.f32.vlgmr.msra.gmra.mrb[10].mxu1 %vm48_vm1, %v1206_v42 }
0x1837   :  { %3609 = vmatpush3.bf16.msra.mxu1 %v4142_v59  ;;  %3372 = vmatprep.mubr.msk.f32.mxu1 %vm3928_vm0, %v3929_v1 }
0x1838   :  { %3610 = vmatprep.subr.bf16.mxu1 %v3927_v0 }
0x183b   :  { %3612 = vmatpush3.bf16.msra.mxu1 %v4145_v61 }
0x183c   :  { %3619 = vmatprep.subr.bf16.mxu1 %v3927_v0 }
0x1909   :  { %v1278_v43 = vpop.f32.mrb[10].mxu1 }
0x190a   :  { %v1289_v44 = vadd.f32 %v1278_v43, %v4180_v16  ;;  %v3352_v45 = vpop.f32.mrb[11].mxu1  ;;  %v1282_v47 = vadd.f32 %v1278_v43, %v1209_v46 }
0x190c   :  { %1291 = vrot.lane.b32.xlu0 %v1289_v44, %s3930_s13  ;;  %v3041_v48 = vmul.f32 -1.442695, %v1282_v47  ;;  %v1524_v47 = vld [vmem:[#allocation3 + $0x4] sm:$0x1] }
0x190e   :  { %3762 = vpow2.f32 %v3041_v48 }
0x1918   :  { %v3763_v49 = vpop.eup %3762 }
0x1919   :  { %v1286_v50 = vadd.f32 1.0, %v3763_v49 }
0x191b   :  { %3764 = vrcp.f32 %v1286_v50 }
0x1925   :  { %v3765_v51 = vpop.eup %3764 }
0x1926   :  { %v1301_v57 = vsub.f32 1.0, %v3765_v51  ;;  %v1307_v58 = vmul.f32 %v3765_v51, %v1203_v41 }
0x197e   :  { %v1292_v52 = vpop.permute.xlu0 %1291 }
0x197f   :  { %v1294_v53 = vmul.f32 %v3765_v51, %v1292_v52 }
0x1981   :  { %1296 = vrot.lane.b32.xlu1 %v1294_v53, %s3930_s13 }
0x19f3   :  { %v1297_v54 = vpop.permute.xlu1 %1296 }
0x19f4   :  { %v1299_v55 = vadd.f32 %v1297_v54, %v1209_v46 }
0x19f6   :  { %3766 = vtanh.f32 %v1299_v55 }
0x1a00   :  { %v3767_v56 = vpop.eup %3766 }
0x1a01   :  { %1303 = vrot.lane.b32.xlu0 %v3767_v56, %s3932_s18 }
0x1a73   :  { %v1304_v18 = vpop.permute.xlu0 %1303 }
0x1a74   :  { %v1306_v60 = vmul.f32 %v1304_v18, %v1301_v57 }
0x1a76   :  { %v1308_v62 = vadd.f32 %v1307_v58, %v1306_v60 }
0x1a78   :  { %1310 = vrot.lane.b32.xlu1 %v1308_v62, %s3932_s18 }
0x1aea   :  { %v1311_v63 = vpop.permute.xlu1 %1310 }
0x1aeb   :  { %1313 = vst.msk [vmem:[#allocation2 + $0x1] sm:$0x1] %vm258_vm2, %v1311_v63  ;;  %3362 = vmatmul.mubr.msk.f32.vlgmr.msra.gmra.mrb[12].mxu0 %vm48_vm1, %v1311_v63 }
0x1aec   :  { %3615 = vmatpush3.bf16.msra.mxu0 %v4142_v59  ;;  %3383 = vmatprep.mubr.msk.f32.mxu0 %vm3928_vm0, %v3929_v1 }
0x1aed   :  { %3616 = vmatprep.subr.bf16.mxu0 %v3927_v0 }
0x1af0   :  { %3618 = vmatpush3.bf16.msra.mxu0 %v4145_v61 }
0x1af1   :  { %3625 = vmatprep.subr.bf16.mxu0 %v3927_v0 }
0x1bbe   :  { %v1383_v2 = vpop.f32.mrb[12].mxu0 }
0x1bbf   :  { %v1394_v3 = vadd.f32 %v1383_v2, %v4180_v16  ;;  %v3363_v4 = vpop.f32.mrb[13].mxu0  ;;  %v1387_v6 = vadd.f32 %v1383_v2, %v1314_v5 }
0x1bc1   :  { %1396 = vrot.lane.b32.xlu0 %v1394_v3, %s3930_s13  ;;  %v3043_v7 = vmul.f32 -1.442695, %v1387_v6  ;;  %v1629_v6 = vld [vmem:[#allocation3 + $0x5] sm:$0x1] }
0x1bc3   :  { %3768 = vpow2.f32 %v3043_v7 }
0x1bcd   :  { %v3769_v8 = vpop.eup %3768 }
0x1bce   :  { %v1391_v9 = vadd.f32 1.0, %v3769_v8 }
0x1bd0   :  { %3770 = vrcp.f32 %v1391_v9 }
0x1bda   :  { %v3771_v10 = vpop.eup %3770 }
0x1bdb   :  { %v1406_v17 = vsub.f32 1.0, %v3771_v10  ;;  %v1412_v20 = vmul.f32 %v3771_v10, %v1308_v62 }
0x1c33   :  { %v1397_v11 = vpop.permute.xlu0 %1396 }
0x1c34   :  { %v1399_v12 = vmul.f32 %v3771_v10, %v1397_v11 }
0x1c36   :  { %1401 = vrot.lane.b32.xlu1 %v1399_v12, %s3930_s13 }
0x1ca8   :  { %v1402_v13 = vpop.permute.xlu1 %1401 }
0x1ca9   :  { %v1404_v15 = vadd.f32 %v1402_v13, %v1314_v5 }
0x1cab   :  { %3772 = vtanh.f32 %v1404_v15 }
0x1cb5   :  { %v3773_v14 = vpop.eup %3772 }
0x1cb6   :  { %1408 = vrot.lane.b32.xlu0 %v3773_v14, %s3932_s18 }
0x1d28   :  { %v1409_v19 = vpop.permute.xlu0 %1408 }
0x1d29   :  { %v1411_v21 = vmul.f32 %v1409_v19, %v1406_v17 }
0x1d2b   :  { %v1413_v22 = vadd.f32 %v1412_v20, %v1411_v21 }
0x1d2d   :  { %1415 = vrot.lane.b32.xlu1 %v1413_v22, %s3932_s18 }
0x1d9f   :  { %v1416_v23 = vpop.permute.xlu1 %1415 }
0x1da0   :  { %1418 = vst.msk [vmem:[#allocation2 + $0x2] sm:$0x1] %vm258_vm2, %v1416_v23  ;;  %3373 = vmatmul.mubr.msk.f32.vlgmr.msra.gmra.mrb[12].mxu1 %vm48_vm1, %v1416_v23 }
0x1da1   :  { %3621 = vmatpush3.bf16.msra.mxu1 %v4142_v59  ;;  %3394 = vmatprep.mubr.msk.f32.mxu1 %vm3928_vm0, %v3929_v1 }
0x1da2   :  { %3622 = vmatprep.subr.bf16.mxu1 %v3927_v0 }
0x1da5   :  { %3624 = vmatpush3.bf16.msra.mxu1 %v4145_v61 }
0x1da6   :  { %3631 = vmatprep.subr.bf16.mxu1 %v3927_v0 }
0x1e73   :  { %v1488_v24 = vpop.f32.mrb[12].mxu1 }
0x1e74   :  { %v1499_v25 = vadd.f32 %v1488_v24, %v4180_v16  ;;  %v3374_v26 = vpop.f32.mrb[13].mxu1  ;;  %v1492_v28 = vadd.f32 %v1488_v24, %v1419_v27 }
0x1e75   :  { %v1734_v26 = vld [vmem:[#allocation3 + $0x6] sm:$0x1] }
0x1e76   :  { %1501 = vrot.lane.b32.xlu0 %v1499_v25, %s3930_s13  ;;  %v3045_v29 = vmul.f32 -1.442695, %v1492_v28 }
0x1e78   :  { %3774 = vpow2.f32 %v3045_v29 }
0x1e82   :  { %v3775_v30 = vpop.eup %3774 }
0x1e83   :  { %v1496_v31 = vadd.f32 1.0, %v3775_v30 }
0x1e85   :  { %3776 = vrcp.f32 %v1496_v31 }
0x1e8f   :  { %v3777_v32 = vpop.eup %3776 }
0x1e90   :  { %v1511_v38 = vsub.f32 1.0, %v3777_v32  ;;  %v1517_v40 = vmul.f32 %v3777_v32, %v1413_v22 }
0x1ee8   :  { %v1502_v33 = vpop.permute.xlu0 %1501 }
0x1ee9   :  { %v1504_v34 = vmul.f32 %v3777_v32, %v1502_v33 }
0x1eeb   :  { %1506 = vrot.lane.b32.xlu1 %v1504_v34, %s3930_s13 }
0x1f5d   :  { %v1507_v35 = vpop.permute.xlu1 %1506 }
0x1f5e   :  { %v1509_v36 = vadd.f32 %v1507_v35, %v1419_v27 }
0x1f60   :  { %3778 = vtanh.f32 %v1509_v36 }
0x1f6a   :  { %v3779_v37 = vpop.eup %3778 }
0x1f6b   :  { %1513 = vrot.lane.b32.xlu0 %v3779_v37, %s3932_s18 }
0x1fdd   :  { %v1514_v39 = vpop.permute.xlu0 %1513 }
0x1fde   :  { %v1516_v41 = vmul.f32 %v1514_v39, %v1511_v38 }
0x1fe0   :  { %v1518_v42 = vadd.f32 %v1517_v40, %v1516_v41 }
0x1fe2   :  { %1520 = vrot.lane.b32.xlu1 %v1518_v42, %s3932_s18 }
0x2054   :  { %v1521_v43 = vpop.permute.xlu1 %1520 }
0x2055   :  { %1523 = vst.msk [vmem:[#allocation2 + $0x3] sm:$0x1] %vm258_vm2, %v1521_v43  ;;  %3384 = vmatmul.mubr.msk.f32.vlgmr.msra.gmra.mrb[14].mxu0 %vm48_vm1, %v1521_v43 }
0x2056   :  { %3627 = vmatpush3.bf16.msra.mxu0 %v4142_v59  ;;  %3405 = vmatprep.mubr.msk.f32.mxu0 %vm3928_vm0, %v3929_v1 }
0x2057   :  { %3628 = vmatprep.subr.bf16.mxu0 %v3927_v0 }
0x205a   :  { %3630 = vmatpush3.bf16.msra.mxu0 %v4145_v61 }
0x205b   :  { %3637 = vmatprep.subr.bf16.mxu0 %v3927_v0 }
0x2128   :  { %v1593_v44 = vpop.f32.mrb[14].mxu0 }
0x2129   :  { %v1604_v45 = vadd.f32 %v1593_v44, %v4180_v16  ;;  %v3385_v46 = vpop.f32.mrb[15].mxu0  ;;  %v1597_v48 = vadd.f32 %v1593_v44, %v1524_v47 }
0x212a   :  { %v1839_v46 = vld [vmem:[#allocation3 + $0x7] sm:$0x1] }
0x212b   :  { %1606 = vrot.lane.b32.xlu0 %v1604_v45, %s3930_s13  ;;  %v3047_v49 = vmul.f32 -1.442695, %v1597_v48 }
0x212d   :  { %3780 = vpow2.f32 %v3047_v49 }
0x2137   :  { %v3781_v50 = vpop.eup %3780 }
0x2138   :  { %v1601_v51 = vadd.f32 1.0, %v3781_v50 }
0x213a   :  { %3782 = vrcp.f32 %v1601_v51 }
0x2144   :  { %v3783_v52 = vpop.eup %3782 }
0x2145   :  { %v1616_v18 = vsub.f32 1.0, %v3783_v52  ;;  %v1622_v60 = vmul.f32 %v3783_v52, %v1518_v42 }
0x219d   :  { %v1607_v53 = vpop.permute.xlu0 %1606 }
0x219e   :  { %v1609_v54 = vmul.f32 %v3783_v52, %v1607_v53 }
0x21a0   :  { %1611 = vrot.lane.b32.xlu1 %v1609_v54, %s3930_s13 }
0x2212   :  { %v1612_v55 = vpop.permute.xlu1 %1611 }
0x2213   :  { %v1614_v56 = vadd.f32 %v1612_v55, %v1524_v47 }
0x2215   :  { %3784 = vtanh.f32 %v1614_v56  ;;  %v1946_v56 = vld [vmem:[#allocation4 + $0x40] sm:$0xff] }
0x221f   :  { %v3785_v57 = vpop.eup %3784 }
0x2220   :  { %1618 = vrot.lane.b32.xlu0 %v3785_v57, %s3932_s18  ;;  %v1948_v57 = vld [vmem:[#allocation4 + $0x50] sm:$0xff] }
0x2292   :  { %v1619_v58 = vpop.permute.xlu0 %1618 }
0x2293   :  { %v1621_v62 = vmul.f32 %v1619_v58, %v1616_v18  ;;  %v1949_v58 = vld [vmem:[#allocation4 + $0x58] sm:$0xff] }
0x2295   :  { %v1623_v63 = vadd.f32 %v1622_v60, %v1621_v62  ;;  %v4284_v60 = vpack.c.bf16 %v1949_v58, %v1948_v57  ;;  %v2040_v62 = vld [vmem:[%s4463_s1 + $0x2] sm:$0x1] }
0x2297   :  { %1625 = vrot.lane.b32.xlu1 %v1623_v63, %s3932_s18 }
0x2309   :  { %v1626_v2 = vpop.permute.xlu1 %1625 }
0x230a   :  { %1628 = vst.msk [vmem:[#allocation2 + $0x4] sm:$0x1] %vm258_vm2, %v1626_v2  ;;  %3395 = vmatmul.mubr.msk.f32.vlgmr.msra.gmra.mrb[14].mxu1 %vm48_vm1, %v1626_v2  ;;  %v3055_v2 = vld [vmem:[%s4464_s2 + $0x40] sm:$0xff] }
0x230b   :  { %3633 = vmatpush3.bf16.msra.mxu1 %v4142_v59  ;;  %3416 = vmatprep.mubr.msk.f32.mxu1 %vm3928_vm0, %v3929_v1 }
0x230c   :  { %3634 = vmatprep.subr.bf16.mxu1 %v3927_v0 }
0x230f   :  { %3636 = vmatpush3.bf16.msra.mxu1 %v4145_v61 }
0x2310   :  { %3643 = vmatprep.subr.bf16.mxu1 %v3927_v0 }
0x23dd   :  { %v1698_v3 = vpop.f32.mrb[14].mxu1 }
0x23de   :  { %v1709_v4 = vadd.f32 %v1698_v3, %v4180_v16  ;;  %v3396_v5 = vpop.f32.mrb[15].mxu1  ;;  %v1702_v7 = vadd.f32 %v1698_v3, %v1629_v6  ;;  %v3056_v3 = vld [vmem:[%s4464_s2 + $0x48] sm:$0xff] }
0x23df   :  { %v3638_v5 = vpack.c.bf16 %v3056_v3, %v3055_v2 }
0x23e0   :  { %1711 = vrot.lane.b32.xlu0 %v1709_v4, %s3930_s13  ;;  %v3049_v8 = vmul.f32 -1.442695, %v1702_v7  ;;  %v3057_v4 = vld [vmem:[%s4464_s2 + $0x50] sm:$0xff] }
0x23e2   :  { %3786 = vpow2.f32 %v3049_v8 }
0x23ec   :  { %v3787_v59 = vpop.eup %3786 }
0x23ed   :  { %v1706_v9 = vadd.f32 1.0, %v3787_v59 }
0x23ef   :  { %3788 = vrcp.f32 %v1706_v9  ;;  %v3064_v9 = vld [vmem:[%s4467_s5 + $0x2] ss:$0 sm:$0xff] }
0x23f9   :  { %v3789_v10 = vpop.eup %3788 }
0x23fa   :  { %v1721_v14 = vsub.f32 1.0, %v3789_v10  ;;  %v1727_v19 = vmul.f32 %v3789_v10, %v1623_v63 }
0x2452   :  { %v1712_v11 = vpop.permute.xlu0 %1711 }
0x2453   :  { %v1714_v12 = vmul.f32 %v3789_v10, %v1712_v11 }
0x2455   :  { %1716 = vrot.lane.b32.xlu1 %v1714_v12, %s3930_s13 }
0x24c7   :  { %v1717_v61 = vpop.permute.xlu1 %1716 }
0x24c8   :  { %v1719_v13 = vadd.f32 %v1717_v61, %v1629_v6  ;;  %v3058_v6 = vld [vmem:[%s4464_s2 + $0x58] sm:$0xff] }
0x24c9   :  { %v3641_v7 = vpack.c.bf16 %v3058_v6, %v3057_v4 }
0x24ca   :  { %3790 = vtanh.f32 %v1719_v13 }
0x24d4   :  { %v3791_v15 = vpop.eup %3790 }
0x24d5   :  { %1723 = vrot.lane.b32.xlu0 %v3791_v15, %s3932_s18 }
0x2547   :  { %v1724_v17 = vpop.permute.xlu0 %1723 }
0x2548   :  { %v1726_v20 = vmul.f32 %v1724_v17, %v1721_v14 }
0x254a   :  { %v1728_v21 = vadd.f32 %v1727_v19, %v1726_v20  ;;  %v3060_v20 = vld [vmem:[%s4466_s4 + $0x2] ss:$0 sm:$0xff] }
0x254c   :  { %1730 = vrot.lane.b32.xlu1 %v1728_v21, %s3932_s18 }
0x25be   :  { %v1731_v22 = vpop.permute.xlu1 %1730 }
0x25bf   :  { %1733 = vst.msk [vmem:[#allocation2 + $0x5] sm:$0x1] %vm258_vm2, %v1731_v22  ;;  %3406 = vmatmul.mubr.msk.f32.vlgmr.msra.gmra.mrb[16].mxu0 %vm48_vm1, %v1731_v22 }
0x25c0   :  { %3427 = vmatprep.mubr.msk.f32.mxu0 %vm3928_vm0, %v3929_v1  ;;  %3639 = vmatpush3.bf16.msra.mxu0 %v3638_v5 }
0x25c1   :  { %3640 = vmatprep.subr.bf16.mxu0 %v3927_v0 }
0x25c4   :  { %3642 = vmatpush3.bf16.msra.mxu0 %v3641_v7 }
0x25c5   :  { %3649 = vmatprep.subr.bf16.mxu0 %v3927_v0 }
0x2692   :  { %v1803_v23 = vpop.f32.mrb[16].mxu0 }
0x2693   :  { %v1814_v24 = vadd.f32 %v1803_v23, %v4180_v16  ;;  %v3407_v25 = vpop.f32.mrb[17].mxu0  ;;  %v1807_v27 = vadd.f32 %v1803_v23, %v1734_v26 }
0x2695   :  { %1816 = vrot.lane.b32.xlu0 %v1814_v24, %s3930_s13  ;;  %v3051_v28 = vmul.f32 -1.442695, %v1807_v27 }
0x2697   :  { %3792 = vpow2.f32 %v3051_v28 }
0x26a1   :  { %v3793_v29 = vpop.eup %3792 }
0x26a2   :  { %v1811_v30 = vadd.f32 1.0, %v3793_v29 }
0x26a4   :  { %3794 = vrcp.f32 %v1811_v30 }
0x26ae   :  { %v3795_v31 = vpop.eup %3794 }
0x26af   :  { %v1826_v37 = vsub.f32 1.0, %v3795_v31  ;;  %v1832_v39 = vmul.f32 %v3795_v31, %v1728_v21 }
0x2707   :  { %v1817_v32 = vpop.permute.xlu0 %1816 }
0x2708   :  { %v1819_v33 = vmul.f32 %v3795_v31, %v1817_v32 }
0x270a   :  { %1821 = vrot.lane.b32.xlu1 %v1819_v33, %s3930_s13 }
0x277c   :  { %v1822_v34 = vpop.permute.xlu1 %1821 }
0x277d   :  { %v1824_v35 = vadd.f32 %v1822_v34, %v1734_v26 }
0x277f   :  { %3796 = vtanh.f32 %v1824_v35 }
0x2789   :  { %v3797_v36 = vpop.eup %3796 }
0x278a   :  { %1828 = vrot.lane.b32.xlu0 %v3797_v36, %s3932_s18 }
0x27fc   :  { %v1829_v38 = vpop.permute.xlu0 %1828 }
0x27fd   :  { %v1831_v40 = vmul.f32 %v1829_v38, %v1826_v37 }
0x27ff   :  { %v1833_v41 = vadd.f32 %v1832_v39, %v1831_v40 }
0x2801   :  { %1835 = vrot.lane.b32.xlu1 %v1833_v41, %s3932_s18 }
0x2873   :  { %v1836_v42 = vpop.permute.xlu1 %1835 }
0x2874   :  { %1838 = vst.msk [vmem:[#allocation2 + $0x6] sm:$0x1] %vm258_vm2, %v1836_v42  ;;  %3417 = vmatmul.mubr.msk.f32.vlgmr.msra.gmra.mrb[16].mxu1 %vm48_vm1, %v1836_v42 }
0x2875   :  { %3438 = vmatprep.mubr.msk.f32.mxu1 %vm3928_vm0, %v3929_v1 }
0x2947   :  { %v1908_v43 = vpop.f32.mrb[16].mxu1 }
0x2948   :  { %v1919_v44 = vadd.f32 %v1908_v43, %v4180_v16  ;;  %v3418_v45 = vpop.f32.mrb[17].mxu1  ;;  %v1912_v47 = vadd.f32 %v1908_v43, %v1839_v46  ;;  %v1947_v16 = vld [vmem:[#allocation4 + $0x48] sm:$0xff] }
0x2949   :  { %v4281_v18 = vpack.c.bf16 %v1947_v16, %v1946_v56 }
0x294a   :  { %1921 = vrot.lane.b32.xlu0 %v1919_v44, %s3930_s13  ;;  %v3053_v48 = vmul.f32 -1.442695, %v1912_v47 }
0x294b   :  { %3645 = vmatpush3.bf16.msra.mxu1 %v4281_v18 }
0x294c   :  { %3798 = vpow2.f32 %v3053_v48  ;;  %3646 = vmatprep.subr.bf16.mxu1 %v3927_v0 }
0x294f   :  { %3648 = vmatpush3.bf16.msra.mxu1 %v4284_v60 }
0x2950   :  { %3655 = vmatprep.subr.bf16.mxu1 %v3927_v0 }
0x2952   :  { %3439 = vmatmul.mubr.msk.f32.vlgmr.msra.gmra.mrb[18].mxu1 %vm48_vm1, %v2040_v62 }
0x2953   :  { %3657 = vmatpush3.bf16.msra.mxu1 %v4281_v18  ;;  %3460 = vmatprep.mubr.msk.f32.mxu1 %vm3928_vm0, %v3929_v1 }
0x2954   :  { %3658 = vmatprep.subr.bf16.mxu1 %v3927_v0 }
0x2956   :  { %v3799_v49 = vpop.eup %3798 }
0x2957   :  { %v1916_v50 = vadd.f32 1.0, %v3799_v49  ;;  %3660 = vmatpush3.bf16.msra.mxu1 %v4284_v60 }
0x2958   :  { %3667 = vmatprep.subr.bf16.mxu1 %v3927_v0 }
0x2959   :  { %3800 = vrcp.f32 %v1916_v50 }
0x2963   :  { %v3801_v51 = vpop.eup %3800 }
0x2964   :  { %v1931_v8 = vsub.f32 1.0, %v3801_v51  ;;  %v1937_v10 = vmul.f32 %v3801_v51, %v1833_v41 }
0x29bc   :  { %v1922_v52 = vpop.permute.xlu0 %1921 }
0x29bd   :  { %v1924_v53 = vmul.f32 %v3801_v51, %v1922_v52 }
0x29bf   :  { %1926 = vrot.lane.b32.xlu1 %v1924_v53, %s3930_s13 }
0x2a25   :  { %v2111_v61 = vpop.f32.mrb[18].mxu1 }
0x2a26   :  { %v3440_v13 = vpop.f32.mrb[19].mxu1 }
0x2a31   :  { %v1927_v54 = vpop.permute.xlu1 %1926 }
0x2a32   :  { %v1929_v55 = vadd.f32 %v1927_v54, %v1839_v46 }
0x2a34   :  { %3802 = vtanh.f32 %v1929_v55 }
0x2a3e   :  { %v3803_v63 = vpop.eup %3802 }
0x2a3f   :  { %1933 = vrot.lane.b32.xlu0 %v3803_v63, %s3932_s18 }
0x2a43   :  { %2127 = vrot.lane.b32.xlu0 %v3064_v9, %s3930_s13 }
0x2ab1   :  { %v1934_v59 = vpop.permute.xlu0 %1933 }
0x2ab2   :  { %v1936_v11 = vmul.f32 %v1934_v59, %v1931_v8 }
0x2ab4   :  { %v1938_v12 = vadd.f32 %v1937_v10, %v1936_v11 }
0x2ab5   :  { %v4319_v15 = vpop.permute.xlu0 %2127 }
0x2ab6   :  { %1940 = vrot.lane.b32.xlu1 %v1938_v12, %s3932_s18  ;;  %v2130_v14 = vadd.f32 %v4319_v15, %v2111_v61 }
0x2aba   :  { %2132 = vrot.lane.b32.xlu1 %v2130_v14, %s3930_s13 }
0x2b28   :  { %v1941_v17 = vpop.permute.xlu1 %1940 }
0x2b29   :  { %1943 = vst.msk [vmem:[#allocation2 + $0x7] sm:$0x1] %vm258_vm2, %v1941_v17  ;;  %1944 = vst.msk [vmem:[#allocation8 + $0x1] sm:$0x1] %vm258_vm2, %v1941_v17 }
0x2b2c   :  { %v2133_v29 = vpop.permute.xlu1 %2132 }
0x2b30   :  { %v1952_v19 = vld [vmem:[#allocation2] sm:$0xff] }
0x2b31   :  { %3428 = vmatmul.mubr.msk.f32.vlgmr.msra.gmra.mrb[18].mxu0 %vm48_vm1, %v1952_v19 }
0x2b32   :  { %3651 = vmatpush3.bf16.msra.mxu0 %v4281_v18  ;;  %3449 = vmatprep.mubr.msk.f32.mxu0 %vm3928_vm0, %v3929_v1 }
0x2b33   :  { %3652 = vmatprep.subr.bf16.mxu0 %v3927_v0 }
0x2b36   :  { %3654 = vmatpush3.bf16.msra.mxu0 %v4284_v60 }
0x2b37   :  { %3661 = vmatprep.subr.bf16.mxu0 %v3927_v0 }
0x2c04   :  { %v2035_v21 = vpop.f32.mrb[18].mxu0 }
0x2c05   :  { %v2036_v22 = vadd.f32 %v3060_v20, %v2035_v21  ;;  %v3429_v23 = vpop.f32.mrb[19].mxu0 }
0x2c07   :  { %2039 = vst [vmem:[#allocation3] sm:$0xff] %v2036_v22 }
0x2c0e   :  { %v2041_v24 = vld [vmem:[#allocation3] sm:$0x1]  ;;  %v2158_v45 = vld [vmem:[#allocation3 + $0x1] sm:$0x1]  ;;  %v2263_v5 = vld [vmem:[#allocation3 + $0x2] sm:$0x1] }
0x2c0f   :  { %v2115_v25 = vadd.f32 %v2111_v61, %v2041_v24 }
0x2c11   :  { %v3063_v26 = vmul.f32 -1.442695, %v2115_v25 }
0x2c13   :  { %3804 = vpow2.f32 %v3063_v26  ;;  %v2368_v26 = vld [vmem:[#allocation3 + $0x3] sm:$0x1] }
0x2c1d   :  { %v3805_v27 = vpop.eup %3804 }
0x2c1e   :  { %v2119_v28 = vadd.f32 1.0, %v3805_v27 }
0x2c20   :  { %3806 = vrcp.f32 %v2119_v28 }
0x2c2a   :  { %v3807_v30 = vpop.eup %3806 }
0x2c2b   :  { %v2135_v31 = vmul.f32 %v3807_v30, %v2133_v29  ;;  %v2142_v36 = vsub.f32 1.0, %v3807_v30 }
0x2c2d   :  { %2137 = vrot.lane.b32.xlu0 %v2135_v31, %s3930_s13 }
0x2c31   :  { %2148 = vrot.lane.b32.xlu0 %v2040_v62, %s3931_s17 }
0x2c9f   :  { %v2138_v32 = vpop.permute.xlu0 %2137 }
0x2ca0   :  { %v2140_v33 = vadd.f32 %v2138_v32, %v2041_v24 }
0x2ca2   :  { %3808 = vtanh.f32 %v2140_v33 }
0x2ca3   :  { %v2149_v35 = vpop.permute.xlu0 %2148 }
0x2ca4   :  { %v2151_v38 = vmul.f32 %v3807_v30, %v2149_v35 }
0x2cac   :  { %v3809_v34 = vpop.eup %3808 }
0x2cad   :  { %2144 = vrot.lane.b32.xlu1 %v3809_v34, %s3932_s18 }
0x2d1f   :  { %v2145_v37 = vpop.permute.xlu1 %2144 }
0x2d20   :  { %v2147_v39 = vmul.f32 %v2145_v37, %v2142_v36 }
0x2d22   :  { %v2152_v40 = vadd.f32 %v2151_v38, %v2147_v39 }
0x2d24   :  { %2154 = vrot.lane.b32.xlu1 %v2152_v40, %s3932_s18 }
0x2d96   :  { %v2155_v41 = vpop.permute.xlu1 %2154 }
0x2d97   :  { %2157 = vst.msk [vmem:[#allocation2] sm:$0x1] %vm258_vm2, %v2155_v41  ;;  %3450 = vmatmul.mubr.msk.f32.vlgmr.msra.gmra.mrb[20].mxu0 %vm48_vm1, %v2155_v41 }
0x2d98   :  { %3663 = vmatpush3.bf16.msra.mxu0 %v4281_v18  ;;  %3471 = vmatprep.mubr.msk.f32.mxu0 %vm3928_vm0, %v3929_v1 }
0x2d99   :  { %3664 = vmatprep.subr.bf16.mxu0 %v3927_v0 }
0x2d9c   :  { %3666 = vmatpush3.bf16.msra.mxu0 %v4284_v60 }
0x2d9d   :  { %3673 = vmatprep.subr.bf16.mxu0 %v3927_v0 }
0x2e6a   :  { %v2227_v42 = vpop.f32.mrb[20].mxu0 }
0x2e6b   :  { %v2238_v43 = vadd.f32 %v2227_v42, %v4319_v15  ;;  %v3451_v44 = vpop.f32.mrb[21].mxu0  ;;  %v2231_v46 = vadd.f32 %v2227_v42, %v2158_v45 }
0x2e6d   :  { %2240 = vrot.lane.b32.xlu0 %v2238_v43, %s3930_s13  ;;  %v3066_v47 = vmul.f32 -1.442695, %v2231_v46  ;;  %v2473_v46 = vld [vmem:[#allocation3 + $0x4] sm:$0x1] }
0x2e6f   :  { %3810 = vpow2.f32 %v3066_v47 }
0x2e79   :  { %v3811_v48 = vpop.eup %3810 }
0x2e7a   :  { %v2235_v49 = vadd.f32 1.0, %v3811_v48 }
0x2e7c   :  { %3812 = vrcp.f32 %v2235_v49 }
0x2e86   :  { %v3813_v50 = vpop.eup %3812 }
0x2e87   :  { %v2250_v56 = vsub.f32 1.0, %v3813_v50  ;;  %v2256_v57 = vmul.f32 %v3813_v50, %v2152_v40 }
0x2edf   :  { %v2241_v51 = vpop.permute.xlu0 %2240 }
0x2ee0   :  { %v2243_v52 = vmul.f32 %v3813_v50, %v2241_v51 }
0x2ee2   :  { %2245 = vrot.lane.b32.xlu1 %v2243_v52, %s3930_s13 }
0x2f54   :  { %v2246_v53 = vpop.permute.xlu1 %2245 }
0x2f55   :  { %v2248_v54 = vadd.f32 %v2246_v53, %v2158_v45 }
0x2f57   :  { %3814 = vtanh.f32 %v2248_v54 }
0x2f61   :  { %v3815_v55 = vpop.eup %3814 }
0x2f62   :  { %2252 = vrot.lane.b32.xlu0 %v3815_v55, %s3932_s18 }
0x2fd4   :  { %v2253_v16 = vpop.permute.xlu0 %2252 }
0x2fd5   :  { %v2255_v58 = vmul.f32 %v2253_v16, %v2250_v56 }
0x2fd7   :  { %v2257_v62 = vadd.f32 %v2256_v57, %v2255_v58 }
0x2fd9   :  { %2259 = vrot.lane.b32.xlu1 %v2257_v62, %s3932_s18 }
0x304b   :  { %v2260_v63 = vpop.permute.xlu1 %2259 }
0x304c   :  { %2262 = vst.msk [vmem:[#allocation2 + $0x1] sm:$0x1] %vm258_vm2, %v2260_v63  ;;  %3461 = vmatmul.mubr.msk.f32.vlgmr.msra.gmra.mrb[20].mxu1 %vm48_vm1, %v2260_v63 }
0x304d   :  { %3669 = vmatpush3.bf16.msra.mxu1 %v4281_v18  ;;  %3482 = vmatprep.mubr.msk.f32.mxu1 %vm3928_vm0, %v3929_v1 }
0x304e   :  { %3670 = vmatprep.subr.bf16.mxu1 %v3927_v0 }
0x3051   :  { %3672 = vmatpush3.bf16.msra.mxu1 %v4284_v60 }
0x3052   :  { %3679 = vmatprep.subr.bf16.mxu1 %v3927_v0 }
0x311f   :  { %v2332_v2 = vpop.f32.mrb[20].mxu1 }
0x3120   :  { %v2343_v3 = vadd.f32 %v2332_v2, %v4319_v15  ;;  %v3462_v4 = vpop.f32.mrb[21].mxu1  ;;  %v2336_v6 = vadd.f32 %v2332_v2, %v2263_v5 }
0x3122   :  { %2345 = vrot.lane.b32.xlu0 %v2343_v3, %s3930_s13  ;;  %v3068_v7 = vmul.f32 -1.442695, %v2336_v6  ;;  %v2578_v6 = vld [vmem:[#allocation3 + $0x5] sm:$0x1] }
0x3124   :  { %3816 = vpow2.f32 %v3068_v7 }
0x312e   :  { %v3817_v8 = vpop.eup %3816 }
0x312f   :  { %v2340_v59 = vadd.f32 1.0, %v3817_v8 }
0x3131   :  { %3818 = vrcp.f32 %v2340_v59 }
0x313b   :  { %v3819_v9 = vpop.eup %3818 }
0x313c   :  { %v2355_v14 = vsub.f32 1.0, %v3819_v9  ;;  %v2361_v19 = vmul.f32 %v3819_v9, %v2257_v62 }
0x3194   :  { %v2346_v10 = vpop.permute.xlu0 %2345 }
0x3195   :  { %v2348_v11 = vmul.f32 %v3819_v9, %v2346_v10 }
0x3197   :  { %2350 = vrot.lane.b32.xlu1 %v2348_v11, %s3930_s13 }
0x3209   :  { %v2351_v12 = vpop.permute.xlu1 %2350 }
0x320a   :  { %v2353_v61 = vadd.f32 %v2351_v12, %v2263_v5 }
0x320c   :  { %3820 = vtanh.f32 %v2353_v61 }
0x3216   :  { %v3821_v13 = vpop.eup %3820 }
0x3217   :  { %2357 = vrot.lane.b32.xlu0 %v3821_v13, %s3932_s18 }
0x3289   :  { %v2358_v17 = vpop.permute.xlu0 %2357 }
0x328a   :  { %v2360_v20 = vmul.f32 %v2358_v17, %v2355_v14 }
0x328c   :  { %v2362_v21 = vadd.f32 %v2361_v19, %v2360_v20 }
0x328e   :  { %2364 = vrot.lane.b32.xlu1 %v2362_v21, %s3932_s18 }
0x3300   :  { %v2365_v22 = vpop.permute.xlu1 %2364 }
0x3301   :  { %2367 = vst.msk [vmem:[#allocation2 + $0x2] sm:$0x1] %vm258_vm2, %v2365_v22  ;;  %3472 = vmatmul.mubr.msk.f32.vlgmr.msra.gmra.mrb[22].mxu0 %vm48_vm1, %v2365_v22 }
0x3302   :  { %3675 = vmatpush3.bf16.msra.mxu0 %v4281_v18  ;;  %3493 = vmatprep.mubr.msk.f32.mxu0 %vm3928_vm0, %v3929_v1 }
0x3303   :  { %3676 = vmatprep.subr.bf16.mxu0 %v3927_v0 }
0x3306   :  { %3678 = vmatpush3.bf16.msra.mxu0 %v4284_v60 }
0x3307   :  { %3685 = vmatprep.subr.bf16.mxu0 %v3927_v0 }
0x33d4   :  { %v2437_v23 = vpop.f32.mrb[22].mxu0 }
0x33d5   :  { %v2448_v24 = vadd.f32 %v2437_v23, %v4319_v15  ;;  %v3473_v25 = vpop.f32.mrb[23].mxu0  ;;  %v2441_v27 = vadd.f32 %v2437_v23, %v2368_v26 }
0x33d6   :  { %v2683_v25 = vld [vmem:[#allocation3 + $0x6] sm:$0x1] }
0x33d7   :  { %2450 = vrot.lane.b32.xlu0 %v2448_v24, %s3930_s13  ;;  %v3070_v28 = vmul.f32 -1.442695, %v2441_v27 }
0x33d9   :  { %3822 = vpow2.f32 %v3070_v28 }
0x33e3   :  { %v3823_v29 = vpop.eup %3822 }
0x33e4   :  { %v2445_v30 = vadd.f32 1.0, %v3823_v29 }
0x33e6   :  { %3824 = vrcp.f32 %v2445_v30 }
0x33f0   :  { %v3825_v31 = vpop.eup %3824 }
0x33f1   :  { %v2460_v37 = vsub.f32 1.0, %v3825_v31  ;;  %v2466_v39 = vmul.f32 %v3825_v31, %v2362_v21 }
0x3449   :  { %v2451_v32 = vpop.permute.xlu0 %2450 }
0x344a   :  { %v2453_v33 = vmul.f32 %v3825_v31, %v2451_v32 }
0x344c   :  { %2455 = vrot.lane.b32.xlu1 %v2453_v33, %s3930_s13 }
0x34be   :  { %v2456_v34 = vpop.permute.xlu1 %2455 }
0x34bf   :  { %v2458_v35 = vadd.f32 %v2456_v34, %v2368_v26 }
0x34c1   :  { %3826 = vtanh.f32 %v2458_v35 }
0x34cb   :  { %v3827_v36 = vpop.eup %3826 }
0x34cc   :  { %2462 = vrot.lane.b32.xlu0 %v3827_v36, %s3932_s18 }
0x353e   :  { %v2463_v38 = vpop.permute.xlu0 %2462 }
0x353f   :  { %v2465_v40 = vmul.f32 %v2463_v38, %v2460_v37 }
0x3541   :  { %v2467_v41 = vadd.f32 %v2466_v39, %v2465_v40 }
0x3543   :  { %2469 = vrot.lane.b32.xlu1 %v2467_v41, %s3932_s18 }
0x35b5   :  { %v2470_v42 = vpop.permute.xlu1 %2469 }
0x35b6   :  { %2472 = vst.msk [vmem:[#allocation2 + $0x3] sm:$0x1] %vm258_vm2, %v2470_v42  ;;  %3483 = vmatmul.mubr.msk.f32.vlgmr.msra.gmra.mrb[22].mxu1 %vm48_vm1, %v2470_v42 }
0x35b7   :  { %3681 = vmatpush3.bf16.msra.mxu1 %v4281_v18  ;;  %3504 = vmatprep.mubr.msk.f32.mxu1 %vm3928_vm0, %v3929_v1 }
0x35b8   :  { %3682 = vmatprep.subr.bf16.mxu1 %v3927_v0 }
0x35bb   :  { %3684 = vmatpush3.bf16.msra.mxu1 %v4284_v60 }
0x35bc   :  { %3691 = vmatprep.subr.bf16.mxu1 %v3927_v0 }
0x3689   :  { %v2542_v43 = vpop.f32.mrb[22].mxu1 }
0x368a   :  { %v2553_v44 = vadd.f32 %v2542_v43, %v4319_v15  ;;  %v3484_v45 = vpop.f32.mrb[23].mxu1  ;;  %v2546_v47 = vadd.f32 %v2542_v43, %v2473_v46 }
0x368c   :  { %2555 = vrot.lane.b32.xlu0 %v2553_v44, %s3930_s13  ;;  %v3072_v48 = vmul.f32 -1.442695, %v2546_v47  ;;  %v2788_v44 = vld [vmem:[#allocation3 + $0x7] sm:$0x1] }
0x368e   :  { %3828 = vpow2.f32 %v3072_v48 }
0x3698   :  { %v3829_v49 = vpop.eup %3828 }
0x3699   :  { %v2550_v50 = vadd.f32 1.0, %v3829_v49 }
0x369b   :  { %3830 = vrcp.f32 %v2550_v50 }
0x36a5   :  { %v3831_v51 = vpop.eup %3830 }
0x36a6   :  { %v2565_v16 = vsub.f32 1.0, %v3831_v51  ;;  %v2571_v58 = vmul.f32 %v3831_v51, %v2467_v41 }
0x36fe   :  { %v2556_v52 = vpop.permute.xlu0 %2555 }
0x36ff   :  { %v2558_v53 = vmul.f32 %v3831_v51, %v2556_v52 }
0x3701   :  { %2560 = vrot.lane.b32.xlu1 %v2558_v53, %s3930_s13 }
0x3773   :  { %v2561_v54 = vpop.permute.xlu1 %2560 }
0x3774   :  { %v2563_v55 = vadd.f32 %v2561_v54, %v2473_v46 }
0x3776   :  { %3832 = vtanh.f32 %v2563_v55  ;;  %v2896_v55 = vld [vmem:[%s4468_s6 + $0x8] sm:$0xff] }
0x3780   :  { %v3833_v56 = vpop.eup %3832 }
0x3781   :  { %2567 = vrot.lane.b32.xlu0 %v3833_v56, %s3932_s18  ;;  %v2897_v56 = vld [vmem:[%s4468_s6 + $0x10] sm:$0xff] }
0x37f3   :  { %v2568_v57 = vpop.permute.xlu0 %2567 }
0x37f4   :  { %v2570_v62 = vmul.f32 %v2568_v57, %v2565_v16  ;;  %v2898_v57 = vld [vmem:[%s4468_s6 + $0x18] sm:$0xff] }
0x37f6   :  { %v2572_v63 = vadd.f32 %v2571_v58, %v2570_v62  ;;  %v3695_v58 = vpack.c.bf16 %v2898_v57, %v2897_v56 }
0x37f8   :  { %2574 = vrot.lane.b32.xlu1 %v2572_v63, %s3932_s18 }
0x386a   :  { %v2575_v2 = vpop.permute.xlu1 %2574 }
0x386b   :  { %2577 = vst.msk [vmem:[#allocation2 + $0x4] sm:$0x1] %vm258_vm2, %v2575_v2  ;;  %3494 = vmatmul.mubr.msk.f32.vlgmr.msra.gmra.mrb[24].mxu0 %vm48_vm1, %v2575_v2 }
0x386c   :  { %3687 = vmatpush3.bf16.msra.mxu0 %v4281_v18  ;;  %3515 = vmatprep.mubr.msk.f32.mxu0 %vm3928_vm0, %v3929_v1 }
0x386d   :  { %3688 = vmatprep.subr.bf16.mxu0 %v3927_v0 }
0x3870   :  { %3690 = vmatpush3.bf16.msra.mxu0 %v4284_v60 }
0x393e   :  { %v2647_v3 = vpop.f32.mrb[24].mxu0 }
0x393f   :  { %v2658_v4 = vadd.f32 %v2647_v3, %v4319_v15  ;;  %v3495_v5 = vpop.f32.mrb[25].mxu0  ;;  %v2651_v7 = vadd.f32 %v2647_v3, %v2578_v6 }
0x3941   :  { %2660 = vrot.lane.b32.xlu0 %v2658_v4, %s3930_s13  ;;  %v3074_v8 = vmul.f32 -1.442695, %v2651_v7 }
0x3943   :  { %3834 = vpow2.f32 %v3074_v8 }
0x394d   :  { %v3835_v59 = vpop.eup %3834 }
0x394e   :  { %v2655_v9 = vadd.f32 1.0, %v3835_v59 }
0x3950   :  { %3836 = vrcp.f32 %v2655_v9 }
0x395a   :  { %v3837_v18 = vpop.eup %3836 }
0x395b   :  { %v2670_v13 = vsub.f32 1.0, %v3837_v18  ;;  %v2676_v17 = vmul.f32 %v3837_v18, %v2572_v63 }
0x39b3   :  { %v2661_v10 = vpop.permute.xlu0 %2660 }
0x39b4   :  { %v2663_v11 = vmul.f32 %v3837_v18, %v2661_v10 }
0x39b6   :  { %2665 = vrot.lane.b32.xlu1 %v2663_v11, %s3930_s13 }
0x3a28   :  { %v2666_v12 = vpop.permute.xlu1 %2665 }
0x3a29   :  { %v2668_v60 = vadd.f32 %v2666_v12, %v2578_v6 }
0x3a2b   :  { %3838 = vtanh.f32 %v2668_v60 }
0x3a35   :  { %v3839_v61 = vpop.eup %3838 }
0x3a36   :  { %2672 = vrot.lane.b32.xlu0 %v3839_v61, %s3932_s18 }
0x3aa8   :  { %v2673_v14 = vpop.permute.xlu0 %2672 }
0x3aa9   :  { %v2675_v19 = vmul.f32 %v2673_v14, %v2670_v13 }
0x3aab   :  { %v2677_v20 = vadd.f32 %v2676_v17, %v2675_v19 }
0x3aad   :  { %2679 = vrot.lane.b32.xlu1 %v2677_v20, %s3932_s18 }
0x3b1f   :  { %v2680_v21 = vpop.permute.xlu1 %2679 }
0x3b20   :  { %2682 = vst.msk [vmem:[#allocation2 + $0x5] sm:$0x1] %vm258_vm2, %v2680_v21  ;;  %3505 = vmatmul.mubr.msk.f32.vlgmr.msra.gmra.mrb[24].mxu1 %vm48_vm1, %v2680_v21 }
0x3b21   :  { %3526 = vmatprep.mubr.msk.f32.mxu1 %vm3928_vm0, %v3929_v1 }
0x3bf3   :  { %v2752_v22 = vpop.f32.mrb[24].mxu1 }
0x3bf4   :  { %v2763_v23 = vadd.f32 %v2752_v22, %v4319_v15  ;;  %v3506_v24 = vpop.f32.mrb[25].mxu1  ;;  %v2756_v26 = vadd.f32 %v2752_v22, %v2683_v25 }
0x3bf6   :  { %2765 = vrot.lane.b32.xlu0 %v2763_v23, %s3930_s13  ;;  %v3076_v27 = vmul.f32 -1.442695, %v2756_v26 }
0x3bf8   :  { %3840 = vpow2.f32 %v3076_v27 }
0x3c02   :  { %v3841_v28 = vpop.eup %3840 }
0x3c03   :  { %v2760_v29 = vadd.f32 1.0, %v3841_v28 }
0x3c05   :  { %3842 = vrcp.f32 %v2760_v29 }
0x3c0f   :  { %v3843_v30 = vpop.eup %3842 }
0x3c10   :  { %v2775_v35 = vsub.f32 1.0, %v3843_v30  ;;  %v2781_v37 = vmul.f32 %v3843_v30, %v2677_v20 }
0x3c68   :  { %v2766_v31 = vpop.permute.xlu0 %2765 }
0x3c69   :  { %v2768_v32 = vmul.f32 %v3843_v30, %v2766_v31 }
0x3c6b   :  { %2770 = vrot.lane.b32.xlu1 %v2768_v32, %s3930_s13 }
0x3cdd   :  { %v2771_v33 = vpop.permute.xlu1 %2770 }
0x3cde   :  { %v2773_v1 = vadd.f32 %v2771_v33, %v2683_v25 }
0x3ce0   :  { %3844 = vtanh.f32 %v2773_v1 }
0x3cea   :  { %v3845_v34 = vpop.eup %3844 }
0x3ceb   :  { %2777 = vrot.lane.b32.xlu0 %v3845_v34, %s3932_s18 }
0x3d5d   :  { %v2778_v36 = vpop.permute.xlu0 %2777 }
0x3d5e   :  { %v2780_v38 = vmul.f32 %v2778_v36, %v2775_v35 }
0x3d60   :  { %v2782_v39 = vadd.f32 %v2781_v37, %v2780_v38 }
0x3d62   :  { %2784 = vrot.lane.b32.xlu1 %v2782_v39, %s3932_s18 }
0x3dd4   :  { %v2785_v40 = vpop.permute.xlu1 %2784 }
0x3dd5   :  { %2787 = vst.msk [vmem:[#allocation2 + $0x6] sm:$0x1] %vm258_vm2, %v2785_v40  ;;  %3516 = vmatmul.mubr.msk.f32.vlgmr.msra.gmra.mrb[26].mxu0 %vm48_vm1, %v2785_v40 }
0x3ea8   :  { %v2857_v41 = vpop.f32.mrb[26].mxu0 }
0x3ea9   :  { %v2868_v42 = vadd.f32 %v2857_v41, %v4319_v15  ;;  %v3517_v43 = vpop.f32.mrb[27].mxu0  ;;  %v2861_v45 = vadd.f32 %v2857_v41, %v2788_v44  ;;  %v2895_v15 = vld [vmem:[%s4468_s6] sm:$0xff]  ;;  %s3933_s6 = smov [#allocation8]  }
0x3eaa   :  { %v3692_v16 = vpack.c.bf16 %v2896_v55, %v2895_v15  ;;  %s2997_s28 = sshll.u32 %s3933_s6, 4  ;;  %s2998_s28 = int_to_ptr.vmem [resolvable:$true] %s2997_s28 }
0x3eab   :  { %2870 = vrot.lane.b32.xlu0 %v2868_v42, %s3930_s13  ;;  %v3078_v46 = vmul.f32 -1.442695, %v2861_v45  ;;  %s3874_s29 = scalar_lea.vmem %s2998_s28, 64  ;;  %p3879_p9 = scmp.lt.s32.totalorder %s2998_s28, %s2998_s28 }
0x3eac   :  { %3693 = vmatpush3.bf16.msra.mxu1 %v3692_v16  ;;  %p3875_p8 = scmp.ne.s32.totalorder %s2998_s28, %s3874_s29  ;;  %p3880_p10 = scmp.lt.s32.totalorder %s3874_s29, %s3874_s29 }
0x3ead   :  { %3846 = vpow2.f32 %v3078_v46  ;;  %3694 = vmatprep.subr.bf16.mxu1 %v3927_v0 }
0x3eae   :  { %p3881_p11 = por %p3880_p10, %p3879_p9 }
0x3eb0   :  { %3696 = vmatpush3.bf16.msra.mxu1 %v3695_v58  ;;  %p3882_p12 = pnand %p3881_p11, %p3875_p8 }
0x3eb7   :  { %v3847_v47 = vpop.eup %3846 }
0x3eb8   :  { %v2865_v48 = vadd.f32 1.0, %v3847_v47 }
0x3eba   :  { %3848 = vrcp.f32 %v2865_v48 }
0x3ec4   :  { %v3849_v49 = vpop.eup %3848 }
0x3ec5   :  { %v2880_v62 = vsub.f32 1.0, %v3849_v49  ;;  %v2886_v2 = vmul.f32 %v3849_v49, %v2782_v39 }
0x3f1d   :  { %v2871_v50 = vpop.permute.xlu0 %2870 }
0x3f1e   :  { %v2873_v51 = vmul.f32 %v3849_v49, %v2871_v50 }
0x3f20   :  { %2875 = vrot.lane.b32.xlu1 %v2873_v51, %s3930_s13 }
0x3f92   :  { %v2876_v52 = vpop.permute.xlu1 %2875 }
0x3f93   :  { %v2878_v53 = vadd.f32 %v2876_v52, %v2788_v44 }
0x3f95   :  { %3850 = vtanh.f32 %v2878_v53 }
0x3f9f   :  { %v3851_v54 = vpop.eup %3850 }
0x3fa0   :  { %2882 = vrot.lane.b32.xlu0 %v3851_v54, %s3932_s18 }
0x4012   :  { %v2883_v63 = vpop.permute.xlu0 %2882 }
0x4013   :  { %v2885_v3 = vmul.f32 %v2883_v63, %v2880_v62 }
0x4015   :  { %v2887_v4 = vadd.f32 %v2886_v2, %v2885_v3 }
0x4017   :  { %2889 = vrot.lane.b32.xlu1 %v2887_v4, %s3932_s18 }
0x4089   :  { %v2890_v5 = vpop.permute.xlu1 %2889 }
0x408a   :  { %2892 = vst.msk [vmem:[#allocation2 + $0x7] sm:$0x1] %vm258_vm2, %v2890_v5  ;;  %2893 = vst.msk [vmem:[#allocation8 + $0x2] sm:$0x1] %vm258_vm2, %v2890_v5 }
0x4091   :  { %v2894_v6 = vld [vmem:[#allocation2] sm:$0xff] }
0x4092   :  { %3527 = vmatmul.mubr.msk.f32.vlgmr.msra.gmra.mrb[26].mxu1 %vm48_vm1, %v2894_v6 }
0x4093   :  { %3885 = shalt.err (!%p3882_p12)
}
0x4094   :  { %s3886_s10 = scalar_lea.hbm %s4471_s9, 64 }
0x4095   :  { %p3887_p13 = scmp.ne.s32.totalorder %s4471_s9, %s3886_s10  ;;  %p3890_p0 = scmp.lt.u32.totalorder %s3886_s10, %s4471_s9 }
0x4097   :  { %p3892_p1 = pnand %p3890_p0, %p3887_p13 }
0x4099   :  { %3895 = shalt.err (!%p3892_p1)
}
0x409a   :  { %3000 = dma.vmem_to_hbm [thread:$0]  %s2998_s28, 64, %s4471_s9, [#allocation9]   ;;  %v3079_v0 = vld [vmem:[%s4469_s7] ss:$0 sm:$0xff]  ;;  %vm2979_vm3 = vcmask 130048  }
0x409b   :  { %s3934_s20 = smov [#allocation7]  }
0x409c   :  { %s2987_s21 = sshll.u32 %s3934_s20, 4  ;;  %s2988_s21 = int_to_ptr.vmem [resolvable:$true] %s2987_s21 }
0x409d   :  { %s3896_s22 = scalar_lea.vmem %s2988_s21, 128  ;;  %p3901_p3 = scmp.lt.s32.totalorder %s2988_s21, %s2988_s21 }
0x409e   :  { %p3897_p2 = scmp.ne.s32.totalorder %s2988_s21, %s3896_s22  ;;  %p3902_p4 = scmp.lt.s32.totalorder %s3896_s22, %s3896_s22 }
0x40a0   :  { %p3903_p5 = por %p3902_p4, %p3901_p3 }
0x40a2   :  { %p3904_p6 = pnand %p3903_p5, %p3897_p2 }
0x4165   :  { %v2975_v7 = vpop.f32.mrb[26].mxu1 }
0x4166   :  { %v2976_v8 = vadd.f32 %v3079_v0, %v2975_v7  ;;  %v3528_v59 = vpop.f32.mrb[27].mxu1 }
0x4168   :  { %2980 = vst.msk [vmem:[#allocation7] sm:$0xff] %vm2979_vm3, %v2976_v8 }
0x4169   :  { %3907 = shalt.err (!%p3904_p6)
}
0x416a   :  { %s3908_s2 = scalar_lea.hbm %s4470_s8, 128 }
0x416b   :  { %p3909_p7 = scmp.ne.s32.totalorder %s4470_s8, %s3908_s2  ;;  %p3912_p8 = scmp.lt.u32.totalorder %s3908_s2, %s4470_s8 }
0x416d   :  { %p3914_p9 = pnand %p3912_p8, %p3909_p7 }
0x416f   :  { %3917 = shalt.err (!%p3914_p9)
}
0x4170   :  { %2990 = dma.vmem_to_hbm [thread:$0]  %s2988_s21, 128, %s4470_s8, [#allocation6]  }
0x4171   :  { %3920 = dma.done.wait [#allocation6], 128  }
0x4172   :  { %3921 = vsyncadd [#allocation6], 4294967168 }
0x4173   :  { %3922 = dma.done.wait [#allocation9], 64  }
0x4174   :  { %3923 = vsyncadd [#allocation9], 4294967232 }
0x4175   :  { %3007 = vsyncpa [#allocation5], 1 }
0x4176   :  { %3008 = vsyncpa [#allocation6], 1 }
0x4177   :  { %3009 = vsyncpa [#allocation9], 1 }

</bundles_post_ra>
